<compile_context>
chip_gen: v7x
topology: tpu7x:2x2x1
jax: 0.10.0
libtpu: 0.0.40
codegen_flags: <defaults>
</compile_context>

<pallas_src>
import functools

import numpy as np

import jax
import jax.numpy as jnp
from jax import lax
from jax.experimental import pallas as pl
from jax.experimental.pallas import tpu as pltpu


# ----------------------------- Pallas kernel ------------------------------- #

def _pw_mac(x, w, b):
    """Pointwise (1x1x1) conv as a VPU broadcast-MAC over the input channels.

    x: (Bt, Cin, S) f32,  w: (Cout, Cin) f32,  b: (Cout, 1) f32 -> (Bt, Cout, S).

    TODO(synk): at production widths (>=~32 channels) switch this to a bf16
    jnp.dot / einsum on the MXU (use fp8, not int8, if quantizing for v7x).
    """
    bt, cin, S = x.shape
    cout = w.shape[0]
    acc = jnp.zeros((bt, cout, S), jnp.float32)
    for c in range(cin):
        wc = w[:, c:c + 1].reshape(1, cout, 1)        # (1, Cout, 1)
        acc = acc + wc * x[:, c:c + 1, :]             # -> (Bt, Cout, S)
    return acc + b                                     # (Cout,1) broadcasts


def _fused_shuffle_block_kernel(x_ref, w1_ref, b1_ref, wm_ref, b2_ref,
                                w3_ref, b3_ref, o_ref, midp_ref, *,
                                cin, cmid, cout, T, H, W, kt, ks, K):
    """Bt batch elements per grid step; every intermediate stays in VMEM.

    x_ref   : (Bt, cin, 2*S) f32  lanes [0:S] = even channels (pass-through),
                                  lanes [S:2S] = odd channels (branch input)
    w1_ref  : (cmid, cin)  f32    1x1x1 conv #1, BN1 scale folded in
    b1_ref  : (cmid, 1)    f32
    wm_ref  : (ntap, cmid, S) f32 depthwise taps with BN2 scale AND the per-tap
                                  boundary mask folded in
    b2_ref  : (cmid, 1)    f32
    w3_ref  : (cout, cmid) f32    1x1x1 conv #2, BN3 scale folded in
    b3_ref  : (cout, 1)    f32
    o_ref   : (Bt, cin+cout, S) f32   out = [x_proj ; branch_main(x)]
    midp_ref: (Bt, cmid, S+2K) f32    flat, zero-padded mid activation scratch
    """
    S = T * H * W
    HW = H * W
    Bt = x_ref.shape[0]

    x = x_ref[...]                                    # (Bt, cin, 2S)
    x_proj = x[:, :, :S]                              # pass-through half (exact)
    x_b = x[:, :, S:]                                 # branch_main input half

    # ---- stage 1: 1x1x1 conv + folded BN + ReLU ---------------------------
    mid = jnp.maximum(_pw_mac(x_b, w1_ref[...], b1_ref[...]), 0.0)

    # ---- stage 2: depthwise (kt, ks, ks) conv + folded BN ------------------
    # Flat-spatial trick: tap (dt,dh,dw) reads position s + dt*HW + dh*W + dw.
    # Boundary masks are folded into wm_ref, so boundary-crossing positions
    # contribute exactly 0 with a single mul+add per tap; out-of-range reads
    # land in the zeroed pad of the scratch (K >= max tap shift).
    # Pad zeroing is intentionally unconditional: see header note on megacore.
    zpad = jnp.zeros((Bt, cmid, K), jnp.float32)
    midp_ref[:, :, :K] = zpad
    midp_ref[:, :, K + S:] = zpad
    midp_ref[:, :, K:K + S] = mid

    pt, ps = kt // 2, ks // 2
    acc = jnp.zeros((Bt, cmid, S), jnp.float32)
    tap = 0
    for dt in range(-pt, pt + 1):
        for dh in range(-ps, ps + 1):
            for dw in range(-ps, ps + 1):
                shift = dt * HW + dh * W + dw
                src = midp_ref[:, :, K + shift:K + shift + S]   # (Bt, cmid, S)
                acc = acc + src * wm_ref[tap]                   # masked weight
                tap += 1
    h2 = acc + b2_ref[...]

    # ---- stage 3: 1x1x1 conv + folded BN + ReLU ---------------------------
    y = jnp.maximum(_pw_mac(h2, w3_ref[...], b3_ref[...]), 0.0)

    # ---- fused channel-shuffle concat: one full-tile unmasked store --------
    o_ref[...] = jnp.concatenate([x_proj, y], axis=1)           # (Bt, C, S)


# ------------------------------ host-side glue ------------------------------ #

def _build_tap_masks(T, H, W, kt, ks):
    """(kt*ks*ks, S) f32 masks: 1 where the shifted tap stays inside T/H/W."""
    S = T * H * W
    s = np.arange(S)
    t, h, w = s // (H * W), (s // W) % H, s % W
    pt, ps = kt // 2, ks // 2
    rows = []
    for dt in range(-pt, pt + 1):
        for dh in range(-ps, ps + 1):
            for dw in range(-ps, ps + 1):
                ok = ((t + dt >= 0) & (t + dt < T) &
                      (h + dh >= 0) & (h + dh < H) &
                      (w + dw >= 0) & (w + dw < W))
                rows.append(ok.astype(np.float32))
    return np.stack(rows)


def _prepare_kernel_params(params, T, H, W, kt, ks):
    """Fold inference-mode BN scales into the conv weights and fold the per-tap
    boundary masks into the depthwise weights (single mul+add per tap)."""
    w1, s1, b1, dw, s2, b2, w3, s3, b3 = params
    cmid = w1.shape[1]
    cout = w3.shape[1]
    w1_eff = (w1 * s1).T                      # (cmid, cin)
    b1_col = b1.reshape(cmid, 1)
    dwt_eff = (dw * s2).T                     # (cmid, ntap)
    b2_col = b2.reshape(cmid, 1)
    w3_eff = (w3 * s3).T                      # (cout, cmid)
    b3_col = b3.reshape(cout, 1)
    masks = jnp.asarray(_build_tap_masks(T, H, W, kt, ks))       # (ntap, S)
    wm = dwt_eff.T[:, :, None] * masks[:, None, :]               # (ntap, cmid, S)
    return w1_eff, b1_col, wm, b2_col, w3_eff, b3_col


def shufflev2_block_forward(old_x, params, *, ksize=3, stride=1, batch_tile=None):
    """Forward of ShuffleV2Block. old_x: NCDHW (B, C, T, H, W), C even, f32."""
    assert stride == 1  # TODO(synk): stride=2 (branch_proj) path not implemented.
    B, C, T, H, W = old_x.shape
    assert C % 2 == 0
    cin = C // 2
    w1, w3 = params[0], params[6]
    cmid, cout = w1.shape[1], w3.shape[1]
    assert w1.shape[0] == cin and cin + cout == C
    kt = 3
    S = T * H * W
    HW = H * W
    ntap = kt * ksize * ksize

    # Batch tiling: several elements per grid step to amortize per-step
    # pipeline overhead; keep the grid even so both v7x TensorCores get work
    # (v5e/v6e have a single TC and are fine either way).
    if batch_tile is None:
        batch_tile = B // 2 if (B % 2 == 0 and B > 1) else B
    assert B % batch_tile == 0
    Bt = batch_tile

    w1_eff, b1_col, wm, b2_col, w3_eff, b3_col = _prepare_kernel_params(
        params, T, H, W, kt, ksize)

    # Scratch pad width, rounded to 128 lanes so the interior store stays
    # vreg-aligned.  Invariants: K >= max_shift, and every flat-index overflow
    # crosses a masked T/H/W boundary (so the folded weight there is 0).
    max_shift = (kt // 2) * HW + (ksize // 2) * W + (ksize // 2)
    K = ((max_shift + 127) // 128) * 128

    # channel_shuffle's even/odd split is a FREE reshape: (B,C,T,H,W) ->
    # (B, C//2, 2*S) puts the even channel of a pair in lanes [0:S] and the odd
    # one in lanes [S:2S].  Activations stay f32 end-to-end so the pass-through
    # half is bit-exact; bf16 branch I/O is a production (HBM-bound) option.
    x_flat = old_x.reshape(B, cin, 2 * S)

    kernel = functools.partial(
        _fused_shuffle_block_kernel, cin=cin, cmid=cmid, cout=cout,
        T=T, H=H, W=W, kt=kt, ks=ksize, K=K)

    # NOTE: the tiny weight/bias operands (<300 KB total incl. the masked
    # depthwise slab) could be packed into one lane-padded array (review item);
    # kept separate for clarity — a negligible fraction of VMEM here.
    out = pl.pallas_call(
        kernel,
        out_shape=jax.ShapeDtypeStruct((B, C, S), jnp.float32),
        grid=(B // Bt,),
        in_specs=[
            pl.BlockSpec((Bt, cin, 2 * S), lambda g: (g, 0, 0)),
            pl.BlockSpec((cmid, cin), lambda g: (0, 0)),
            pl.BlockSpec((cmid, 1), lambda g: (0, 0)),
            pl.BlockSpec((ntap, cmid, S), lambda g: (0, 0, 0)),
            pl.BlockSpec((cmid, 1), lambda g: (0, 0)),
            pl.BlockSpec((cout, cmid), lambda g: (0, 0)),
            pl.BlockSpec((cout, 1), lambda g: (0, 0)),
        ],
        out_specs=pl.BlockSpec((Bt, C, S), lambda g: (g, 0, 0)),
        scratch_shapes=[pltpu.VMEM((Bt, cmid, S + 2 * K), jnp.float32)],
        compiler_params=pltpu.CompilerParams(
            dimension_semantics=("parallel",),
            vmem_limit_bytes=32 * 1024 * 1024),
    )(x_flat, w1_eff, b1_col, wm, b2_col, w3_eff, b3_col)

    return out.reshape(B, C, T, H, W)   # free reshape back to NCDHW


# ------------------------- deterministic parameters ------------------------- #

def init_params(key, inp, mid, outputs, ksize):
    ks = jax.random.split(key, 15)

    def folded_bn(kg, kb, km, kv, c):
        eps = 1e-5
        gamma = jax.random.uniform(kg, (c,), minval=0.5, maxval=1.5)
        beta = jax.random.normal(kb, (c,)) * 0.1
        mean = jax.random.normal(km, (c,)) * 0.1
        var = jax.random.uniform(kv, (c,), minval=0.5, maxval=1.5)
        scale = gamma / jnp.sqrt(var + eps)
        shift = beta - mean * scale
        return (scale.reshape(1, c).astype(jnp.float32),
                shift.reshape(1, c).astype(jnp.float32))

    w1 = (jax.random.normal(ks[0], (inp, mid)) * 0.2).astype(jnp.float32)
    dw = (jax.random.normal(ks[1], (3 * ksize * ksize, mid)) * 0.2).astype(jnp.float32)
    w3 = (jax.random.normal(ks[2], (mid, outputs)) * 0.2).astype(jnp.float32)
    s1, b1 = folded_bn(ks[3], ks[4], ks[5], ks[6], mid)
    s2, b2 = folded_bn(ks[7], ks[8], ks[9], ks[10], mid)
    s3, b3 = folded_bn(ks[11], ks[12], ks[13], ks[14], outputs)
    return (w1, s1, b1, dw, s2, b2, w3, s3, b3)


# ------------------------------ pure-JAX reference --------------------------- #

def reference_forward(old_x, params, *, ksize=3):
    w1, s1, b1, dw, s2, b2, w3, s3, b3 = params
    cmid = w1.shape[1]
    pad = ksize // 2
    x_proj = old_x[:, 0::2]
    x = old_x[:, 1::2]
    xc = jnp.transpose(x, (0, 2, 3, 4, 1))
    h = jnp.maximum(
        jnp.einsum('bthwc,cm->bthwm', xc, w1,
                   precision=lax.Precision.HIGHEST) * s1[0] + b1[0], 0.0)
    dw_w = dw.reshape(3, ksize, ksize, 1, cmid)
    hd = lax.conv_general_dilated(
        h, dw_w, window_strides=(1, 1, 1),
        padding=((1, 1), (pad, pad), (pad, pad)),
        dimension_numbers=('NDHWC', 'DHWIO', 'NDHWC'),
        feature_group_count=cmid, precision=lax.Precision.HIGHEST)
    h2 = hd * s2[0] + b2[0]
    y = jnp.maximum(
        jnp.einsum('bthwm,mo->bthwo', h2, w3,
                   precision=lax.Precision.HIGHEST) * s3[0] + b3[0], 0.0)
    y = jnp.transpose(y, (0, 4, 1, 2, 3))
    return jnp.concatenate([x_proj, y], axis=1)


# ----------------------------------- main ----------------------------------- #

if __name__ == "__main__":
    # B=8 -> Bt=4 per grid step, grid=(2,): both v7x TensorCores get one
    # well-amortized step; v5e/v6e run the 2 pipelined steps on their single TC.
    B, oup, T, H, W = 8, 8, 4, 8, 8
    ksize = 3
    inp = oup // 2           # stride=1 => block input has `oup` channels, inp = oup//2
    mid = 8                  # mid_channels
    outputs = oup - inp

    key = jax.random.PRNGKey(0)
    kx, kp = jax.random.split(key)
    old_x = jax.random.normal(kx, (B, oup, T, H, W), dtype=jnp.float32)
    params = init_params(kp, inp, mid, outputs, ksize)

    fwd = jax.jit(functools.partial(shufflev2_block_forward, ksize=ksize, stride=1))
    out = fwd(old_x, params)
    jax.block_until_ready(out)

    ref = reference_forward(old_x, params, ksize=ksize)
    assert out.shape == (B, oup, T, H, W), out.shape
    max_err = float(jnp.max(jnp.abs(out - ref)))
    assert max_err < 1e-3, f"mismatch vs reference, max_err={max_err}"
    print("KERNEL_OK")
</pallas_src>

<mosaic_0001>
module attributes {stable_mosaic.version = 11 : i64} {
  func.func @_fused_shuffle_block_kernel(%arg0: i32, %arg1: memref<4x4x512xf32, #tpu.memory_space<vmem>>, %arg2: memref<8x4xf32, #tpu.memory_space<vmem>>, %arg3: memref<8x1xf32, #tpu.memory_space<vmem>>, %arg4: memref<27x8x256xf32, #tpu.memory_space<vmem>>, %arg5: memref<8x1xf32, #tpu.memory_space<vmem>>, %arg6: memref<4x8xf32, #tpu.memory_space<vmem>>, %arg7: memref<4x1xf32, #tpu.memory_space<vmem>>, %arg8: memref<4x8x256xf32, #tpu.memory_space<vmem>>, %arg9: memref<4x8x512xf32, #tpu.memory_space<vmem>>) attributes {dimension_semantics = [#tpu.dimension_semantics<parallel>], iteration_bounds = array<i64: 2>, scalar_prefetch = 0 : i64, scratch_operands = 1 : i64, tpu.core_type = #tpu.core_type<tc>, window_params = [{transform_indices = @transform_0, window_bounds = array<i64: 4, 4, 512>}, {pipeline_mode = #tpu.pipeline_mode<synchronous>, transform_indices = @transform_1, window_bounds = array<i64: 8, 4>}, {pipeline_mode = #tpu.pipeline_mode<synchronous>, transform_indices = @transform_2, window_bounds = array<i64: 8, 1>}, {pipeline_mode = #tpu.pipeline_mode<synchronous>, transform_indices = @transform_3, window_bounds = array<i64: 27, 8, 256>}, {pipeline_mode = #tpu.pipeline_mode<synchronous>, transform_indices = @transform_4, window_bounds = array<i64: 8, 1>}, {pipeline_mode = #tpu.pipeline_mode<synchronous>, transform_indices = @transform_5, window_bounds = array<i64: 4, 8>}, {pipeline_mode = #tpu.pipeline_mode<synchronous>, transform_indices = @transform_6, window_bounds = array<i64: 4, 1>}, {transform_indices = @transform_7, window_bounds = array<i64: 4, 8, 256>}]} {
    %c0 = arith.constant 0 : index
    %c0_0 = arith.constant 0 : index
    %c0_1 = arith.constant 0 : index
    %0 = vector.load %arg1[%c0, %c0_0, %c0_1] : memref<4x4x512xf32, #tpu.memory_space<vmem>>, vector<4x4x512xf32>
    %1 = vector.extract_strided_slice %0 {offsets = [0, 0, 0], sizes = [4, 4, 256], strides = [1, 1, 1]} : vector<4x4x512xf32> to vector<4x4x256xf32>
    %2 = vector.extract_strided_slice %0 {offsets = [0, 0, 256], sizes = [4, 4, 256], strides = [1, 1, 1]} : vector<4x4x512xf32> to vector<4x4x256xf32>
    %c0_2 = arith.constant 0 : index
    %c0_3 = arith.constant 0 : index
    %3 = vector.load %arg2[%c0_2, %c0_3] : memref<8x4xf32, #tpu.memory_space<vmem>>, vector<8x4xf32>
    %c0_4 = arith.constant 0 : index
    %c0_5 = arith.constant 0 : index
    %4 = vector.load %arg3[%c0_4, %c0_5] : memref<8x1xf32, #tpu.memory_space<vmem>>, vector<8x1xf32>
    %cst = arith.constant 0.000000e+00 : f32
    %5 = vector.broadcast %cst : f32 to vector<4x8x256xf32>
    %6 = vector.extract_strided_slice %3 {offsets = [0, 0], sizes = [8, 1], strides = [1, 1]} : vector<8x4xf32> to vector<8x1xf32>
    %7 = vector.shape_cast %6 : vector<8x1xf32> to vector<1x8x1xf32>
    %8 = vector.extract_strided_slice %2 {offsets = [0, 0, 0], sizes = [4, 1, 256], strides = [1, 1, 1]} : vector<4x4x256xf32> to vector<4x1x256xf32>
    %9 = vector.broadcast %7 : vector<1x8x1xf32> to vector<4x8x256xf32>
    %10 = vector.broadcast %8 : vector<4x1x256xf32> to vector<4x8x256xf32>
    %11 = arith.mulf %9, %10 : vector<4x8x256xf32>
    %12 = arith.addf %5, %11 : vector<4x8x256xf32>
    %13 = vector.extract_strided_slice %3 {offsets = [0, 1], sizes = [8, 1], strides = [1, 1]} : vector<8x4xf32> to vector<8x1xf32>
    %14 = vector.shape_cast %13 : vector<8x1xf32> to vector<1x8x1xf32>
    %15 = vector.extract_strided_slice %2 {offsets = [0, 1, 0], sizes = [4, 1, 256], strides = [1, 1, 1]} : vector<4x4x256xf32> to vector<4x1x256xf32>
    %16 = vector.broadcast %14 : vector<1x8x1xf32> to vector<4x8x256xf32>
    %17 = vector.broadcast %15 : vector<4x1x256xf32> to vector<4x8x256xf32>
    %18 = arith.mulf %16, %17 : vector<4x8x256xf32>
    %19 = arith.addf %12, %18 : vector<4x8x256xf32>
    %20 = vector.extract_strided_slice %3 {offsets = [0, 2], sizes = [8, 1], strides = [1, 1]} : vector<8x4xf32> to vector<8x1xf32>
    %21 = vector.shape_cast %20 : vector<8x1xf32> to vector<1x8x1xf32>
    %22 = vector.extract_strided_slice %2 {offsets = [0, 2, 0], sizes = [4, 1, 256], strides = [1, 1, 1]} : vector<4x4x256xf32> to vector<4x1x256xf32>
    %23 = vector.broadcast %21 : vector<1x8x1xf32> to vector<4x8x256xf32>
    %24 = vector.broadcast %22 : vector<4x1x256xf32> to vector<4x8x256xf32>
    %25 = arith.mulf %23, %24 : vector<4x8x256xf32>
    %26 = arith.addf %19, %25 : vector<4x8x256xf32>
    %27 = vector.extract_strided_slice %3 {offsets = [0, 3], sizes = [8, 1], strides = [1, 1]} : vector<8x4xf32> to vector<8x1xf32>
    %28 = vector.shape_cast %27 : vector<8x1xf32> to vector<1x8x1xf32>
    %29 = vector.extract_strided_slice %2 {offsets = [0, 3, 0], sizes = [4, 1, 256], strides = [1, 1, 1]} : vector<4x4x256xf32> to vector<4x1x256xf32>
    %30 = vector.broadcast %28 : vector<1x8x1xf32> to vector<4x8x256xf32>
    %31 = vector.broadcast %29 : vector<4x1x256xf32> to vector<4x8x256xf32>
    %32 = arith.mulf %30, %31 : vector<4x8x256xf32>
    %33 = arith.addf %26, %32 : vector<4x8x256xf32>
    %34 = vector.shape_cast %4 : vector<8x1xf32> to vector<1x8x1xf32>
    %35 = vector.broadcast %34 : vector<1x8x1xf32> to vector<4x8x256xf32>
    %36 = arith.addf %33, %35 : vector<4x8x256xf32>
    %cst_6 = arith.constant 0.000000e+00 : f32
    %37 = vector.broadcast %cst_6 : f32 to vector<4x8x256xf32>
    %38 = arith.maximumf %36, %37 : vector<4x8x256xf32>
    %cst_7 = arith.constant 0.000000e+00 : f32
    %39 = vector.broadcast %cst_7 : f32 to vector<4x8x128xf32>
    %c0_8 = arith.constant 0 : index
    %c0_9 = arith.constant 0 : index
    %c0_10 = arith.constant 0 : index
    %40 = vector.load %arg9[%c0_8, %c0_9, %c0_10] : memref<4x8x512xf32, #tpu.memory_space<vmem>>, vector<4x8x128xf32>
    tpu.vector_store %arg9[%c0_8, %c0_9, %c0_10], %39 {strides = array<i32>} : memref<4x8x512xf32, #tpu.memory_space<vmem>>, vector<4x8x128xf32>,
    %c0_11 = arith.constant 0 : index
    %c0_12 = arith.constant 0 : index
    %c384 = arith.constant 384 : index
    %41 = vector.load %arg9[%c0_11, %c0_12, %c384] : memref<4x8x512xf32, #tpu.memory_space<vmem>>, vector<4x8x128xf32>
    tpu.vector_store %arg9[%c0_11, %c0_12, %c384], %39 {strides = array<i32>} : memref<4x8x512xf32, #tpu.memory_space<vmem>>, vector<4x8x128xf32>,
    %c0_13 = arith.constant 0 : index
    %c0_14 = arith.constant 0 : index
    %c128 = arith.constant 128 : index
    %42 = vector.load %arg9[%c0_13, %c0_14, %c128] : memref<4x8x512xf32, #tpu.memory_space<vmem>>, vector<4x8x256xf32>
    tpu.vector_store %arg9[%c0_13, %c0_14, %c128], %38 {strides = array<i32>} : memref<4x8x512xf32, #tpu.memory_space<vmem>>, vector<4x8x256xf32>,
    %cst_15 = arith.constant 0.000000e+00 : f32
    %43 = vector.broadcast %cst_15 : f32 to vector<4x8x256xf32>
    %c0_16 = arith.constant 0 : index
    %c0_17 = arith.constant 0 : index
    %c55 = arith.constant 55 : index
    %44 = vector.load %arg9[%c0_16, %c0_17, %c55] : memref<4x8x512xf32, #tpu.memory_space<vmem>>, vector<4x8x256xf32>
    %c0_18 = arith.constant 0 : index
    %c0_19 = arith.constant 0 : index
    %c0_20 = arith.constant 0 : index
    %45 = vector.load %arg4[%c0_18, %c0_19, %c0_20] : memref<27x8x256xf32, #tpu.memory_space<vmem>>, vector<1x8x256xf32>
    %46 = vector.shape_cast %45 : vector<1x8x256xf32> to vector<8x256xf32>
    %47 = vector.shape_cast %46 : vector<8x256xf32> to vector<1x8x256xf32>
    %48 = vector.broadcast %47 : vector<1x8x256xf32> to vector<4x8x256xf32>
    %49 = arith.mulf %44, %48 : vector<4x8x256xf32>
    %50 = arith.addf %43, %49 : vector<4x8x256xf32>
    %c0_21 = arith.constant 0 : index
    %c0_22 = arith.constant 0 : index
    %c56 = arith.constant 56 : index
    %51 = vector.load %arg9[%c0_21, %c0_22, %c56] : memref<4x8x512xf32, #tpu.memory_space<vmem>>, vector<4x8x256xf32>
    %c1 = arith.constant 1 : index
    %c0_23 = arith.constant 0 : index
    %c0_24 = arith.constant 0 : index
    %52 = vector.load %arg4[%c1, %c0_23, %c0_24] : memref<27x8x256xf32, #tpu.memory_space<vmem>>, vector<1x8x256xf32>
    %53 = vector.shape_cast %52 : vector<1x8x256xf32> to vector<8x256xf32>
    %54 = vector.shape_cast %53 : vector<8x256xf32> to vector<1x8x256xf32>
    %55 = vector.broadcast %54 : vector<1x8x256xf32> to vector<4x8x256xf32>
    %56 = arith.mulf %51, %55 : vector<4x8x256xf32>
    %57 = arith.addf %50, %56 : vector<4x8x256xf32>
    %c0_25 = arith.constant 0 : index
    %c0_26 = arith.constant 0 : index
    %c57 = arith.constant 57 : index
    %58 = vector.load %arg9[%c0_25, %c0_26, %c57] : memref<4x8x512xf32, #tpu.memory_space<vmem>>, vector<4x8x256xf32>
    %c2 = arith.constant 2 : index
    %c0_27 = arith.constant 0 : index
    %c0_28 = arith.constant 0 : index
    %59 = vector.load %arg4[%c2, %c0_27, %c0_28] : memref<27x8x256xf32, #tpu.memory_space<vmem>>, vector<1x8x256xf32>
    %60 = vector.shape_cast %59 : vector<1x8x256xf32> to vector<8x256xf32>
    %61 = vector.shape_cast %60 : vector<8x256xf32> to vector<1x8x256xf32>
    %62 = vector.broadcast %61 : vector<1x8x256xf32> to vector<4x8x256xf32>
    %63 = arith.mulf %58, %62 : vector<4x8x256xf32>
    %64 = arith.addf %57, %63 : vector<4x8x256xf32>
    %c0_29 = arith.constant 0 : index
    %c0_30 = arith.constant 0 : index
    %c63 = arith.constant 63 : index
    %65 = vector.load %arg9[%c0_29, %c0_30, %c63] : memref<4x8x512xf32, #tpu.memory_space<vmem>>, vector<4x8x256xf32>
    %c3 = arith.constant 3 : index
    %c0_31 = arith.constant 0 : index
    %c0_32 = arith.constant 0 : index
    %66 = vector.load %arg4[%c3, %c0_31, %c0_32] : memref<27x8x256xf32, #tpu.memory_space<vmem>>, vector<1x8x256xf32>
    %67 = vector.shape_cast %66 : vector<1x8x256xf32> to vector<8x256xf32>
    %68 = vector.shape_cast %67 : vector<8x256xf32> to vector<1x8x256xf32>
    %69 = vector.broadcast %68 : vector<1x8x256xf32> to vector<4x8x256xf32>
    %70 = arith.mulf %65, %69 : vector<4x8x256xf32>
    %71 = arith.addf %64, %70 : vector<4x8x256xf32>
    %c0_33 = arith.constant 0 : index
    %c0_34 = arith.constant 0 : index
    %c64 = arith.constant 64 : index
    %72 = vector.load %arg9[%c0_33, %c0_34, %c64] : memref<4x8x512xf32, #tpu.memory_space<vmem>>, vector<4x8x256xf32>
    %c4 = arith.constant 4 : index
    %c0_35 = arith.constant 0 : index
    %c0_36 = arith.constant 0 : index
    %73 = vector.load %arg4[%c4, %c0_35, %c0_36] : memref<27x8x256xf32, #tpu.memory_space<vmem>>, vector<1x8x256xf32>
    %74 = vector.shape_cast %73 : vector<1x8x256xf32> to vector<8x256xf32>
    %75 = vector.shape_cast %74 : vector<8x256xf32> to vector<1x8x256xf32>
    %76 = vector.broadcast %75 : vector<1x8x256xf32> to vector<4x8x256xf32>
    %77 = arith.mulf %72, %76 : vector<4x8x256xf32>
    %78 = arith.addf %71, %77 : vector<4x8x256xf32>
    %c0_37 = arith.constant 0 : index
    %c0_38 = arith.constant 0 : index
    %c65 = arith.constant 65 : index
    %79 = vector.load %arg9[%c0_37, %c0_38, %c65] : memref<4x8x512xf32, #tpu.memory_space<vmem>>, vector<4x8x256xf32>
    %c5 = arith.constant 5 : index
    %c0_39 = arith.constant 0 : index
    %c0_40 = arith.constant 0 : index
    %80 = vector.load %arg4[%c5, %c0_39, %c0_40] : memref<27x8x256xf32, #tpu.memory_space<vmem>>, vector<1x8x256xf32>
    %81 = vector.shape_cast %80 : vector<1x8x256xf32> to vector<8x256xf32>
    %82 = vector.shape_cast %81 : vector<8x256xf32> to vector<1x8x256xf32>
    %83 = vector.broadcast %82 : vector<1x8x256xf32> to vector<4x8x256xf32>
    %84 = arith.mulf %79, %83 : vector<4x8x256xf32>
    %85 = arith.addf %78, %84 : vector<4x8x256xf32>
    %c0_41 = arith.constant 0 : index
    %c0_42 = arith.constant 0 : index
    %c71 = arith.constant 71 : index
    %86 = vector.load %arg9[%c0_41, %c0_42, %c71] : memref<4x8x512xf32, #tpu.memory_space<vmem>>, vector<4x8x256xf32>
    %c6 = arith.constant 6 : index
    %c0_43 = arith.constant 0 : index
    %c0_44 = arith.constant 0 : index
    %87 = vector.load %arg4[%c6, %c0_43, %c0_44] : memref<27x8x256xf32, #tpu.memory_space<vmem>>, vector<1x8x256xf32>
    %88 = vector.shape_cast %87 : vector<1x8x256xf32> to vector<8x256xf32>
    %89 = vector.shape_cast %88 : vector<8x256xf32> to vector<1x8x256xf32>
    %90 = vector.broadcast %89 : vector<1x8x256xf32> to vector<4x8x256xf32>
    %91 = arith.mulf %86, %90 : vector<4x8x256xf32>
    %92 = arith.addf %85, %91 : vector<4x8x256xf32>
    %c0_45 = arith.constant 0 : index
    %c0_46 = arith.constant 0 : index
    %c72 = arith.constant 72 : index
    %93 = vector.load %arg9[%c0_45, %c0_46, %c72] : memref<4x8x512xf32, #tpu.memory_space<vmem>>, vector<4x8x256xf32>
    %c7 = arith.constant 7 : index
    %c0_47 = arith.constant 0 : index
    %c0_48 = arith.constant 0 : index
    %94 = vector.load %arg4[%c7, %c0_47, %c0_48] : memref<27x8x256xf32, #tpu.memory_space<vmem>>, vector<1x8x256xf32>
    %95 = vector.shape_cast %94 : vector<1x8x256xf32> to vector<8x256xf32>
    %96 = vector.shape_cast %95 : vector<8x256xf32> to vector<1x8x256xf32>
    %97 = vector.broadcast %96 : vector<1x8x256xf32> to vector<4x8x256xf32>
    %98 = arith.mulf %93, %97 : vector<4x8x256xf32>
    %99 = arith.addf %92, %98 : vector<4x8x256xf32>
    %c0_49 = arith.constant 0 : index
    %c0_50 = arith.constant 0 : index
    %c73 = arith.constant 73 : index
    %100 = vector.load %arg9[%c0_49, %c0_50, %c73] : memref<4x8x512xf32, #tpu.memory_space<vmem>>, vector<4x8x256xf32>
    %c8 = arith.constant 8 : index
    %c0_51 = arith.constant 0 : index
    %c0_52 = arith.constant 0 : index
    %101 = vector.load %arg4[%c8, %c0_51, %c0_52] : memref<27x8x256xf32, #tpu.memory_space<vmem>>, vector<1x8x256xf32>
    %102 = vector.shape_cast %101 : vector<1x8x256xf32> to vector<8x256xf32>
    %103 = vector.shape_cast %102 : vector<8x256xf32> to vector<1x8x256xf32>
    %104 = vector.broadcast %103 : vector<1x8x256xf32> to vector<4x8x256xf32>
    %105 = arith.mulf %100, %104 : vector<4x8x256xf32>
    %106 = arith.addf %99, %105 : vector<4x8x256xf32>
    %c0_53 = arith.constant 0 : index
    %c0_54 = arith.constant 0 : index
    %c119 = arith.constant 119 : index
    %107 = vector.load %arg9[%c0_53, %c0_54, %c119] : memref<4x8x512xf32, #tpu.memory_space<vmem>>, vector<4x8x256xf32>
    %c9 = arith.constant 9 : index
    %c0_55 = arith.constant 0 : index
    %c0_56 = arith.constant 0 : index
    %108 = vector.load %arg4[%c9, %c0_55, %c0_56] : memref<27x8x256xf32, #tpu.memory_space<vmem>>, vector<1x8x256xf32>
    %109 = vector.shape_cast %108 : vector<1x8x256xf32> to vector<8x256xf32>
    %110 = vector.shape_cast %109 : vector<8x256xf32> to vector<1x8x256xf32>
    %111 = vector.broadcast %110 : vector<1x8x256xf32> to vector<4x8x256xf32>
    %112 = arith.mulf %107, %111 : vector<4x8x256xf32>
    %113 = arith.addf %106, %112 : vector<4x8x256xf32>
    %c0_57 = arith.constant 0 : index
    %c0_58 = arith.constant 0 : index
    %c120 = arith.constant 120 : index
    %114 = vector.load %arg9[%c0_57, %c0_58, %c120] : memref<4x8x512xf32, #tpu.memory_space<vmem>>, vector<4x8x256xf32>
    %c10 = arith.constant 10 : index
    %c0_59 = arith.constant 0 : index
    %c0_60 = arith.constant 0 : index
    %115 = vector.load %arg4[%c10, %c0_59, %c0_60] : memref<27x8x256xf32, #tpu.memory_space<vmem>>, vector<1x8x256xf32>
    %116 = vector.shape_cast %115 : vector<1x8x256xf32> to vector<8x256xf32>
    %117 = vector.shape_cast %116 : vector<8x256xf32> to vector<1x8x256xf32>
    %118 = vector.broadcast %117 : vector<1x8x256xf32> to vector<4x8x256xf32>
    %119 = arith.mulf %114, %118 : vector<4x8x256xf32>
    %120 = arith.addf %113, %119 : vector<4x8x256xf32>
    %c0_61 = arith.constant 0 : index
    %c0_62 = arith.constant 0 : index
    %c121 = arith.constant 121 : index
    %121 = vector.load %arg9[%c0_61, %c0_62, %c121] : memref<4x8x512xf32, #tpu.memory_space<vmem>>, vector<4x8x256xf32>
    %c11 = arith.constant 11 : index
    %c0_63 = arith.constant 0 : index
    %c0_64 = arith.constant 0 : index
    %122 = vector.load %arg4[%c11, %c0_63, %c0_64] : memref<27x8x256xf32, #tpu.memory_space<vmem>>, vector<1x8x256xf32>
    %123 = vector.shape_cast %122 : vector<1x8x256xf32> to vector<8x256xf32>
    %124 = vector.shape_cast %123 : vector<8x256xf32> to vector<1x8x256xf32>
    %125 = vector.broadcast %124 : vector<1x8x256xf32> to vector<4x8x256xf32>
    %126 = arith.mulf %121, %125 : vector<4x8x256xf32>
    %127 = arith.addf %120, %126 : vector<4x8x256xf32>
    %c0_65 = arith.constant 0 : index
    %c0_66 = arith.constant 0 : index
    %c127 = arith.constant 127 : index
    %128 = vector.load %arg9[%c0_65, %c0_66, %c127] : memref<4x8x512xf32, #tpu.memory_space<vmem>>, vector<4x8x256xf32>
    %c12 = arith.constant 12 : index
    %c0_67 = arith.constant 0 : index
    %c0_68 = arith.constant 0 : index
    %129 = vector.load %arg4[%c12, %c0_67, %c0_68] : memref<27x8x256xf32, #tpu.memory_space<vmem>>, vector<1x8x256xf32>
    %130 = vector.shape_cast %129 : vector<1x8x256xf32> to vector<8x256xf32>
    %131 = vector.shape_cast %130 : vector<8x256xf32> to vector<1x8x256xf32>
    %132 = vector.broadcast %131 : vector<1x8x256xf32> to vector<4x8x256xf32>
    %133 = arith.mulf %128, %132 : vector<4x8x256xf32>
    %134 = arith.addf %127, %133 : vector<4x8x256xf32>
    %c0_69 = arith.constant 0 : index
    %c0_70 = arith.constant 0 : index
    %c128_71 = arith.constant 128 : index
    %135 = vector.load %arg9[%c0_69, %c0_70, %c128_71] : memref<4x8x512xf32, #tpu.memory_space<vmem>>, vector<4x8x256xf32>
    %c13 = arith.constant 13 : index
    %c0_72 = arith.constant 0 : index
    %c0_73 = arith.constant 0 : index
    %136 = vector.load %arg4[%c13, %c0_72, %c0_73] : memref<27x8x256xf32, #tpu.memory_space<vmem>>, vector<1x8x256xf32>
    %137 = vector.shape_cast %136 : vector<1x8x256xf32> to vector<8x256xf32>
    %138 = vector.shape_cast %137 : vector<8x256xf32> to vector<1x8x256xf32>
    %139 = vector.broadcast %138 : vector<1x8x256xf32> to vector<4x8x256xf32>
    %140 = arith.mulf %135, %139 : vector<4x8x256xf32>
    %141 = arith.addf %134, %140 : vector<4x8x256xf32>
    %c0_74 = arith.constant 0 : index
    %c0_75 = arith.constant 0 : index
    %c129 = arith.constant 129 : index
    %142 = vector.load %arg9[%c0_74, %c0_75, %c129] : memref<4x8x512xf32, #tpu.memory_space<vmem>>, vector<4x8x256xf32>
    %c14 = arith.constant 14 : index
    %c0_76 = arith.constant 0 : index
    %c0_77 = arith.constant 0 : index
    %143 = vector.load %arg4[%c14, %c0_76, %c0_77] : memref<27x8x256xf32, #tpu.memory_space<vmem>>, vector<1x8x256xf32>
    %144 = vector.shape_cast %143 : vector<1x8x256xf32> to vector<8x256xf32>
    %145 = vector.shape_cast %144 : vector<8x256xf32> to vector<1x8x256xf32>
    %146 = vector.broadcast %145 : vector<1x8x256xf32> to vector<4x8x256xf32>
    %147 = arith.mulf %142, %146 : vector<4x8x256xf32>
    %148 = arith.addf %141, %147 : vector<4x8x256xf32>
    %c0_78 = arith.constant 0 : index
    %c0_79 = arith.constant 0 : index
    %c135 = arith.constant 135 : index
    %149 = vector.load %arg9[%c0_78, %c0_79, %c135] : memref<4x8x512xf32, #tpu.memory_space<vmem>>, vector<4x8x256xf32>
    %c15 = arith.constant 15 : index
    %c0_80 = arith.constant 0 : index
    %c0_81 = arith.constant 0 : index
    %150 = vector.load %arg4[%c15, %c0_80, %c0_81] : memref<27x8x256xf32, #tpu.memory_space<vmem>>, vector<1x8x256xf32>
    %151 = vector.shape_cast %150 : vector<1x8x256xf32> to vector<8x256xf32>
    %152 = vector.shape_cast %151 : vector<8x256xf32> to vector<1x8x256xf32>
    %153 = vector.broadcast %152 : vector<1x8x256xf32> to vector<4x8x256xf32>
    %154 = arith.mulf %149, %153 : vector<4x8x256xf32>
    %155 = arith.addf %148, %154 : vector<4x8x256xf32>
    %c0_82 = arith.constant 0 : index
    %c0_83 = arith.constant 0 : index
    %c136 = arith.constant 136 : index
    %156 = vector.load %arg9[%c0_82, %c0_83, %c136] : memref<4x8x512xf32, #tpu.memory_space<vmem>>, vector<4x8x256xf32>
    %c16 = arith.constant 16 : index
    %c0_84 = arith.constant 0 : index
    %c0_85 = arith.constant 0 : index
    %157 = vector.load %arg4[%c16, %c0_84, %c0_85] : memref<27x8x256xf32, #tpu.memory_space<vmem>>, vector<1x8x256xf32>
    %158 = vector.shape_cast %157 : vector<1x8x256xf32> to vector<8x256xf32>
    %159 = vector.shape_cast %158 : vector<8x256xf32> to vector<1x8x256xf32>
    %160 = vector.broadcast %159 : vector<1x8x256xf32> to vector<4x8x256xf32>
    %161 = arith.mulf %156, %160 : vector<4x8x256xf32>
    %162 = arith.addf %155, %161 : vector<4x8x256xf32>
    %c0_86 = arith.constant 0 : index
    %c0_87 = arith.constant 0 : index
    %c137 = arith.constant 137 : index
    %163 = vector.load %arg9[%c0_86, %c0_87, %c137] : memref<4x8x512xf32, #tpu.memory_space<vmem>>, vector<4x8x256xf32>
    %c17 = arith.constant 17 : index
    %c0_88 = arith.constant 0 : index
    %c0_89 = arith.constant 0 : index
    %164 = vector.load %arg4[%c17, %c0_88, %c0_89] : memref<27x8x256xf32, #tpu.memory_space<vmem>>, vector<1x8x256xf32>
    %165 = vector.shape_cast %164 : vector<1x8x256xf32> to vector<8x256xf32>
    %166 = vector.shape_cast %165 : vector<8x256xf32> to vector<1x8x256xf32>
    %167 = vector.broadcast %166 : vector<1x8x256xf32> to vector<4x8x256xf32>
    %168 = arith.mulf %163, %167 : vector<4x8x256xf32>
    %169 = arith.addf %162, %168 : vector<4x8x256xf32>
    %c0_90 = arith.constant 0 : index
    %c0_91 = arith.constant 0 : index
    %c183 = arith.constant 183 : index
    %170 = vector.load %arg9[%c0_90, %c0_91, %c183] : memref<4x8x512xf32, #tpu.memory_space<vmem>>, vector<4x8x256xf32>
    %c18 = arith.constant 18 : index
    %c0_92 = arith.constant 0 : index
    %c0_93 = arith.constant 0 : index
    %171 = vector.load %arg4[%c18, %c0_92, %c0_93] : memref<27x8x256xf32, #tpu.memory_space<vmem>>, vector<1x8x256xf32>
    %172 = vector.shape_cast %171 : vector<1x8x256xf32> to vector<8x256xf32>
    %173 = vector.shape_cast %172 : vector<8x256xf32> to vector<1x8x256xf32>
    %174 = vector.broadcast %173 : vector<1x8x256xf32> to vector<4x8x256xf32>
    %175 = arith.mulf %170, %174 : vector<4x8x256xf32>
    %176 = arith.addf %169, %175 : vector<4x8x256xf32>
    %c0_94 = arith.constant 0 : index
    %c0_95 = arith.constant 0 : index
    %c184 = arith.constant 184 : index
    %177 = vector.load %arg9[%c0_94, %c0_95, %c184] : memref<4x8x512xf32, #tpu.memory_space<vmem>>, vector<4x8x256xf32>
    %c19 = arith.constant 19 : index
    %c0_96 = arith.constant 0 : index
    %c0_97 = arith.constant 0 : index
    %178 = vector.load %arg4[%c19, %c0_96, %c0_97] : memref<27x8x256xf32, #tpu.memory_space<vmem>>, vector<1x8x256xf32>
    %179 = vector.shape_cast %178 : vector<1x8x256xf32> to vector<8x256xf32>
    %180 = vector.shape_cast %179 : vector<8x256xf32> to vector<1x8x256xf32>
    %181 = vector.broadcast %180 : vector<1x8x256xf32> to vector<4x8x256xf32>
    %182 = arith.mulf %177, %181 : vector<4x8x256xf32>
    %183 = arith.addf %176, %182 : vector<4x8x256xf32>
    %c0_98 = arith.constant 0 : index
    %c0_99 = arith.constant 0 : index
    %c185 = arith.constant 185 : index
    %184 = vector.load %arg9[%c0_98, %c0_99, %c185] : memref<4x8x512xf32, #tpu.memory_space<vmem>>, vector<4x8x256xf32>
    %c20 = arith.constant 20 : index
    %c0_100 = arith.constant 0 : index
    %c0_101 = arith.constant 0 : index
    %185 = vector.load %arg4[%c20, %c0_100, %c0_101] : memref<27x8x256xf32, #tpu.memory_space<vmem>>, vector<1x8x256xf32>
    %186 = vector.shape_cast %185 : vector<1x8x256xf32> to vector<8x256xf32>
    %187 = vector.shape_cast %186 : vector<8x256xf32> to vector<1x8x256xf32>
    %188 = vector.broadcast %187 : vector<1x8x256xf32> to vector<4x8x256xf32>
    %189 = arith.mulf %184, %188 : vector<4x8x256xf32>
    %190 = arith.addf %183, %189 : vector<4x8x256xf32>
    %c0_102 = arith.constant 0 : index
    %c0_103 = arith.constant 0 : index
    %c191 = arith.constant 191 : index
    %191 = vector.load %arg9[%c0_102, %c0_103, %c191] : memref<4x8x512xf32, #tpu.memory_space<vmem>>, vector<4x8x256xf32>
    %c21 = arith.constant 21 : index
    %c0_104 = arith.constant 0 : index
    %c0_105 = arith.constant 0 : index
    %192 = vector.load %arg4[%c21, %c0_104, %c0_105] : memref<27x8x256xf32, #tpu.memory_space<vmem>>, vector<1x8x256xf32>
    %193 = vector.shape_cast %192 : vector<1x8x256xf32> to vector<8x256xf32>
    %194 = vector.shape_cast %193 : vector<8x256xf32> to vector<1x8x256xf32>
    %195 = vector.broadcast %194 : vector<1x8x256xf32> to vector<4x8x256xf32>
    %196 = arith.mulf %191, %195 : vector<4x8x256xf32>
    %197 = arith.addf %190, %196 : vector<4x8x256xf32>
    %c0_106 = arith.constant 0 : index
    %c0_107 = arith.constant 0 : index
    %c192 = arith.constant 192 : index
    %198 = vector.load %arg9[%c0_106, %c0_107, %c192] : memref<4x8x512xf32, #tpu.memory_space<vmem>>, vector<4x8x256xf32>
    %c22 = arith.constant 22 : index
    %c0_108 = arith.constant 0 : index
    %c0_109 = arith.constant 0 : index
    %199 = vector.load %arg4[%c22, %c0_108, %c0_109] : memref<27x8x256xf32, #tpu.memory_space<vmem>>, vector<1x8x256xf32>
    %200 = vector.shape_cast %199 : vector<1x8x256xf32> to vector<8x256xf32>
    %201 = vector.shape_cast %200 : vector<8x256xf32> to vector<1x8x256xf32>
    %202 = vector.broadcast %201 : vector<1x8x256xf32> to vector<4x8x256xf32>
    %203 = arith.mulf %198, %202 : vector<4x8x256xf32>
    %204 = arith.addf %197, %203 : vector<4x8x256xf32>
    %c0_110 = arith.constant 0 : index
    %c0_111 = arith.constant 0 : index
    %c193 = arith.constant 193 : index
    %205 = vector.load %arg9[%c0_110, %c0_111, %c193] : memref<4x8x512xf32, #tpu.memory_space<vmem>>, vector<4x8x256xf32>
    %c23 = arith.constant 23 : index
    %c0_112 = arith.constant 0 : index
    %c0_113 = arith.constant 0 : index
    %206 = vector.load %arg4[%c23, %c0_112, %c0_113] : memref<27x8x256xf32, #tpu.memory_space<vmem>>, vector<1x8x256xf32>
    %207 = vector.shape_cast %206 : vector<1x8x256xf32> to vector<8x256xf32>
    %208 = vector.shape_cast %207 : vector<8x256xf32> to vector<1x8x256xf32>
    %209 = vector.broadcast %208 : vector<1x8x256xf32> to vector<4x8x256xf32>
    %210 = arith.mulf %205, %209 : vector<4x8x256xf32>
    %211 = arith.addf %204, %210 : vector<4x8x256xf32>
    %c0_114 = arith.constant 0 : index
    %c0_115 = arith.constant 0 : index
    %c199 = arith.constant 199 : index
    %212 = vector.load %arg9[%c0_114, %c0_115, %c199] : memref<4x8x512xf32, #tpu.memory_space<vmem>>, vector<4x8x256xf32>
    %c24 = arith.constant 24 : index
    %c0_116 = arith.constant 0 : index
    %c0_117 = arith.constant 0 : index
    %213 = vector.load %arg4[%c24, %c0_116, %c0_117] : memref<27x8x256xf32, #tpu.memory_space<vmem>>, vector<1x8x256xf32>
    %214 = vector.shape_cast %213 : vector<1x8x256xf32> to vector<8x256xf32>
    %215 = vector.shape_cast %214 : vector<8x256xf32> to vector<1x8x256xf32>
    %216 = vector.broadcast %215 : vector<1x8x256xf32> to vector<4x8x256xf32>
    %217 = arith.mulf %212, %216 : vector<4x8x256xf32>
    %218 = arith.addf %211, %217 : vector<4x8x256xf32>
    %c0_118 = arith.constant 0 : index
    %c0_119 = arith.constant 0 : index
    %c200 = arith.constant 200 : index
    %219 = vector.load %arg9[%c0_118, %c0_119, %c200] : memref<4x8x512xf32, #tpu.memory_space<vmem>>, vector<4x8x256xf32>
    %c25 = arith.constant 25 : index
    %c0_120 = arith.constant 0 : index
    %c0_121 = arith.constant 0 : index
    %220 = vector.load %arg4[%c25, %c0_120, %c0_121] : memref<27x8x256xf32, #tpu.memory_space<vmem>>, vector<1x8x256xf32>
    %221 = vector.shape_cast %220 : vector<1x8x256xf32> to vector<8x256xf32>
    %222 = vector.shape_cast %221 : vector<8x256xf32> to vector<1x8x256xf32>
    %223 = vector.broadcast %222 : vector<1x8x256xf32> to vector<4x8x256xf32>
    %224 = arith.mulf %219, %223 : vector<4x8x256xf32>
    %225 = arith.addf %218, %224 : vector<4x8x256xf32>
    %c0_122 = arith.constant 0 : index
    %c0_123 = arith.constant 0 : index
    %c201 = arith.constant 201 : index
    %226 = vector.load %arg9[%c0_122, %c0_123, %c201] : memref<4x8x512xf32, #tpu.memory_space<vmem>>, vector<4x8x256xf32>
    %c26 = arith.constant 26 : index
    %c0_124 = arith.constant 0 : index
    %c0_125 = arith.constant 0 : index
    %227 = vector.load %arg4[%c26, %c0_124, %c0_125] : memref<27x8x256xf32, #tpu.memory_space<vmem>>, vector<1x8x256xf32>
    %228 = vector.shape_cast %227 : vector<1x8x256xf32> to vector<8x256xf32>
    %229 = vector.shape_cast %228 : vector<8x256xf32> to vector<1x8x256xf32>
    %230 = vector.broadcast %229 : vector<1x8x256xf32> to vector<4x8x256xf32>
    %231 = arith.mulf %226, %230 : vector<4x8x256xf32>
    %232 = arith.addf %225, %231 : vector<4x8x256xf32>
    %c0_126 = arith.constant 0 : index
    %c0_127 = arith.constant 0 : index
    %233 = vector.load %arg5[%c0_126, %c0_127] : memref<8x1xf32, #tpu.memory_space<vmem>>, vector<8x1xf32>
    %234 = vector.shape_cast %233 : vector<8x1xf32> to vector<1x8x1xf32>
    %235 = vector.broadcast %234 : vector<1x8x1xf32> to vector<4x8x256xf32>
    %236 = arith.addf %232, %235 : vector<4x8x256xf32>
    %c0_128 = arith.constant 0 : index
    %c0_129 = arith.constant 0 : index
    %237 = vector.load %arg6[%c0_128, %c0_129] : memref<4x8xf32, #tpu.memory_space<vmem>>, vector<4x8xf32>
    %c0_130 = arith.constant 0 : index
    %c0_131 = arith.constant 0 : index
    %238 = vector.load %arg7[%c0_130, %c0_131] : memref<4x1xf32, #tpu.memory_space<vmem>>, vector<4x1xf32>
    %cst_132 = arith.constant 0.000000e+00 : f32
    %239 = vector.broadcast %cst_132 : f32 to vector<4x4x256xf32>
    %240 = vector.extract_strided_slice %237 {offsets = [0, 0], sizes = [4, 1], strides = [1, 1]} : vector<4x8xf32> to vector<4x1xf32>
    %241 = vector.shape_cast %240 : vector<4x1xf32> to vector<1x4x1xf32>
    %242 = vector.extract_strided_slice %236 {offsets = [0, 0, 0], sizes = [4, 1, 256], strides = [1, 1, 1]} : vector<4x8x256xf32> to vector<4x1x256xf32>
    %243 = vector.broadcast %241 : vector<1x4x1xf32> to vector<4x4x256xf32>
    %244 = vector.broadcast %242 : vector<4x1x256xf32> to vector<4x4x256xf32>
    %245 = arith.mulf %243, %244 : vector<4x4x256xf32>
    %246 = arith.addf %239, %245 : vector<4x4x256xf32>
    %247 = vector.extract_strided_slice %237 {offsets = [0, 1], sizes = [4, 1], strides = [1, 1]} : vector<4x8xf32> to vector<4x1xf32>
    %248 = vector.shape_cast %247 : vector<4x1xf32> to vector<1x4x1xf32>
    %249 = vector.extract_strided_slice %236 {offsets = [0, 1, 0], sizes = [4, 1, 256], strides = [1, 1, 1]} : vector<4x8x256xf32> to vector<4x1x256xf32>
    %250 = vector.broadcast %248 : vector<1x4x1xf32> to vector<4x4x256xf32>
    %251 = vector.broadcast %249 : vector<4x1x256xf32> to vector<4x4x256xf32>
    %252 = arith.mulf %250, %251 : vector<4x4x256xf32>
    %253 = arith.addf %246, %252 : vector<4x4x256xf32>
    %254 = vector.extract_strided_slice %237 {offsets = [0, 2], sizes = [4, 1], strides = [1, 1]} : vector<4x8xf32> to vector<4x1xf32>
    %255 = vector.shape_cast %254 : vector<4x1xf32> to vector<1x4x1xf32>
    %256 = vector.extract_strided_slice %236 {offsets = [0, 2, 0], sizes = [4, 1, 256], strides = [1, 1, 1]} : vector<4x8x256xf32> to vector<4x1x256xf32>
    %257 = vector.broadcast %255 : vector<1x4x1xf32> to vector<4x4x256xf32>
    %258 = vector.broadcast %256 : vector<4x1x256xf32> to vector<4x4x256xf32>
    %259 = arith.mulf %257, %258 : vector<4x4x256xf32>
    %260 = arith.addf %253, %259 : vector<4x4x256xf32>
    %261 = vector.extract_strided_slice %237 {offsets = [0, 3], sizes = [4, 1], strides = [1, 1]} : vector<4x8xf32> to vector<4x1xf32>
    %262 = vector.shape_cast %261 : vector<4x1xf32> to vector<1x4x1xf32>
    %263 = vector.extract_strided_slice %236 {offsets = [0, 3, 0], sizes = [4, 1, 256], strides = [1, 1, 1]} : vector<4x8x256xf32> to vector<4x1x256xf32>
    %264 = vector.broadcast %262 : vector<1x4x1xf32> to vector<4x4x256xf32>
    %265 = vector.broadcast %263 : vector<4x1x256xf32> to vector<4x4x256xf32>
    %266 = arith.mulf %264, %265 : vector<4x4x256xf32>
    %267 = arith.addf %260, %266 : vector<4x4x256xf32>
    %268 = vector.extract_strided_slice %237 {offsets = [0, 4], sizes = [4, 1], strides = [1, 1]} : vector<4x8xf32> to vector<4x1xf32>
    %269 = vector.shape_cast %268 : vector<4x1xf32> to vector<1x4x1xf32>
    %270 = vector.extract_strided_slice %236 {offsets = [0, 4, 0], sizes = [4, 1, 256], strides = [1, 1, 1]} : vector<4x8x256xf32> to vector<4x1x256xf32>
    %271 = vector.broadcast %269 : vector<1x4x1xf32> to vector<4x4x256xf32>
    %272 = vector.broadcast %270 : vector<4x1x256xf32> to vector<4x4x256xf32>
    %273 = arith.mulf %271, %272 : vector<4x4x256xf32>
    %274 = arith.addf %267, %273 : vector<4x4x256xf32>
    %275 = vector.extract_strided_slice %237 {offsets = [0, 5], sizes = [4, 1], strides = [1, 1]} : vector<4x8xf32> to vector<4x1xf32>
    %276 = vector.shape_cast %275 : vector<4x1xf32> to vector<1x4x1xf32>
    %277 = vector.extract_strided_slice %236 {offsets = [0, 5, 0], sizes = [4, 1, 256], strides = [1, 1, 1]} : vector<4x8x256xf32> to vector<4x1x256xf32>
    %278 = vector.broadcast %276 : vector<1x4x1xf32> to vector<4x4x256xf32>
    %279 = vector.broadcast %277 : vector<4x1x256xf32> to vector<4x4x256xf32>
    %280 = arith.mulf %278, %279 : vector<4x4x256xf32>
    %281 = arith.addf %274, %280 : vector<4x4x256xf32>
    %282 = vector.extract_strided_slice %237 {offsets = [0, 6], sizes = [4, 1], strides = [1, 1]} : vector<4x8xf32> to vector<4x1xf32>
    %283 = vector.shape_cast %282 : vector<4x1xf32> to vector<1x4x1xf32>
    %284 = vector.extract_strided_slice %236 {offsets = [0, 6, 0], sizes = [4, 1, 256], strides = [1, 1, 1]} : vector<4x8x256xf32> to vector<4x1x256xf32>
    %285 = vector.broadcast %283 : vector<1x4x1xf32> to vector<4x4x256xf32>
    %286 = vector.broadcast %284 : vector<4x1x256xf32> to vector<4x4x256xf32>
    %287 = arith.mulf %285, %286 : vector<4x4x256xf32>
    %288 = arith.addf %281, %287 : vector<4x4x256xf32>
    %289 = vector.extract_strided_slice %237 {offsets = [0, 7], sizes = [4, 1], strides = [1, 1]} : vector<4x8xf32> to vector<4x1xf32>
    %290 = vector.shape_cast %289 : vector<4x1xf32> to vector<1x4x1xf32>
    %291 = vector.extract_strided_slice %236 {offsets = [0, 7, 0], sizes = [4, 1, 256], strides = [1, 1, 1]} : vector<4x8x256xf32> to vector<4x1x256xf32>
    %292 = vector.broadcast %290 : vector<1x4x1xf32> to vector<4x4x256xf32>
    %293 = vector.broadcast %291 : vector<4x1x256xf32> to vector<4x4x256xf32>
    %294 = arith.mulf %292, %293 : vector<4x4x256xf32>
    %295 = arith.addf %288, %294 : vector<4x4x256xf32>
    %296 = vector.shape_cast %238 : vector<4x1xf32> to vector<1x4x1xf32>
    %297 = vector.broadcast %296 : vector<1x4x1xf32> to vector<4x4x256xf32>
    %298 = arith.addf %295, %297 : vector<4x4x256xf32>
    %cst_133 = arith.constant 0.000000e+00 : f32
    %299 = vector.broadcast %cst_133 : f32 to vector<4x4x256xf32>
    %300 = arith.maximumf %298, %299 : vector<4x4x256xf32>
    %301 = tpu.concatenate %1, %300 in 1 : vector<4x4x256xf32>, vector<4x4x256xf32> -> vector<4x8x256xf32>
    %c0_134 = arith.constant 0 : index
    %c0_135 = arith.constant 0 : index
    %c0_136 = arith.constant 0 : index
    %302 = vector.load %arg8[%c0_134, %c0_135, %c0_136] : memref<4x8x256xf32, #tpu.memory_space<vmem>>, vector<4x8x256xf32>
    tpu.vector_store %arg8[%c0_134, %c0_135, %c0_136], %301 {strides = array<i32>} : memref<4x8x256xf32, #tpu.memory_space<vmem>>, vector<4x8x256xf32>,
    return
  }
  func.func @transform_0(%arg0: i32) -> (i32, i32, i32) {
    %c0_i32 = arith.constant 0 : i32
    %c0_i32_0 = arith.constant 0 : i32
    %c0_i32_1 = arith.constant 0 : i32
    return %arg0, %c0_i32, %c0_i32_0 : i32, i32, i32
  }
  func.func @transform_1(%arg0: i32) -> (i32, i32) {
    %c0_i32 = arith.constant 0 : i32
    %c0_i32_0 = arith.constant 0 : i32
    %c0_i32_1 = arith.constant 0 : i32
    return %c0_i32, %c0_i32_0 : i32, i32
  }
  func.func @transform_2(%arg0: i32) -> (i32, i32) {
    %c0_i32 = arith.constant 0 : i32
    %c0_i32_0 = arith.constant 0 : i32
    %c0_i32_1 = arith.constant 0 : i32
    return %c0_i32, %c0_i32_0 : i32, i32
  }
  func.func @transform_3(%arg0: i32) -> (i32, i32, i32) {
    %c0_i32 = arith.constant 0 : i32
    %c0_i32_0 = arith.constant 0 : i32
    %c0_i32_1 = arith.constant 0 : i32
    %c0_i32_2 = arith.constant 0 : i32
    return %c0_i32, %c0_i32_0, %c0_i32_1 : i32, i32, i32
  }
  func.func @transform_4(%arg0: i32) -> (i32, i32) {
    %c0_i32 = arith.constant 0 : i32
    %c0_i32_0 = arith.constant 0 : i32
    %c0_i32_1 = arith.constant 0 : i32
    return %c0_i32, %c0_i32_0 : i32, i32
  }
  func.func @transform_5(%arg0: i32) -> (i32, i32) {
    %c0_i32 = arith.constant 0 : i32
    %c0_i32_0 = arith.constant 0 : i32
    %c0_i32_1 = arith.constant 0 : i32
    return %c0_i32, %c0_i32_0 : i32, i32
  }
  func.func @transform_6(%arg0: i32) -> (i32, i32) {
    %c0_i32 = arith.constant 0 : i32
    %c0_i32_0 = arith.constant 0 : i32
    %c0_i32_1 = arith.constant 0 : i32
    return %c0_i32, %c0_i32_0 : i32, i32
  }
  func.func @transform_7(%arg0: i32) -> (i32, i32, i32) {
    %c0_i32 = arith.constant 0 : i32
    %c0_i32_0 = arith.constant 0 : i32
    %c0_i32_1 = arith.constant 0 : i32
    return %arg0, %c0_i32, %c0_i32_0 : i32, i32, i32
  }
}

</mosaic_0001>

<bundles_post_ra>
// kernel: shufflev2_block_forward.1
= control target key start
LH: loop header
LB: loop body
LE: loop exit
PB: predicated region body
PF: predicated region fallthrough
CT: control target
= control target key end

     0   :  { %s4146_s24 = smov 0   ;;  %s6901_s0 = inlined_call_operand.vmem [shape: f32[8,4,512], index: 0, kind: input, shape index: {}]   ;;  %s6902_s1 = inlined_call_operand.vmem [shape: f32[8,4], index: 1, kind: input, shape index: {}]   ;;  %s6903_s2 = inlined_call_operand.vmem [shape: f32[8,1], index: 2, kind: input, shape index: {}]   ;;  %s6904_s3 = inlined_call_operand.vmem [shape: f32[27,8,256], index: 3, kind: input, shape index: {}]   ;;  %s6905_s4 = inlined_call_operand.vmem [shape: f32[8,1], index: 4, kind: input, shape index: {}]   ;;  %s6906_s5 = inlined_call_operand.vmem [shape: f32[4,8], index: 5, kind: input, shape index: {}]   ;;  %s6907_s6 = inlined_call_operand.vmem [shape: f32[4,1], index: 6, kind: input, shape index: {}]   ;;  %s6908_s7 = inlined_call_operand.vmem [shape: f32[8,8,256], index: 7, kind: output, shape index: {}]  }
   0x1 LB: > { %s3935_s25 = sadd.s32 4294967295, %s4069_s24   ;;  %p3939_p0 = scmp.ge.s32.totalorder %s4069_s24, 1  ;;  %s4069_s24 = sphi %s4146_s24, %s17_s24  }
   0x2   : > { %p239_p1 = scmp.lt.s32.totalorder %s4069_s24, 3 }
   0x4   : > { %p240_p2 = pnand %p3939_p0, %p239_p1 }
   0x6   : > { %243 = sbr.rel (%p240_p2) target bundleno = 2837 (0xb15), region = 48 }
   0xd   : > { %v295_v0 = vld [vmem:[%s6902_s1] sm:$0xff]  ;;  %v6912_v1 = vmov 2   ;;  %v4072_v2 = vmov 1   ;;  %v6911_v3 = vmov 3   ;;  %v6909_v4 = vmov 0   ;;  %s4075_s9 = smov 55  }
   0xe   : > { %4047 = vset.pattern.permute.xlu1 %v6912_v1  ;;  %4045 = vset.pattern.permute.xlu0 %v4072_v2  ;;  %v719_v5 = vld [vmem:[%s6904_s3] sm:$0xff]  ;;  %v3946_v7 = vld [vmem:[%s6904_s3 + $0x10] sm:$0xff]  ;;  %v720_v8 = vld [vmem:[%s6904_s3 + $0x8] sm:$0xff]  ;;  %s4076_s14 = smov 56   ;;  %s4077_s19 = smov 57   ;;  %v306_v20 = vlaneseq  ;;  %vm765_vm0 = vcmask 457728  }
   0xf   : > { %487 = vperm.xlu1 %4047, %v295_v0   ;;  %395 = vperm.xlu0 %4045, %v295_v0   ;;  %v296_v6 = vld [vmem:[%s6903_s2] sm:$0xff]  ;;  %v3947_v10 = vld [vmem:[%s6904_s3 + $0x18] sm:$0xff]  ;;  %v3950_v11 = vld [vmem:[%s6904_s3 + $0x30] sm:$0xff]  ;;  %s4078_s26 = smov 63   ;;  %s4079_s8 = smov 64   ;;  %vm860_vm1 = vcmask 465920  }
  0x10   : > { %v3948_v9 = vld [vmem:[%s6904_s3 + $0x20] sm:$0xff]  ;;  %v3949_v12 = vld [vmem:[%s6904_s3 + $0x28] sm:$0xff]  ;;  %v3951_v14 = vld [vmem:[%s6904_s3 + $0x38] sm:$0xff]  ;;  %s4080_s15 = smov 65   ;;  %s3940_s18 = sshll.u32 %s3935_s25, 2  ;;  %v307_v22 = vshrl.u32 %v306_v20, 7 }
  0x11   : > { %v3952_v13 = vld [vmem:[%s6904_s3 + $0x40] sm:$0xff]  ;;  %v3954_v15 = vld [vmem:[%s6904_s3 + $0x50] sm:$0xff]  ;;  %v3953_v16 = vld [vmem:[%s6904_s3 + $0x48] sm:$0xff]  ;;  %p274_p3 = scmp.lt.s32.totalorder %s3940_s18, 7  ;;  %s4081_s25 = smov 127   ;;  %vm955_vm2 = vcmask 515072  }
  0x12   : > { %v3955_v17 = vld [vmem:[%s6904_s3 + $0x58] sm:$0xff]  ;;  %v4230_v23 = vsub.s32 1, %v307_v22  ;;  %v4232_v24 = vsub.s32 5, %v307_v22  ;;  %v4253_v33 = vsub.s32 2, %v307_v22  ;;  %v4259_v36 = vsub.s32 6, %v307_v22  ;;  %s4082_s27 = smov 126  }
  0x13   : > { %4048 = vset.pattern.permute.xlu1 %v6911_v3  ;;  %4046 = vset.pattern.permute.xlu0 %v6909_v4  ;;  %s7559_s18 = smov (!%p274_p3, %s3940_s18), 7  ;;  %v4261_v37 = vsub.s32 0, %v307_v22  ;;  %v4275_v43 = vsub.s32 3, %v307_v22  ;;  %v4279_v46 = vsub.s32 4, %v307_v22  ;;  %s4083_s28 = smov 120   ;;  %vm1050_vm3 = vcmask 523264  }
  0x14   : > { %579 = vperm.xlu1 %4048, %v295_v0   ;;  %299 = vperm.xlu0 %4046, %v295_v0   ;;  %s6946_s20 = sshll.u32 %s7559_s18, 4  ;;  %7092 = vst [vmem:[#allocation3_spill] sm:$0xff] %v4230_v23  ;;  %7093 = vst [vmem:[#allocation4_spill] sm:$0xff] %v4232_v24  ;;  %s7037_s29 = smov 119   ;;  %vm1145_vm4 = vcmask 531456   ;;  %vm1240_vm5 = vcmask 580608  }
  0x15   : > { %s4228_s23 = scalar_lea.vmem %s6901_s0, %s6946_s20  ;;  %7094 = vst [vmem:[#allocation5_spill] sm:$0xff] %v4253_v33  ;;  %7095 = vst [vmem:[#allocation6_spill] sm:$0xff] %v4259_v36  ;;  %s7035_s30 = smov 118   ;;  %vm1335_vm6 = vcmask 588800   ;;  %vm7089_vm7 = vcmask 596992   ;;  %vm1103_vm8 = vcmask 973824  }
  0x16   : > { %v4235_v25 = vld [vmem:[%s4228_s23 + $0x8] sm:$0xff]  ;;  %v4240_v27 = vld [vmem:[%s4228_s23 + $0x18] sm:$0xff]  ;;  %7096 = vst [vmem:[#allocation7_spill] sm:$0xff] %v4261_v37  ;;  %7097 = vst [vmem:[#allocation8_spill] sm:$0xff] %v4275_v43  ;;  %s4086_s16 = smov 71   ;;  %s7009_s17 = smov 112  }
  0x17   : > { %v4243_v28 = vld [vmem:[%s4228_s23 + $0x28] sm:$0xff]  ;;  %v4246_v29 = vld [vmem:[%s4228_s23 + $0x38] sm:$0xff]  ;;  %v401_v30 = vrot.slane %v4235_v25, %v4230_v23  ;;  %v405_v31 = vrot.slane %v4235_v25, %v4232_v24  ;;  %v409_v34 = vrot.slane %v4240_v27, %v4230_v23  ;;  %v413_v35 = vrot.slane %v4240_v27, %v4232_v24  ;;  %7098 = vst [vmem:[#allocation9_spill] sm:$0xff] %v4279_v46  ;;  %s4088_s12 = smov 72   ;;  %s6956_s13 = smov 111  }
  0x18   : > { %4049 = vset.pattern.permute.xlu1 %v6909_v4  ;;  %723 = vrot.lane.b32.xlu0 %v719_v5, %s4075_s9  ;;  %v417_v38 = vrot.slane %v4243_v28, %v4230_v23  ;;  %v421_v39 = vrot.slane %v4243_v28, %v4232_v24  ;;  %v425_v40 = vrot.slane %v4246_v29, %v4230_v23  ;;  %s7039_s20 = smov 73   ;;  %s6974_s21 = smov 110   ;;  %vm1008_vm9 = vcmask 982016  }
  0x19   : > { %672 = vperm.xlu1 %4049, %v296_v6   ;;  %v429_v41 = vrot.slane %v4246_v29, %v4232_v24  ;;  %v441_v44 = vrot.slane %v401_v30, %v4230_v23  ;;  %v445_v45 = vrot.slane %v405_v31, %v4230_v23  ;;  %v4282_v47 = vrot.slane %v409_v34, %v4230_v23  ;;  %s4092_s10 = smov 121   ;;  %s4095_s11 = smov 54  }
  0x1a   : > { %v453_v48 = vrot.slane %v413_v35, %v4230_v23  ;;  %v493_v49 = vrot.slane %v4235_v25, %v4253_v33  ;;  %v497_v50 = vrot.slane %v4235_v25, %v4259_v36  ;;  %v4290_v51 = vrot.slane %v417_v38, %v4230_v23  ;;  %s4096_s22 = smov 7  }
  0x1b   : > { %v4293_v52 = vrot.slane %v421_v39, %v4230_v23  ;;  %v309_v54 = vrot.slane %v4235_v25, %v4261_v37  ;;  %v4303_v56 = vrot.slane %v425_v40, %v4230_v23  ;;  %v4306_v57 = vrot.slane %v429_v41, %v4230_v23 }
  0x1c   : > { %761 = vrot.lane.b32.xlu0 %v3946_v7, %s4076_s14  ;;  %v501_v58 = vrot.slane %v4240_v27, %v4253_v33  ;;  %v505_v59 = vrot.slane %v4240_v27, %v4259_v36  ;;  %v509_v60 = vrot.slane %v4243_v28, %v4253_v33  ;;  %v513_v61 = vrot.slane %v4243_v28, %v4259_v36 }
  0x1d   : > { %725 = vrot.lane.b32.xlu1 %v720_v8, %s4075_s9  ;;  %v313_v62 = vrot.slane %v4235_v25, %v4279_v46  ;;  %v321_v63 = vrot.slane %v4240_v27, %v4279_v46  ;;  %v517_v0 = vrot.slane %v4246_v29, %v4253_v33  ;;  %v533_v5 = vrot.slane %v493_v49, %v4253_v33 }
  0x1e   : > { %4050 = vset.pattern.permute.xlu1 %v4072_v2  ;;  %v521_v2 = vrot.slane %v4246_v29, %v4259_v36  ;;  %v537_v6 = vrot.slane %v497_v50, %v4253_v33  ;;  %v317_v7 = vrot.slane %v4240_v27, %v4261_v37  ;;  %v325_v8 = vrot.slane %v4243_v28, %v4261_v37 }
  0x1f   : > { %v361_v20 = vrot.slane %v321_v63, %v4261_v37  ;;  %v4353_v30 = vrot.slane %v513_v61, %v4253_v33  ;;  %v4356_v31 = vrot.slane %v517_v0, %v4253_v33  ;;  %v585_v34 = vrot.slane %v4235_v25, %v4275_v43 }
  0x20   : > { %856 = vrot.lane.b32.xlu0 %v3948_v9, %s4077_s19  ;;  %v349_v9 = vrot.slane %v309_v54, %v4261_v37  ;;  %v357_v38 = vrot.slane %v317_v7, %v4261_v37  ;;  %v365_v39 = vrot.slane %v325_v8, %v4261_v37  ;;  %v593_v63 = vrot.slane %v4240_v27, %v4275_v43 }
  0x21   : > { %763 = vrot.lane.b32.xlu1 %v3947_v10, %s4076_s14  ;;  %v4331_v10 = vsub.s32 7, %v307_v22  ;;  %v601_v0 = vrot.slane %v4243_v28, %v4275_v43  ;;  %vm1711_vm10 = vcmask 990208   ;;  %vm818_vm11 = vcmask 1039360  }
  0x22   : > { %vm1974_vm12 = vcmask 7168   ;;  %vm2069_vm13 = vcmask 56320   ;;  %vm2164_vm14 = vcmask 64512   ;;  %vm2259_vm15 = vcmask 72704  }
  0x23   : > { %7099 = vst [vmem:[#allocation10_spill] sm:$0xff] %v4331_v10  ;;  %v589_v54 = vrot.slane %v4235_v25, %v4331_v10  ;;  %v625_v25 = vrot.slane %v585_v34, %v4275_v43  ;;  %v641_v34 = vrot.slane %v601_v0, %v4275_v43 }
  0x24   : > { %951 = vrot.lane.b32.xlu0 %v3950_v11, %s4078_s26  ;;  %v4336_v11 = vrot.slane %v501_v58, %v4253_v33  ;;  %v597_v58 = vrot.slane %v4240_v27, %v4331_v10  ;;  %v605_v27 = vrot.slane %v4243_v28, %v4331_v10 }
  0x25   : > { %858 = vrot.lane.b32.xlu1 %v3949_v12, %s4077_s19  ;;  %v545_v12 = vrot.slane %v505_v59, %v4253_v33 }
  0x28   : > { %1046 = vrot.lane.b32.xlu0 %v3952_v13, %s4079_s8  ;;  %v329_v13 = vrot.slane %v4243_v28, %v4279_v46  ;;  %v633_v28 = vrot.slane %v593_v63, %v4275_v43 }
  0x29   : > { %953 = vrot.lane.b32.xlu1 %v3951_v14, %s4078_s26  ;;  %v333_v14 = vrot.slane %v4246_v29, %v4261_v37 }
  0x2a   : > { %v369_v49 = vrot.slane %v329_v13, %v4261_v37 }
  0x2b   : > { %v4373_v50 = vrot.slane %v333_v14, %v4261_v37 }
  0x2c   : > { %1141 = vrot.lane.b32.xlu0 %v3954_v15, %s4080_s15  ;;  %v4344_v15 = vrot.slane %v509_v60, %v4253_v33 }
  0x2d   : > { %1048 = vrot.lane.b32.xlu1 %v3953_v16, %s4079_s8  ;;  %v337_v16 = vrot.slane %v4246_v29, %v4279_v46 }
  0x2f   : > { %v377_v60 = vrot.slane %v337_v16, %v4261_v37 }
  0x31   : > { %1143 = vrot.lane.b32.xlu1 %v3955_v17, %s4080_s15  ;;  %v353_v17 = vrot.slane %v313_v62, %v4261_v37 }
  0x8e   : > { %v4212_v18 = vpop.permute.xlu0 %395  ;;  %v4295_v53 = vpop.permute.xlu1 %487 }
  0x8f   : > { %v470_v59 = vmul.f32 %v441_v44, %v4212_v18  ;;  %v562_v44 = vmul.f32 %v533_v5, %v4295_v53  ;;  %v563_v5 = vmul.f32 %v537_v6, %v4295_v53  ;;  %v565_v13 = vmul.f32 %v545_v12, %v4295_v53 }
  0x93   : > { %v4216_v19 = vpop.permute.xlu0 %299  ;;  %v4350_v22 = vpop.permute.xlu1 %579 }
  0x94   : > { %v378_v40 = vmul.f32 %v349_v9, %v4216_v19  ;;  %v379_v61 = vmul.f32 %v353_v17, %v4216_v19  ;;  %v381_v62 = vmul.f32 %v361_v20, %v4216_v19  ;;  %v629_v9 = vrot.slane %v589_v54, %v4275_v43 }
  0x95   : > { %v380_v17 = vmul.f32 %v357_v38, %v4216_v19  ;;  %v613_v20 = vrot.slane %v4246_v29, %v4331_v10  ;;  %v382_v54 = vmul.f32 %v365_v39, %v4216_v19  ;;  %v472_v38 = vmul.f32 %v4282_v47, %v4212_v18 }
  0x96   : > { %v478_v7 = vadd.f32 %v470_v59, %v378_v40  ;;  %v474_v59 = vmul.f32 %v4290_v51, %v4212_v18  ;;  %v655_v39 = vmul.f32 %v629_v9, %v4350_v22  ;;  %v477_v47 = vmul.f32 %v4306_v57, %v4212_v18 }
  0x97   : > { %v4221_v21 = vpop.permute.xlu0 %723  ;;  %v564_v51 = vmul.f32 %v4336_v11, %v4295_v53  ;;  %v645_v57 = vrot.slane %v605_v27, %v4275_v43  ;;  %v653_v9 = vrot.slane %v613_v20, %v4275_v43 }
  0x98   : > { %v4391_v8 = vpop.permute.xlu1 %672  ;;  %v570_v6 = vadd.f32 %v562_v44, %v478_v7 }
  0x9b   : > { %v4237_v26 = vpop.permute.xlu0 %761 }
  0x9c   : > { %v770_v32 = vmul.f32 0.0, %v4237_v26 }
  0x9e   : > { %800 = vrot.lane.b32.xlu1 %v770_v32, %s4081_s25  ;;  %794 = vrot.lane.b32.xlu0 %v770_v32, %s4081_s25 }
  0x9f   : > { %v4273_v42 = vpop.permute.xlu0 %856 }
  0xa0   : > { %v865_v55 = vmul.f32 0.0, %v4273_v42 }
  0xa2   : > { %812 = vrot.lane.b32.xlu1 %v770_v32, %s4081_s25  ;;  %806 = vrot.lane.b32.xlu0 %v770_v32, %s4081_s25  ;;  %v4359_v32 = vrot.slane %v521_v2, %v4253_v33  ;;  %v473_v2 = vmul.f32 %v453_v48, %v4212_v18  ;;  %v637_v48 = vrot.slane %v597_v58, %v4275_v43 }
  0xa3   : > { %v4363_v35 = vpop.permute.xlu0 %951  ;;  %v654_v58 = vmul.f32 %v625_v25, %v4350_v22  ;;  %v4423_v25 = vpop.permute.xlu1 %725 }
  0xa4   : > { %v960_v41 = vmul.f32 0.0, %v4363_v35  ;;  %v481_v16 = vadd.f32 %v473_v2, %v381_v62  ;;  %v385_v62 = vmul.f32 %v377_v60, %v4216_v19  ;;  %v480_v60 = vadd.f32 %v472_v38, %v380_v17 }
  0xa5   : > { %v482_v2 = vadd.f32 %v474_v59, %v382_v54  ;;  %v662_v44 = vadd.f32 %v654_v58, %v570_v6  ;;  %v569_v11 = vmul.f32 %v4359_v32, %v4295_v53  ;;  %v568_v59 = vmul.f32 %v4356_v31, %v4295_v53 }
  0xa6   : > { %895 = vrot.lane.b32.xlu1 %v865_v55, %s4082_s27  ;;  %889 = vrot.lane.b32.xlu0 %v865_v55, %s4082_s27  ;;  %v573_v0 = vadd.f32 %v565_v13, %v481_v16  ;;  %v384_v13 = vmul.f32 %v4373_v50, %v4216_v19  ;;  %v658_v16 = vmul.f32 %v641_v34, %v4350_v22 }
  0xa7   : > { %v4408_v40 = vpop.permute.xlu0 %1046  ;;  %v675_v20 = vadd.f32 %v4391_v8, %v662_v44  ;;  %v764_v54 = vpop.permute.xlu1 %763  ;;  %v659_v50 = vmul.f32 %v645_v57, %v4350_v22  ;;  %v661_v34 = vmul.f32 %v653_v9, %v4350_v22 }
  0xa8   : > { %v1055_v12 = vmul.f32 0.0, %v4408_v40 }
  0xaa   : > { %907 = vrot.lane.b32.xlu1 %v865_v55, %s4082_s27  ;;  %901 = vrot.lane.b32.xlu0 %v865_v55, %s4082_s27  ;;  %v471_v55 = vmul.f32 %v445_v45, %v4212_v18  ;;  %v609_v45 = vrot.slane %v4246_v29, %v4275_v43 }
  0xab   : > { %v4445_v17 = vpop.permute.xlu0 %1141 }
  0xac   : > { %v479_v14 = vadd.f32 %v471_v55, %v379_v61  ;;  %v383_v61 = vmul.f32 %v369_v49, %v4216_v19  ;;  %v657_v55 = vmul.f32 %v637_v48, %v4350_v22  ;;  %v566_v49 = vmul.f32 %v4344_v15, %v4295_v53 }
  0xad   : > { %v485_v15 = vadd.f32 %v477_v47, %v385_v62  ;;  %v4449_v32 = vmul.f32 0.0, %v4445_v17  ;;  %v476_v19 = vmul.f32 %v4303_v56, %v4212_v18 }
  0xae   : > { %990 = vrot.lane.b32.xlu1 %v960_v41, %s4083_s28  ;;  %984 = vrot.lane.b32.xlu0 %v960_v41, %s4083_s28  ;;  %v571_v63 = vadd.f32 %v563_v5, %v479_v14  ;;  %v665_v5 = vadd.f32 %v657_v55, %v573_v0  ;;  %v656_v14 = vmul.f32 %v633_v28, %v4350_v22 }
  0xaf   : > { %v574_v27 = vadd.f32 %v566_v49, %v482_v2  ;;  %v577_v58 = vadd.f32 %v569_v11, %v485_v15  ;;  %v484_v56 = vadd.f32 %v476_v19, %v384_v13  ;;  %v859_v15 = vpop.permute.xlu1 %858 }
  0xb0   : > { %v663_v48 = vadd.f32 %v655_v39, %v571_v63  ;;  %v678_v38 = vadd.f32 %v4391_v8, %v665_v5  ;;  %v4467_v39 = vmax.f32 %v675_v20, 0.0  ;;  %v861_v13 = vsel %vm860_vm1, %v4273_v42, %v859_v15 }
  0xb1   : > { %v666_v62 = vadd.f32 %v658_v16, %v574_v27  ;;  %v669_v31 = vadd.f32 %v661_v34, %v577_v58  ;;  %v576_v63 = vadd.f32 %v568_v59, %v484_v56 }
  0xb2   : > { %1002 = vrot.lane.b32.xlu1 %v960_v41, %s4083_s28  ;;  %996 = vrot.lane.b32.xlu0 %v960_v41, %s4083_s28  ;;  %v475_v41 = vmul.f32 %v4293_v52, %v4212_v18  ;;  %v567_v52 = vmul.f32 %v4353_v30, %v4295_v53  ;;  %v572_v30 = vadd.f32 %v564_v51, %v480_v60  ;;  %v4475_v29 = vmax.f32 %v678_v38, 0.0 }
  0xb3   : > { %v676_v6 = vadd.f32 %v4391_v8, %v663_v48  ;;  %v766_v18 = vsel %vm765_vm0, %v4237_v26, %v764_v54  ;;  %v682_v51 = vadd.f32 %v4391_v8, %v669_v31  ;;  %v866_v16 = vmul.f32 %v861_v13, %v4467_v39 }
  0xb4   : > { %v483_v7 = vadd.f32 %v475_v41, %v383_v61  ;;  %v664_v61 = vadd.f32 %v656_v14, %v572_v30  ;;  %7100 = vst [vmem:[#allocation11_spill] sm:$0xff] %v4475_v29  ;;  %v771_v26 = vmul.f32 %v766_v18, %v4467_v39  ;;  %v679_v41 = vadd.f32 %v4391_v8, %v666_v62 }
  0xb5   : > { %v4473_v55 = vmax.f32 %v676_v6, 0.0  ;;  %v775_v60 = vmul.f32 %v764_v54, %v4475_v29  ;;  %v870_v27 = vmul.f32 %v859_v15, %v4475_v29 }
  0xb6   : > { %1085 = vrot.lane.b32.xlu1 %v1055_v12, %s7037_s29  ;;  %1079 = vrot.lane.b32.xlu0 %v1055_v12, %s7037_s29  ;;  %v575_v28 = vadd.f32 %v567_v52, %v483_v7  ;;  %v677_v0 = vadd.f32 %v4391_v8, %v664_v61  ;;  %v4490_v44 = vmax.f32 %v679_v41, 0.0  ;;  %v4496_v7 = vmax.f32 %v682_v51, 0.0 }
  0xb7   : > { %v772_v49 = vmul.f32 %v764_v54, %v4473_v55  ;;  %v867_v30 = vmul.f32 %v859_v15, %v4473_v55 }
  0xb8   : > { %v667_v53 = vadd.f32 %v659_v50, %v575_v28  ;;  %7102 = vst [vmem:[#allocation13_spill] sm:$0xff] %v4490_v44  ;;  %7103 = vst [vmem:[#allocation14_spill] sm:$0xff] %v4496_v7  ;;  %v777_v9 = vmul.f32 %v766_v18, %v4490_v44  ;;  %v781_v5 = vmul.f32 %v764_v54, %v4496_v7 }
  0xb9   : > { %v872_v20 = vmul.f32 %v861_v13, %v4490_v44  ;;  %v876_v50 = vmul.f32 %v859_v15, %v4496_v7 }
  0xba   : > { %1097 = vrot.lane.b32.xlu1 %v1055_v12, %s7037_s29  ;;  %1091 = vrot.lane.b32.xlu0 %v1055_v12, %s7037_s29  ;;  %v649_v12 = vrot.slane %v609_v45, %v4275_v43  ;;  %v680_v47 = vadd.f32 %v4391_v8, %v667_v53 }
  0xbc   : > { %v660_v45 = vmul.f32 %v649_v12, %v4350_v22  ;;  %v4488_v22 = vmax.f32 %v677_v0, 0.0  ;;  %v4494_v52 = vmax.f32 %v680_v47, 0.0 }
  0xbe   : > { %1180 = vrot.lane.b32.xlu1 %v4449_v32, %s7035_s30  ;;  %1174 = vrot.lane.b32.xlu0 %v4449_v32, %s7035_s30  ;;  %v668_v2 = vadd.f32 %v660_v45, %v576_v63  ;;  %7101 = vst [vmem:[#allocation12_spill] sm:$0xff] %v4488_v22  ;;  %v774_v57 = vmul.f32 %v766_v18, %v4488_v22 }
  0xbf   : > { %v778_v48 = vmul.f32 %v764_v54, %v4494_v52  ;;  %v869_v42 = vmul.f32 %v861_v13, %v4488_v22  ;;  %v954_v54 = vpop.permute.xlu1 %953  ;;  %v873_v19 = vmul.f32 %v859_v15, %v4494_v52 }
  0xc0   : > { %v681_v11 = vadd.f32 %v4391_v8, %v668_v2  ;;  %v956_v28 = vsel %vm955_vm2, %v4363_v35, %v954_v54  ;;  %v962_v6 = vmul.f32 %v954_v54, %v4473_v55  ;;  %v965_v38 = vmul.f32 %v954_v54, %v4475_v29 }
  0xc1   : > { %v961_v58 = vmul.f32 %v956_v28, %v4467_v39  ;;  %v964_v35 = vmul.f32 %v956_v28, %v4488_v22  ;;  %v967_v59 = vmul.f32 %v956_v28, %v4490_v44  ;;  %v971_v56 = vmul.f32 %v954_v54, %v4496_v7 }
  0xc2   : > { %1186 = vrot.lane.b32.xlu0 %v4449_v32, %s7035_s30  ;;  %796 = vrot.lane.b32.xlu1 %v771_v26, %s4081_s25  ;;  %v4507_v14 = vmax.f32 %v681_v11, 0.0 }
  0xc3   : > { %v1049_v12 = vpop.permute.xlu1 %1048 }
  0xc4   : > { %v780_v8 = vmul.f32 %v766_v18, %v4507_v14  ;;  %v875_v34 = vmul.f32 %v861_v13, %v4507_v14  ;;  %v968_v18 = vmul.f32 %v954_v54, %v4494_v52  ;;  %v1051_v61 = vsel %vm1050_vm3, %v4408_v40, %v1049_v12  ;;  %v3956_v13 = vld [vmem:[%s6904_s3 + $0x60] sm:$0xff] }
  0xc5   : > { %v970_v62 = vmul.f32 %v956_v28, %v4507_v14  ;;  %v1056_v53 = vmul.f32 %v1051_v61, %v4467_v39  ;;  %v1057_v31 = vmul.f32 %v1049_v12, %v4473_v55  ;;  %v1060_v26 = vmul.f32 %v1049_v12, %v4475_v29 }
  0xc6   : > { %798 = vrot.lane.b32.xlu0 %v772_v49, %s4081_s25  ;;  %804 = vrot.lane.b32.xlu1 %v775_v60, %s4081_s25  ;;  %v1059_v40 = vmul.f32 %v1051_v61, %v4488_v22  ;;  %v1062_v45 = vmul.f32 %v1051_v61, %v4490_v44  ;;  %v1063_v0 = vmul.f32 %v1049_v12, %v4494_v52 }
  0xc7   : > { %v1144_v63 = vpop.permute.xlu1 %1143  ;;  %v1066_v41 = vmul.f32 %v1049_v12, %v4496_v7  ;;  %v1065_v51 = vmul.f32 %v1051_v61, %v4507_v14 }
  0xc8   : > { %v1146_v47 = vsel %vm1145_vm4, %v4445_v17, %v1144_v63  ;;  %v1152_v60 = vmul.f32 %v1144_v63, %v4473_v55  ;;  %v1155_v2 = vmul.f32 %v1144_v63, %v4475_v29 }
  0xc9   : > { %v1151_v49 = vmul.f32 %v1146_v47, %v4467_v39  ;;  %v1154_v17 = vmul.f32 %v1146_v47, %v4488_v22 }
  0xca   : > { %802 = vrot.lane.b32.xlu0 %v774_v57, %s4081_s25  ;;  %808 = vrot.lane.b32.xlu1 %v777_v9, %s4081_s25  ;;  %v1157_v57 = vmul.f32 %v1146_v47, %v4490_v44  ;;  %v1158_v9 = vmul.f32 %v1144_v63, %v4494_v52 }
  0xce   : > { %810 = vrot.lane.b32.xlu0 %v778_v48, %s4081_s25  ;;  %816 = vrot.lane.b32.xlu1 %v781_v5, %s4081_s25  ;;  %v1160_v48 = vmul.f32 %v1146_v47, %v4507_v14  ;;  %v1161_v5 = vmul.f32 %v1144_v63, %v4496_v7 }
  0xd2   : > { %814 = vrot.lane.b32.xlu0 %v780_v8, %s4081_s25  ;;  %891 = vrot.lane.b32.xlu1 %v866_v16, %s4082_s27 }
  0xd6   : > { %893 = vrot.lane.b32.xlu0 %v867_v30, %s4082_s27  ;;  %899 = vrot.lane.b32.xlu1 %v870_v27, %s4082_s27 }
  0xda   : > { %897 = vrot.lane.b32.xlu0 %v869_v42, %s4082_s27  ;;  %903 = vrot.lane.b32.xlu1 %v872_v20, %s4082_s27 }
  0xde   : > { %905 = vrot.lane.b32.xlu0 %v873_v19, %s4082_s27  ;;  %911 = vrot.lane.b32.xlu1 %v876_v50, %s4082_s27 }
  0xe2   : > { %909 = vrot.lane.b32.xlu0 %v875_v34, %s4082_s27  ;;  %986 = vrot.lane.b32.xlu1 %v961_v58, %s4083_s28 }
  0xe6   : > { %988 = vrot.lane.b32.xlu0 %v962_v6, %s4083_s28  ;;  %994 = vrot.lane.b32.xlu1 %v965_v38, %s4083_s28 }
  0xea   : > { %992 = vrot.lane.b32.xlu0 %v964_v35, %s4083_s28  ;;  %998 = vrot.lane.b32.xlu1 %v967_v59, %s4083_s28 }
  0xee   : > { %1000 = vrot.lane.b32.xlu0 %v968_v18, %s4083_s28  ;;  %1006 = vrot.lane.b32.xlu1 %v971_v56, %s4083_s28 }
  0xf2   : > { %1004 = vrot.lane.b32.xlu0 %v970_v62, %s4083_s28  ;;  %1081 = vrot.lane.b32.xlu1 %v1056_v53, %s7037_s29 }
  0xf6   : > { %1083 = vrot.lane.b32.xlu0 %v1057_v31, %s7037_s29  ;;  %1089 = vrot.lane.b32.xlu1 %v1060_v26, %s7037_s29 }
  0xfa   : > { %1087 = vrot.lane.b32.xlu0 %v1059_v40, %s7037_s29  ;;  %1093 = vrot.lane.b32.xlu1 %v1062_v45, %s7037_s29 }
  0xfe   : > { %1095 = vrot.lane.b32.xlu0 %v1063_v0, %s7037_s29  ;;  %1101 = vrot.lane.b32.xlu1 %v1066_v41, %s7037_s29 }
 0x102   : > { %1099 = vrot.lane.b32.xlu0 %v1065_v51, %s7037_s29  ;;  %1176 = vrot.lane.b32.xlu1 %v1151_v49, %s7035_s30 }
 0x106   : > { %1178 = vrot.lane.b32.xlu0 %v1152_v60, %s7035_s30  ;;  %1184 = vrot.lane.b32.xlu1 %v1155_v2, %s7035_s30 }
 0x10a   : > { %1182 = vrot.lane.b32.xlu0 %v1154_v17, %s7035_s30  ;;  %1188 = vrot.lane.b32.xlu1 %v1157_v57, %s7035_s30 }
 0x10e   : > { %1190 = vrot.lane.b32.xlu0 %v1158_v9, %s7035_s30  ;;  %1192 = vrot.lane.b32.xlu1 %v4449_v32, %s7035_s30  ;;  %v3957_v32 = vld [vmem:[%s6904_s3 + $0x68] sm:$0xff] }
 0x110   : > { %v4581_v11 = vpop.permute.xlu1 %800  ;;  %v4583_v15 = vpop.permute.xlu0 %794 }
 0x112   : > { %1194 = vrot.lane.b32.xlu0 %v1160_v48, %s7035_s30  ;;  %1196 = vrot.lane.b32.xlu1 %v1161_v5, %s7035_s30 }
 0x114   : > { %v4595_v8 = vpop.permute.xlu1 %812  ;;  %v4597_v16 = vpop.permute.xlu0 %806 }
 0x116   : > { %1236 = vrot.lane.b32.xlu0 %v3956_v13, %s4086_s16  ;;  %1238 = vrot.lane.b32.xlu1 %v3957_v32, %s4086_s16 }
 0x118   : > { %v4601_v30 = vpop.permute.xlu1 %895  ;;  %v4603_v27 = vpop.permute.xlu0 %889 }
 0x11c   : > { %v4605_v42 = vpop.permute.xlu1 %907  ;;  %v4607_v20 = vpop.permute.xlu0 %901 }
 0x120   : > { %v4609_v54 = vpop.permute.xlu1 %990  ;;  %v4611_v19 = vpop.permute.xlu0 %984 }
 0x124   : > { %v4613_v50 = vpop.permute.xlu1 %1002  ;;  %v4615_v28 = vpop.permute.xlu0 %996 }
 0x128   : > { %v4617_v34 = vpop.permute.xlu1 %1085  ;;  %v4619_v58 = vpop.permute.xlu0 %1079 }
 0x129   : > { %7104 = vst [vmem:[#allocation15_spill] sm:$0xff] %v4617_v34 }
 0x12c   : > { %v4621_v6 = vpop.permute.xlu1 %1097  ;;  %v4623_v38 = vpop.permute.xlu0 %1091 }
 0x12d   : > { %7105 = vst [vmem:[#allocation16_spill] sm:$0xff] %v4621_v6  ;;  %7106 = vst [vmem:[#allocation17_spill] sm:$0xff] %v4623_v38 }
 0x130   : > { %v4625_v35 = vpop.permute.xlu1 %1180  ;;  %v4627_v59 = vpop.permute.xlu0 %1174 }
 0x131   : > { %7107 = vst [vmem:[#allocation18_spill] sm:$0xff] %v4625_v35  ;;  %7108 = vst [vmem:[#allocation19_spill] sm:$0xff] %v4627_v59 }
 0x134   : > { %v4629_v12 = vpop.permute.xlu0 %1186  ;;  %v4631_v18 = vpop.permute.xlu1 %796 }
 0x135   : > { %7109 = vst [vmem:[#allocation20_spill] sm:$0xff] %v4629_v12 }
 0x138   : > { %v4633_v56 = vpop.permute.xlu0 %798  ;;  %v4635_v61 = vpop.permute.xlu1 %804 }
 0x13c   : > { %v4637_v62 = vpop.permute.xlu0 %802  ;;  %v4639_v53 = vpop.permute.xlu1 %808 }
 0x140   : > { %v4641_v31 = vpop.permute.xlu0 %810  ;;  %v4643_v26 = vpop.permute.xlu1 %816 }
 0x144   : > { %v4645_v40 = vpop.permute.xlu0 %814  ;;  %v4647_v45 = vpop.permute.xlu1 %891 }
 0x148   : > { %v4649_v63 = vpop.permute.xlu0 %893  ;;  %v4651_v0 = vpop.permute.xlu1 %899 }
 0x14c   : > { %v4653_v41 = vpop.permute.xlu0 %897  ;;  %v4655_v47 = vpop.permute.xlu1 %903 }
 0x150   : > { %v4657_v51 = vpop.permute.xlu0 %905  ;;  %v4659_v49 = vpop.permute.xlu1 %911 }
 0x151   : > { %7110 = vst [vmem:[#allocation21_spill] sm:$0xff] %v4659_v49 }
 0x154   : > { %v4661_v60 = vpop.permute.xlu0 %909  ;;  %v4663_v2 = vpop.permute.xlu1 %986 }
 0x158   : > { %v4665_v17 = vpop.permute.xlu0 %988  ;;  %v4667_v57 = vpop.permute.xlu1 %994 }
 0x15c   : > { %v4669_v9 = vpop.permute.xlu0 %992  ;;  %v4671_v48 = vpop.permute.xlu1 %998 }
 0x160   : > { %v4673_v5 = vpop.permute.xlu0 %1000  ;;  %v4675_v13 = vpop.permute.xlu1 %1006 }
 0x161   : > { %7111 = vst [vmem:[#allocation22_spill] sm:$0xff] %v4675_v13 }
 0x164   : > { %v4677_v32 = vpop.permute.xlu0 %1004  ;;  %v4679_v4 = vpop.permute.xlu1 %1081 }
 0x168   : > { %v4681_v3 = vpop.permute.xlu0 %1083  ;;  %v4683_v1 = vpop.permute.xlu1 %1089 }
 0x169   : > { %7112 = vst [vmem:[#allocation23_spill] sm:$0xff] %v4683_v1 }
 0x16c   : > { %v4685_v10 = vpop.permute.xlu0 %1087  ;;  %v4687_v36 = vpop.permute.xlu1 %1093 }
 0x16d   : > { %7113 = vst [vmem:[#allocation24_spill] sm:$0xff] %v4685_v10  ;;  %7114 = vst [vmem:[#allocation25_spill] sm:$0xff] %v4687_v36 }
 0x170   : > { %v4689_v24 = vpop.permute.xlu0 %1095  ;;  %v4691_v46 = vpop.permute.xlu1 %1101 }
 0x171   : > { %7115 = vst [vmem:[#allocation26_spill] sm:$0xff] %v4689_v24  ;;  %7116 = vst [vmem:[#allocation27_spill] sm:$0xff] %v4691_v46 }
 0x174   : > { %v4693_v43 = vpop.permute.xlu0 %1099  ;;  %v4695_v33 = vpop.permute.xlu1 %1176 }
 0x175   : > { %7117 = vst [vmem:[#allocation28_spill] sm:$0xff] %v4693_v43  ;;  %7118 = vst [vmem:[#allocation29_spill] sm:$0xff] %v4695_v33 }
 0x178   : > { %v4697_v23 = vpop.permute.xlu0 %1178  ;;  %v4699_v37 = vpop.permute.xlu1 %1184 }
 0x179   : > { %7119 = vst [vmem:[#allocation30_spill] sm:$0xff] %v4697_v23  ;;  %7120 = vst [vmem:[#allocation31_spill] sm:$0xff] %v4699_v37 }
 0x17c   : > { %v4701_v13 = vpop.permute.xlu0 %1182  ;;  %v4703_v49 = vpop.permute.xlu1 %1188 }
 0x17d   : > { %7121 = vst [vmem:[#allocation32_spill] sm:$0xff] %v4701_v13  ;;  %7122 = vst [vmem:[#allocation33_spill] sm:$0xff] %v4703_v49 }
 0x180   : > { %v4705_v12 = vpop.permute.xlu0 %1190  ;;  %v4707_v35 = vpop.permute.xlu1 %1192 }
 0x181   : > { %7123 = vst [vmem:[#allocation34_spill] sm:$0xff] %v4705_v12  ;;  %7124 = vst [vmem:[#allocation35_spill] sm:$0xff] %v4707_v35 }
 0x184   : > { %v4709_v59 = vpop.permute.xlu0 %1194  ;;  %v4711_v6 = vpop.permute.xlu1 %1196 }
 0x185   : > { %7125 = vst [vmem:[#allocation36_spill] sm:$0xff] %v4709_v59  ;;  %7126 = vst [vmem:[#allocation37_spill] sm:$0xff] %v4711_v6 }
 0x188   : > { %v1237_v46 = vpop.permute.xlu0 %1236  ;;  %v1239_v43 = vpop.permute.xlu1 %1238 }
 0x189   : > { %v1245_v33 = vmul.f32 0.0, %v1237_v46  ;;  %v1241_v23 = vsel %vm1240_vm5, %v1237_v46, %v1239_v43  ;;  %v1247_v12 = vmul.f32 %v1239_v43, %v4473_v55  ;;  %v1250_v35 = vmul.f32 %v1239_v43, %v4475_v29 }
 0x18a   : > { %v1246_v37 = vmul.f32 %v1241_v23, %v4467_v39  ;;  %v1249_v6 = vmul.f32 %v1241_v23, %v4488_v22  ;;  %v1252_v46 = vmul.f32 %v1241_v23, %v4490_v44  ;;  %v1256_v59 = vmul.f32 %v1239_v43, %v4496_v7 }
 0x18b   : > { %1269 = vrot.lane.b32.xlu0 %v1245_v33, %s7009_s17 }
 0x18c   : > { %1271 = vrot.lane.b32.xlu1 %v1246_v37, %s7009_s17  ;;  %v1253_v37 = vmul.f32 %v1239_v43, %v4494_v52 }
 0x18f   : > { %1273 = vrot.lane.b32.xlu0 %v1247_v12, %s7009_s17  ;;  %v1255_v12 = vmul.f32 %v1241_v23, %v4507_v14 }
 0x190   : > { %1275 = vrot.lane.b32.xlu1 %v1245_v33, %s7009_s17 }
 0x193   : > { %1277 = vrot.lane.b32.xlu0 %v1249_v6, %s7009_s17  ;;  %v3958_v6 = vld [vmem:[%s6904_s3 + $0x70] sm:$0xff] }
 0x194   : > { %1279 = vrot.lane.b32.xlu1 %v1250_v35, %s7009_s17  ;;  %v3959_v35 = vld [vmem:[%s6904_s3 + $0x78] sm:$0xff] }
 0x197   : > { %1281 = vrot.lane.b32.xlu0 %v1245_v33, %s7009_s17 }
 0x198   : > { %1283 = vrot.lane.b32.xlu1 %v1252_v46, %s7009_s17 }
 0x19b   : > { %1285 = vrot.lane.b32.xlu0 %v1253_v37, %s7009_s17 }
 0x19c   : > { %1287 = vrot.lane.b32.xlu1 %v1245_v33, %s7009_s17 }
 0x19f   : > { %1289 = vrot.lane.b32.xlu0 %v1255_v12, %s7009_s17 }
 0x1a0   : > { %1291 = vrot.lane.b32.xlu1 %v1256_v59, %s7009_s17  ;;  %s4097_s17 = smov 48  }
 0x1a3   : > { %1331 = vrot.lane.b32.xlu0 %v3958_v6, %s4088_s12 }
 0x1a4   : > { %1333 = vrot.lane.b32.xlu1 %v3959_v35, %s4088_s12 }
 0x1fd   : > { %v4742_v23 = vpop.permute.xlu0 %1269 }
 0x1fe   : > { %7127 = vst [vmem:[#allocation38_spill] sm:$0xff] %v4742_v23  ;;  %v4744_v33 = vpop.permute.xlu1 %1271 }
 0x1ff   : > { %7128 = vst [vmem:[#allocation39_spill] sm:$0xff] %v4744_v33 }
 0x201   : > { %v4746_v43 = vpop.permute.xlu0 %1273 }
 0x202   : > { %7129 = vst [vmem:[#allocation40_spill] sm:$0xff] %v4746_v43  ;;  %v4748_v59 = vpop.permute.xlu1 %1275 }
 0x203   : > { %7130 = vst [vmem:[#allocation41_spill] sm:$0xff] %v4748_v59 }
 0x205   : > { %v4750_v46 = vpop.permute.xlu0 %1277 }
 0x206   : > { %7131 = vst [vmem:[#allocation42_spill] sm:$0xff] %v4750_v46  ;;  %v4752_v37 = vpop.permute.xlu1 %1279 }
 0x207   : > { %7132 = vst [vmem:[#allocation43_spill] sm:$0xff] %v4752_v37 }
 0x209   : > { %v4754_v12 = vpop.permute.xlu0 %1281 }
 0x20a   : > { %7133 = vst [vmem:[#allocation44_spill] sm:$0xff] %v4754_v12  ;;  %v4756_v49 = vpop.permute.xlu1 %1283 }
 0x20b   : > { %7134 = vst [vmem:[#allocation45_spill] sm:$0xff] %v4756_v49 }
 0x20d   : > { %v4758_v13 = vpop.permute.xlu0 %1285 }
 0x20e   : > { %7135 = vst [vmem:[#allocation46_spill] sm:$0xff] %v4758_v13  ;;  %v4760_v6 = vpop.permute.xlu1 %1287 }
 0x20f   : > { %7136 = vst [vmem:[#allocation47_spill] sm:$0xff] %v4760_v6 }
 0x211   : > { %v4762_v35 = vpop.permute.xlu0 %1289 }
 0x212   : > { %7137 = vst [vmem:[#allocation48_spill] sm:$0xff] %v4762_v35  ;;  %v4764_v23 = vpop.permute.xlu1 %1291 }
 0x213   : > { %7138 = vst [vmem:[#allocation49_spill] sm:$0xff] %v4764_v23 }
 0x215   : > { %v1332_v43 = vpop.permute.xlu0 %1331 }
 0x216   : > { %v1340_v33 = vmul.f32 0.0, %v1332_v43  ;;  %v1334_v59 = vpop.permute.xlu1 %1333 }
 0x217   : > { %v1336_v46 = vsel %vm1335_vm6, %v1332_v43, %v1334_v59  ;;  %v1342_v13 = vmul.f32 %v1334_v59, %v4473_v55  ;;  %v1345_v6 = vmul.f32 %v1334_v59, %v4475_v29 }
 0x218   : > { %1364 = vrot.lane.b32.xlu0 %v1340_v33, %s6956_s13  ;;  %v1341_v12 = vmul.f32 %v1336_v46, %v4467_v39  ;;  %v1344_v23 = vmul.f32 %v1336_v46, %v4488_v22  ;;  %v1347_v43 = vmul.f32 %v1336_v46, %v4490_v44 }
 0x21a   : > { %1366 = vrot.lane.b32.xlu1 %v1341_v12, %s6956_s13  ;;  %v1348_v12 = vmul.f32 %v1334_v59, %v4494_v52 }
 0x21c   : > { %1368 = vrot.lane.b32.xlu0 %v1342_v13, %s6956_s13  ;;  %v1350_v13 = vmul.f32 %v1336_v46, %v4507_v14 }
 0x21e   : > { %1370 = vrot.lane.b32.xlu1 %v1340_v33, %s6956_s13 }
 0x220   : > { %1372 = vrot.lane.b32.xlu0 %v1344_v23, %s6956_s13  ;;  %v1351_v23 = vmul.f32 %v1334_v59, %v4496_v7 }
 0x222   : > { %1374 = vrot.lane.b32.xlu1 %v1345_v6, %s6956_s13  ;;  %v3960_v6 = vld [vmem:[%s6904_s3 + $0x80] sm:$0xff] }
 0x224   : > { %1376 = vrot.lane.b32.xlu0 %v1340_v33, %s6956_s13 }
 0x226   : > { %1378 = vrot.lane.b32.xlu1 %v1347_v43, %s6956_s13  ;;  %v3961_v43 = vld [vmem:[%s6904_s3 + $0x88] sm:$0xff] }
 0x228   : > { %1380 = vrot.lane.b32.xlu0 %v1348_v12, %s6956_s13 }
 0x22a   : > { %1382 = vrot.lane.b32.xlu1 %v1340_v33, %s6956_s13 }
 0x22c   : > { %1384 = vrot.lane.b32.xlu0 %v1350_v13, %s6956_s13 }
 0x22e   : > { %1386 = vrot.lane.b32.xlu1 %v1351_v23, %s6956_s13  ;;  %s4094_s13 = smov 1  }
 0x230   : > { %1426 = vrot.lane.b32.xlu0 %v3960_v6, %s7039_s20 }
 0x232   : > { %1428 = vrot.lane.b32.xlu1 %v3961_v43, %s7039_s20 }
 0x28a   : > { %v4795_v33 = vpop.permute.xlu0 %1364 }
 0x28b   : > { %7139 = vst [vmem:[#allocation50_spill] sm:$0xff] %v4795_v33 }
 0x28c   : > { %v4797_v46 = vpop.permute.xlu1 %1366 }
 0x28d   : > { %7140 = vst [vmem:[#allocation51_spill] sm:$0xff] %v4797_v46 }
 0x28e   : > { %v4799_v59 = vpop.permute.xlu0 %1368 }
 0x28f   : > { %7141 = vst [vmem:[#allocation52_spill] sm:$0xff] %v4799_v59 }
 0x290   : > { %v4801_v12 = vpop.permute.xlu1 %1370 }
 0x291   : > { %7142 = vst [vmem:[#allocation53_spill] sm:$0xff] %v4801_v12 }
 0x292   : > { %v4803_v13 = vpop.permute.xlu0 %1372 }
 0x293   : > { %7143 = vst [vmem:[#allocation54_spill] sm:$0xff] %v4803_v13 }
 0x294   : > { %v4805_v23 = vpop.permute.xlu1 %1374 }
 0x295   : > { %7144 = vst [vmem:[#allocation55_spill] sm:$0xff] %v4805_v23 }
 0x296   : > { %v4807_v35 = vpop.permute.xlu0 %1376 }
 0x297   : > { %7145 = vst [vmem:[#allocation56_spill] sm:$0xff] %v4807_v35 }
 0x298   : > { %v4809_v49 = vpop.permute.xlu1 %1378 }
 0x299   : > { %7146 = vst [vmem:[#allocation57_spill] sm:$0xff] %v4809_v49 }
 0x29a   : > { %v4811_v37 = vpop.permute.xlu0 %1380 }
 0x29b   : > { %7147 = vst [vmem:[#allocation58_spill] sm:$0xff] %v4811_v37 }
 0x29c   : > { %v4813_v6 = vpop.permute.xlu1 %1382 }
 0x29d   : > { %7148 = vst [vmem:[#allocation59_spill] sm:$0xff] %v4813_v6 }
 0x29e   : > { %v4815_v43 = vpop.permute.xlu0 %1384 }
 0x29f   : > { %7149 = vst [vmem:[#allocation60_spill] sm:$0xff] %v4815_v43 }
 0x2a0   : > { %v4817_v33 = vpop.permute.xlu1 %1386 }
 0x2a1   : > { %7150 = vst [vmem:[#allocation61_spill] sm:$0xff] %v4817_v33 }
 0x2a2   : > { %v1427_v46 = vpop.permute.xlu0 %1426 }
 0x2a3   : > { %v1435_v59 = vmul.f32 0.0, %v1427_v46 }
 0x2a4   : > { %v1429_v12 = vpop.permute.xlu1 %1428 }
 0x2a5   : > { %1459 = vrot.lane.b32.xlu0 %v1435_v59, %s6974_s21  ;;  %v1431_v23 = vsel %vm7089_vm7, %v1427_v46, %v1429_v12  ;;  %v1437_v49 = vmul.f32 %v1429_v12, %v4473_v55  ;;  %v1440_v33 = vmul.f32 %v1429_v12, %v4475_v29  ;;  %v1443_v43 = vmul.f32 %v1429_v12, %v4494_v52 }
 0x2a6   : > { %v1436_v35 = vmul.f32 %v1431_v23, %v4467_v39  ;;  %v1439_v6 = vmul.f32 %v1431_v23, %v4488_v22  ;;  %v1442_v46 = vmul.f32 %v1431_v23, %v4490_v44 }
 0x2a8   : > { %1461 = vrot.lane.b32.xlu1 %v1436_v35, %s6974_s21  ;;  %v1446_v35 = vmul.f32 %v1429_v12, %v4496_v7 }
 0x2a9   : > { %1463 = vrot.lane.b32.xlu0 %v1437_v49, %s6974_s21  ;;  %v1445_v49 = vmul.f32 %v1431_v23, %v4507_v14 }
 0x2ac   : > { %1465 = vrot.lane.b32.xlu1 %v1435_v59, %s6974_s21 }
 0x2ad   : > { %1467 = vrot.lane.b32.xlu0 %v1439_v6, %s6974_s21  ;;  %v3963_v6 = vld [vmem:[%s6904_s3 + $0x98] sm:$0xff] }
 0x2b0   : > { %1469 = vrot.lane.b32.xlu1 %v1440_v33, %s6974_s21  ;;  %v3962_v33 = vld [vmem:[%s6904_s3 + $0x90] sm:$0xff] }
 0x2b1   : > { %1471 = vrot.lane.b32.xlu0 %v1435_v59, %s6974_s21 }
 0x2b4   : > { %1473 = vrot.lane.b32.xlu1 %v1442_v46, %s6974_s21 }
 0x2b5   : > { %1475 = vrot.lane.b32.xlu0 %v1443_v43, %s6974_s21 }
 0x2b8   : > { %1477 = vrot.lane.b32.xlu1 %v1435_v59, %s6974_s21 }
 0x2b9   : > { %1479 = vrot.lane.b32.xlu0 %v1445_v49, %s6974_s21 }
 0x2bc   : > { %1481 = vrot.lane.b32.xlu1 %v1446_v35, %s6974_s21  ;;  %s4093_s21 = smov 62  }
 0x2bd   : > { %1521 = vrot.lane.b32.xlu0 %v3962_v33, %s7037_s29 }
 0x2c0   : > { %1523 = vrot.lane.b32.xlu1 %v3963_v6, %s7037_s29 }
 0x317   : > { %v4848_v23 = vpop.permute.xlu0 %1459 }
 0x318   : > { %7151 = vst [vmem:[#allocation62_spill] sm:$0xff] %v4848_v23 }
 0x31a   : > { %v4850_v59 = vpop.permute.xlu1 %1461 }
 0x31b   : > { %7152 = vst [vmem:[#allocation63_spill] sm:$0xff] %v4850_v59  ;;  %v4852_v43 = vpop.permute.xlu0 %1463 }
 0x31c   : > { %7153 = vst [vmem:[#allocation64_spill] sm:$0xff] %v4852_v43 }
 0x31e   : > { %v4854_v12 = vpop.permute.xlu1 %1465 }
 0x31f   : > { %7154 = vst [vmem:[#allocation65_spill] sm:$0xff] %v4854_v12  ;;  %v4856_v46 = vpop.permute.xlu0 %1467 }
 0x320   : > { %7155 = vst [vmem:[#allocation66_spill] sm:$0xff] %v4856_v46 }
 0x322   : > { %v4858_v49 = vpop.permute.xlu1 %1469 }
 0x323   : > { %7156 = vst [vmem:[#allocation67_spill] sm:$0xff] %v4858_v49  ;;  %v4860_v35 = vpop.permute.xlu0 %1471 }
 0x324   : > { %7157 = vst [vmem:[#allocation68_spill] sm:$0xff] %v4860_v35 }
 0x326   : > { %v4862_v33 = vpop.permute.xlu1 %1473 }
 0x327   : > { %7158 = vst [vmem:[#allocation69_spill] sm:$0xff] %v4862_v33  ;;  %v4864_v37 = vpop.permute.xlu0 %1475 }
 0x328   : > { %7159 = vst [vmem:[#allocation70_spill] sm:$0xff] %v4864_v37 }
 0x32a   : > { %v4866_v13 = vpop.permute.xlu1 %1477 }
 0x32b   : > { %7160 = vst [vmem:[#allocation71_spill] sm:$0xff] %v4866_v13  ;;  %v4868_v6 = vpop.permute.xlu0 %1479 }
 0x32c   : > { %7161 = vst [vmem:[#allocation72_spill] sm:$0xff] %v4868_v6 }
 0x32e   : > { %v4870_v23 = vpop.permute.xlu1 %1481 }
 0x32f   : > { %7162 = vst [vmem:[#allocation73_spill] sm:$0xff] %v4870_v23  ;;  %v1522_v59 = vpop.permute.xlu0 %1521 }
 0x330   : > { %v1529_v43 = vmul.f32 0.0, %v1522_v59 }
 0x332   : > { %1553 = vrot.lane.b32.xlu0 %v1529_v43, %s4079_s8  ;;  %v1524_v12 = vpop.permute.xlu1 %1523 }
 0x333   : > { %v1531_v49 = vmul.f32 %v1524_v12, %v4473_v55  ;;  %v1525_v35 = vsel %vm1103_vm8, %v1522_v59, %v1524_v12  ;;  %v1534_v23 = vmul.f32 %v1524_v12, %v4475_v29  ;;  %v1537_v59 = vmul.f32 %v1524_v12, %v4494_v52 }
 0x334   : > { %v1530_v33 = vmul.f32 %v1525_v35, %v4467_v39  ;;  %v1533_v13 = vmul.f32 %v1525_v35, %v4488_v22  ;;  %v1536_v6 = vmul.f32 %v1525_v35, %v4490_v44 }
 0x336   : > { %1557 = vrot.lane.b32.xlu0 %v1531_v49, %s4079_s8  ;;  %1555 = vrot.lane.b32.xlu1 %v1530_v33, %s4079_s8  ;;  %v1539_v49 = vmul.f32 %v1525_v35, %v4507_v14  ;;  %v3965_v33 = vld [vmem:[%s6904_s3 + $0xa8] sm:$0xff] }
 0x33a   : > { %1561 = vrot.lane.b32.xlu0 %v1533_v13, %s4079_s8  ;;  %1559 = vrot.lane.b32.xlu1 %v1529_v43, %s4079_s8  ;;  %v3964_v13 = vld [vmem:[%s6904_s3 + $0xa0] sm:$0xff] }
 0x33e   : > { %1565 = vrot.lane.b32.xlu0 %v1529_v43, %s4079_s8  ;;  %1563 = vrot.lane.b32.xlu1 %v1534_v23, %s4079_s8  ;;  %v1540_v23 = vmul.f32 %v1524_v12, %v4496_v7 }
 0x342   : > { %1569 = vrot.lane.b32.xlu0 %v1537_v59, %s4079_s8  ;;  %1567 = vrot.lane.b32.xlu1 %v1536_v6, %s4079_s8 }
 0x346   : > { %1573 = vrot.lane.b32.xlu0 %v1539_v49, %s4079_s8  ;;  %1571 = vrot.lane.b32.xlu1 %v1529_v43, %s4079_s8 }
 0x34a   : > { %1614 = vrot.lane.b32.xlu0 %v3964_v13, %s4083_s28  ;;  %1575 = vrot.lane.b32.xlu1 %v1540_v23, %s4079_s8 }
 0x34e   : > { %1616 = vrot.lane.b32.xlu1 %v3965_v33, %s4083_s28 }
 0x3a4   : > { %v4901_v35 = vpop.permute.xlu0 %1553 }
 0x3a5   : > { %7163 = vst [vmem:[#allocation74_spill] sm:$0xff] %v4901_v35 }
 0x3a8   : > { %v4903_v6 = vpop.permute.xlu0 %1557  ;;  %v4905_v43 = vpop.permute.xlu1 %1555 }
 0x3a9   : > { %7164 = vst [vmem:[#allocation75_spill] sm:$0xff] %v4903_v6  ;;  %7165 = vst [vmem:[#allocation76_spill] sm:$0xff] %v4905_v43 }
 0x3ac   : > { %v4907_v59 = vpop.permute.xlu0 %1561  ;;  %v4909_v49 = vpop.permute.xlu1 %1559 }
 0x3ad   : > { %7166 = vst [vmem:[#allocation77_spill] sm:$0xff] %v4907_v59  ;;  %7167 = vst [vmem:[#allocation78_spill] sm:$0xff] %v4909_v49 }
 0x3b0   : > { %v4911_v12 = vpop.permute.xlu0 %1565  ;;  %v4913_v13 = vpop.permute.xlu1 %1563 }
 0x3b1   : > { %7168 = vst [vmem:[#allocation79_spill] sm:$0xff] %v4911_v12  ;;  %7169 = vst [vmem:[#allocation80_spill] sm:$0xff] %v4913_v13 }
 0x3b4   : > { %v4915_v23 = vpop.permute.xlu0 %1569  ;;  %v4917_v37 = vpop.permute.xlu1 %1567 }
 0x3b5   : > { %7170 = vst [vmem:[#allocation81_spill] sm:$0xff] %v4915_v23  ;;  %7171 = vst [vmem:[#allocation82_spill] sm:$0xff] %v4917_v37 }
 0x3b8   : > { %v4919_v46 = vpop.permute.xlu0 %1573  ;;  %v4921_v33 = vpop.permute.xlu1 %1571 }
 0x3b9   : > { %7172 = vst [vmem:[#allocation83_spill] sm:$0xff] %v4919_v46  ;;  %7173 = vst [vmem:[#allocation84_spill] sm:$0xff] %v4921_v33 }
 0x3bc   : > { %v1615_v35 = vpop.permute.xlu0 %1614  ;;  %v4923_v6 = vpop.permute.xlu1 %1575 }
 0x3bd   : > { %7174 = vst [vmem:[#allocation85_spill] sm:$0xff] %v4923_v6  ;;  %v1622_v43 = vmul.f32 0.0, %v1615_v35 }
 0x3bf   : > { %1646 = vrot.lane.b32.xlu0 %v1622_v43, %s4078_s26 }
 0x3c0   : > { %v1617_v49 = vpop.permute.xlu1 %1616 }
 0x3c1   : > { %v1624_v12 = vmul.f32 %v1617_v49, %v4473_v55  ;;  %v1618_v13 = vsel %vm1008_vm9, %v1615_v35, %v1617_v49  ;;  %v1627_v6 = vmul.f32 %v1617_v49, %v4475_v29  ;;  %v1630_v35 = vmul.f32 %v1617_v49, %v4494_v52 }
 0x3c2   : > { %v1623_v23 = vmul.f32 %v1618_v13, %v4467_v39  ;;  %v1626_v33 = vmul.f32 %v1618_v13, %v4488_v22  ;;  %v1629_v46 = vmul.f32 %v1618_v13, %v4490_v44 }
 0x3c3   : > { %1650 = vrot.lane.b32.xlu0 %v1624_v12, %s4078_s26  ;;  %v1632_v12 = vmul.f32 %v1618_v13, %v4507_v14 }
 0x3c4   : > { %1648 = vrot.lane.b32.xlu1 %v1623_v23, %s4078_s26  ;;  %v3966_v23 = vld [vmem:[%s6904_s3 + $0xb0] sm:$0xff] }
 0x3c7   : > { %1654 = vrot.lane.b32.xlu0 %v1626_v33, %s4078_s26 }
 0x3c8   : > { %1652 = vrot.lane.b32.xlu1 %v1622_v43, %s4078_s26 }
 0x3cb   : > { %1658 = vrot.lane.b32.xlu0 %v1622_v43, %s4078_s26 }
 0x3cc   : > { %1656 = vrot.lane.b32.xlu1 %v1627_v6, %s4078_s26  ;;  %v1633_v6 = vmul.f32 %v1617_v49, %v4496_v7 }
 0x3cf   : > { %1662 = vrot.lane.b32.xlu0 %v1630_v35, %s4078_s26 }
 0x3d0   : > { %1660 = vrot.lane.b32.xlu1 %v1629_v46, %s4078_s26  ;;  %v3967_v46 = vld [vmem:[%s6904_s3 + $0xb8] sm:$0xff] }
 0x3d3   : > { %1666 = vrot.lane.b32.xlu0 %v1632_v12, %s4078_s26 }
 0x3d4   : > { %1664 = vrot.lane.b32.xlu1 %v1622_v43, %s4078_s26 }
 0x3d7   : > { %1707 = vrot.lane.b32.xlu0 %v3966_v23, %s4092_s10 }
 0x3d8   : > { %1668 = vrot.lane.b32.xlu1 %v1633_v6, %s4078_s26 }
 0x3dc   : > { %1709 = vrot.lane.b32.xlu1 %v3967_v46, %s4092_s10  ;;  %s7360_s10 = smov 111  }
 0x431   : > { %v4952_v13 = vpop.permute.xlu0 %1646 }
 0x432   : > { %7175 = vst [vmem:[#allocation86_spill] sm:$0xff] %v4952_v13 }
 0x435   : > { %v4954_v33 = vpop.permute.xlu0 %1650 }
 0x436   : > { %7176 = vst [vmem:[#allocation87_spill] sm:$0xff] %v4954_v33  ;;  %v4956_v43 = vpop.permute.xlu1 %1648 }
 0x437   : > { %7177 = vst [vmem:[#allocation88_spill] sm:$0xff] %v4956_v43 }
 0x439   : > { %v4958_v35 = vpop.permute.xlu0 %1654 }
 0x43a   : > { %7178 = vst [vmem:[#allocation89_spill] sm:$0xff] %v4958_v35  ;;  %v4960_v12 = vpop.permute.xlu1 %1652 }
 0x43b   : > { %7179 = vst [vmem:[#allocation90_spill] sm:$0xff] %v4960_v12 }
 0x43d   : > { %v4962_v49 = vpop.permute.xlu0 %1658 }
 0x43e   : > { %7180 = vst [vmem:[#allocation91_spill] sm:$0xff] %v4962_v49  ;;  %v4964_v23 = vpop.permute.xlu1 %1656 }
 0x43f   : > { %7181 = vst [vmem:[#allocation92_spill] sm:$0xff] %v4964_v23 }
 0x441   : > { %v4966_v6 = vpop.permute.xlu0 %1662 }
 0x442   : > { %7182 = vst [vmem:[#allocation93_spill] sm:$0xff] %v4966_v6  ;;  %v4968_v37 = vpop.permute.xlu1 %1660 }
 0x443   : > { %7183 = vst [vmem:[#allocation94_spill] sm:$0xff] %v4968_v37 }
 0x445   : > { %v4970_v59 = vpop.permute.xlu0 %1666 }
 0x446   : > { %7184 = vst [vmem:[#allocation95_spill] sm:$0xff] %v4970_v59  ;;  %v4972_v46 = vpop.permute.xlu1 %1664 }
 0x447   : > { %7185 = vst [vmem:[#allocation96_spill] sm:$0xff] %v4972_v46 }
 0x449   : > { %v1708_v13 = vpop.permute.xlu0 %1707 }
 0x44a   : > { %v1716_v33 = vmul.f32 0.0, %v1708_v13  ;;  %v4974_v24 = vpop.permute.xlu1 %1668 }
 0x44b   : > { %7186 = vst [vmem:[#allocation97_spill] sm:$0xff] %v4974_v24 }
 0x44c   : > { %1740 = vrot.lane.b32.xlu0 %v1716_v33, %s4093_s21 }
 0x44e   : > { %v1710_v12 = vpop.permute.xlu1 %1709 }
 0x44f   : > { %v1718_v49 = vmul.f32 %v1710_v12, %v4473_v55  ;;  %v1712_v35 = vsel %vm1711_vm10, %v1708_v13, %v1710_v12  ;;  %v1721_v46 = vmul.f32 %v1710_v12, %v4475_v29  ;;  %v1724_v24 = vmul.f32 %v1710_v12, %v4494_v52 }
 0x450   : > { %v1717_v23 = vmul.f32 %v1712_v35, %v4467_v39  ;;  %v1720_v6 = vmul.f32 %v1712_v35, %v4488_v22  ;;  %v1723_v59 = vmul.f32 %v1712_v35, %v4490_v44  ;;  %v1726_v13 = vmul.f32 %v1712_v35, %v4507_v14 }
 0x451   : > { %1744 = vrot.lane.b32.xlu0 %v1718_v49, %s4093_s21  ;;  %v3968_v49 = vld [vmem:[%s6904_s3 + $0xc0] sm:$0xff]  ;;  %vm1293_vm10 = vcmask 916480  }
 0x452   : > { %1742 = vrot.lane.b32.xlu1 %v1717_v23, %s4093_s21  ;;  %v1727_v23 = vmul.f32 %v1710_v12, %v4496_v7 }
 0x455   : > { %1748 = vrot.lane.b32.xlu0 %v1720_v6, %s4093_s21  ;;  %v3969_v6 = vld [vmem:[%s6904_s3 + $0xc8] sm:$0xff] }
 0x456   : > { %1746 = vrot.lane.b32.xlu1 %v1716_v33, %s4093_s21 }
 0x459   : > { %1752 = vrot.lane.b32.xlu0 %v1716_v33, %s4093_s21 }
 0x45a   : > { %1750 = vrot.lane.b32.xlu1 %v1721_v46, %s4093_s21 }
 0x45d   : > { %1756 = vrot.lane.b32.xlu0 %v1724_v24, %s4093_s21 }
 0x45e   : > { %1754 = vrot.lane.b32.xlu1 %v1723_v59, %s4093_s21 }
 0x461   : > { %1760 = vrot.lane.b32.xlu0 %v1726_v13, %s4093_s21 }
 0x462   : > { %1758 = vrot.lane.b32.xlu1 %v1716_v33, %s4093_s21 }
 0x465   : > { %1802 = vrot.lane.b32.xlu0 %v3968_v49, %s4081_s25 }
 0x466   : > { %1762 = vrot.lane.b32.xlu1 %v1727_v23, %s4093_s21  ;;  %s7310_s21 = smov 112  }
 0x46a   : > { %1804 = vrot.lane.b32.xlu1 %v3969_v6, %s4081_s25 }
 0x4be   : > { %v4992_v24 = vpop.permute.xlu0 %1740 }
 0x4bf   : > { %7187 = vst [vmem:[#allocation98_spill] sm:$0xff] %v4992_v24 }
 0x4c3   : > { %v4994_v59 = vpop.permute.xlu0 %1744 }
 0x4c4   : > { %7188 = vst [vmem:[#allocation99_spill] sm:$0xff] %v4994_v59  ;;  %v4996_v33 = vpop.permute.xlu1 %1742 }
 0x4c5   : > { %7189 = vst [vmem:[#allocation100_spill] sm:$0xff] %v4996_v33 }
 0x4c7   : > { %v4998_v35 = vpop.permute.xlu0 %1748 }
 0x4c8   : > { %7190 = vst [vmem:[#allocation101_spill] sm:$0xff] %v4998_v35  ;;  %v5000_v46 = vpop.permute.xlu1 %1746 }
 0x4c9   : > { %7191 = vst [vmem:[#allocation102_spill] sm:$0xff] %v5000_v46 }
 0x4cb   : > { %v5002_v12 = vpop.permute.xlu0 %1752 }
 0x4cc   : > { %7192 = vst [vmem:[#allocation103_spill] sm:$0xff] %v5002_v12  ;;  %v5004_v13 = vpop.permute.xlu1 %1750 }
 0x4cd   : > { %7193 = vst [vmem:[#allocation104_spill] sm:$0xff] %v5004_v13 }
 0x4cf   : > { %v5006_v49 = vpop.permute.xlu0 %1756 }
 0x4d0   : > { %7194 = vst [vmem:[#allocation105_spill] sm:$0xff] %v5006_v49  ;;  %v5008_v23 = vpop.permute.xlu1 %1754 }
 0x4d1   : > { %7195 = vst [vmem:[#allocation106_spill] sm:$0xff] %v5008_v23 }
 0x4d3   : > { %v5010_v37 = vpop.permute.xlu0 %1760 }
 0x4d4   : > { %7196 = vst [vmem:[#allocation107_spill] sm:$0xff] %v5010_v37  ;;  %v5012_v6 = vpop.permute.xlu1 %1758 }
 0x4d5   : > { %7197 = vst [vmem:[#allocation108_spill] sm:$0xff] %v5012_v6 }
 0x4d7   : > { %v1803_v24 = vpop.permute.xlu0 %1802 }
 0x4d8   : > { %v1810_v59 = vmul.f32 0.0, %v1803_v24  ;;  %v5014_v43 = vpop.permute.xlu1 %1762 }
 0x4d9   : > { %7198 = vst [vmem:[#allocation109_spill] sm:$0xff] %v5014_v43 }
 0x4da   : > { %1834 = vrot.lane.b32.xlu0 %v1810_v59, %s4076_s14 }
 0x4dc   : > { %v1805_v46 = vpop.permute.xlu1 %1804 }
 0x4dd   : > { %v1812_v12 = vmul.f32 %v1805_v46, %v4473_v55  ;;  %v1806_v13 = vsel %vm818_vm11, %v1803_v24, %v1805_v46  ;;  %v1815_v43 = vmul.f32 %v1805_v46, %v4475_v29  ;;  %v1818_v24 = vmul.f32 %v1805_v46, %v4494_v52 }
 0x4de   : > { %v1811_v49 = vmul.f32 %v1806_v13, %v4467_v39  ;;  %v1814_v6 = vmul.f32 %v1806_v13, %v4488_v22  ;;  %v1817_v37 = vmul.f32 %v1806_v13, %v4490_v44 }
 0x4df   : > { %1838 = vrot.lane.b32.xlu0 %v1812_v12, %s4076_s14  ;;  %v1820_v12 = vmul.f32 %v1806_v13, %v4507_v14 }
 0x4e0   : > { %1836 = vrot.lane.b32.xlu1 %v1811_v49, %s4076_s14  ;;  %v3970_v49 = vld [vmem:[%s6904_s3 + $0xd0] sm:$0xff] }
 0x4e1   : > { %v1895_v13 = vmul.f32 %v3970_v49, %v4488_v22 }
 0x4e3   : > { %1842 = vrot.lane.b32.xlu0 %v1814_v6, %s4076_s14  ;;  %v1821_v6 = vmul.f32 %v1805_v46, %v4496_v7 }
 0x4e4   : > { %1840 = vrot.lane.b32.xlu1 %v1810_v59, %s4076_s14 }
 0x4e7   : > { %1846 = vrot.lane.b32.xlu0 %v1810_v59, %s4076_s14 }
 0x4e8   : > { %1844 = vrot.lane.b32.xlu1 %v1815_v43, %s4076_s14  ;;  %v1893_v43 = vmul.f32 %v3970_v49, %v4467_v39 }
 0x4eb   : > { %1850 = vrot.lane.b32.xlu0 %v1818_v24, %s4076_s14 }
 0x4ec   : > { %1848 = vrot.lane.b32.xlu1 %v1817_v37, %s4076_s14  ;;  %v3971_v37 = vld [vmem:[%s6904_s3 + $0xd8] sm:$0xff] }
 0x4ed   : > { %v1894_v24 = vmul.f32 %v3971_v37, %v4473_v55  ;;  %v1896_v46 = vmul.f32 %v3971_v37, %v4475_v29 }
 0x4ef   : > { %1854 = vrot.lane.b32.xlu0 %v1820_v12, %s4076_s14  ;;  %v1899_v12 = vmul.f32 %v3970_v49, %v4507_v14 }
 0x4f0   : > { %1852 = vrot.lane.b32.xlu1 %v1810_v59, %s4076_s14  ;;  %v1897_v59 = vmul.f32 %v3970_v49, %v4490_v44  ;;  %v3973_v49 = vld [vmem:[%s6904_s3 + $0xe8] sm:$0xff] }
 0x4f3   : > { %1909 = vrot.lane.b32.xlu0 %v1893_v43, %s4075_s9  ;;  %v1898_v43 = vmul.f32 %v3971_v37, %v4494_v52 }
 0x4f4   : > { %1856 = vrot.lane.b32.xlu1 %v1821_v6, %s4076_s14  ;;  %v3972_v6 = vld [vmem:[%s6904_s3 + $0xe0] sm:$0xff] }
 0x4f7   : > { %1913 = vrot.lane.b32.xlu0 %v1895_v13, %s4075_s9  ;;  %v1900_v13 = vmul.f32 %v3971_v37, %v4496_v7 }
 0x4f8   : > { %1911 = vrot.lane.b32.xlu1 %v1894_v24, %s4075_s9 }
 0x4fb   : > { %1917 = vrot.lane.b32.xlu0 %v1897_v59, %s4075_s9 }
 0x4fc   : > { %1915 = vrot.lane.b32.xlu1 %v1896_v46, %s4075_s9 }
 0x4ff   : > { %1921 = vrot.lane.b32.xlu0 %v1899_v12, %s4075_s9 }
 0x500   : > { %1919 = vrot.lane.b32.xlu1 %v1898_v43, %s4075_s9 }
 0x503   : > { %1970 = vrot.lane.b32.xlu0 %v3972_v6, %s4094_s13 }
 0x504   : > { %1923 = vrot.lane.b32.xlu1 %v1900_v13, %s4075_s9 }
 0x508   : > { %1972 = vrot.lane.b32.xlu1 %v3973_v49, %s4094_s13  ;;  %s4098_s13 = smov 8  }
 0x54c   : > { %v5065_v24 = vpop.permute.xlu0 %1834 }
 0x54d   : > { %7199 = vst [vmem:[#allocation110_spill] sm:$0xff] %v5065_v24 }
 0x551   : > { %v5067_v59 = vpop.permute.xlu0 %1838 }
 0x552   : > { %7200 = vst [vmem:[#allocation111_spill] sm:$0xff] %v5067_v59  ;;  %v5069_v46 = vpop.permute.xlu1 %1836 }
 0x553   : > { %7201 = vst [vmem:[#allocation112_spill] sm:$0xff] %v5069_v46 }
 0x555   : > { %v5071_v12 = vpop.permute.xlu0 %1842 }
 0x556   : > { %7202 = vst [vmem:[#allocation113_spill] sm:$0xff] %v5071_v12  ;;  %v5073_v43 = vpop.permute.xlu1 %1840 }
 0x557   : > { %7203 = vst [vmem:[#allocation114_spill] sm:$0xff] %v5073_v43 }
 0x559   : > { %v5075_v37 = vpop.permute.xlu0 %1846 }
 0x55a   : > { %7204 = vst [vmem:[#allocation115_spill] sm:$0xff] %v5075_v37  ;;  %v5077_v6 = vpop.permute.xlu1 %1844 }
 0x55b   : > { %7205 = vst [vmem:[#allocation116_spill] sm:$0xff] %v5077_v6 }
 0x55d   : > { %v5079_v13 = vpop.permute.xlu0 %1850 }
 0x55e   : > { %7206 = vst [vmem:[#allocation117_spill] sm:$0xff] %v5079_v13  ;;  %v5081_v23 = vpop.permute.xlu1 %1848 }
 0x55f   : > { %7207 = vst [vmem:[#allocation118_spill] sm:$0xff] %v5081_v23 }
 0x561   : > { %v5083_v35 = vpop.permute.xlu0 %1854 }
 0x562   : > { %7208 = vst [vmem:[#allocation119_spill] sm:$0xff] %v5083_v35  ;;  %v5085_v49 = vpop.permute.xlu1 %1852 }
 0x563   : > { %7209 = vst [vmem:[#allocation120_spill] sm:$0xff] %v5085_v49 }
 0x565   : > { %v5087_v24 = vpop.permute.xlu0 %1909 }
 0x566   : > { %7210 = vst [vmem:[#allocation121_spill] sm:$0xff] %v5087_v24  ;;  %v5089_v59 = vpop.permute.xlu1 %1856 }
 0x567   : > { %7211 = vst [vmem:[#allocation122_spill] sm:$0xff] %v5089_v59 }
 0x569   : > { %v5091_v46 = vpop.permute.xlu0 %1913 }
 0x56a   : > { %7212 = vst [vmem:[#allocation123_spill] sm:$0xff] %v5091_v46  ;;  %v5093_v12 = vpop.permute.xlu1 %1911 }
 0x56b   : > { %7213 = vst [vmem:[#allocation124_spill] sm:$0xff] %v5093_v12 }
 0x56d   : > { %v5095_v43 = vpop.permute.xlu0 %1917 }
 0x56e   : > { %7214 = vst [vmem:[#allocation125_spill] sm:$0xff] %v5095_v43  ;;  %v5097_v37 = vpop.permute.xlu1 %1915 }
 0x56f   : > { %7215 = vst [vmem:[#allocation126_spill] sm:$0xff] %v5097_v37 }
 0x571   : > { %v5099_v6 = vpop.permute.xlu0 %1921 }
 0x572   : > { %7216 = vst [vmem:[#allocation127_spill] sm:$0xff] %v5099_v6  ;;  %v5101_v13 = vpop.permute.xlu1 %1919 }
 0x573   : > { %7217 = vst [vmem:[#allocation128_spill] sm:$0xff] %v5101_v13 }
 0x575   : > { %v1971_v23 = vpop.permute.xlu0 %1970 }
 0x576   : > { %v5103_v35 = vpop.permute.xlu1 %1923  ;;  %v1979_v49 = vmul.f32 %v1971_v23, %v4467_v39  ;;  %v1982_v6 = vmul.f32 %v1971_v23, %v4488_v22  ;;  %v1988_v13 = vmul.f32 %v1971_v23, %v4507_v14 }
 0x577   : > { %7218 = vst [vmem:[#allocation129_spill] sm:$0xff] %v5103_v35  ;;  %v1985_v35 = vmul.f32 %v1971_v23, %v4490_v44 }
 0x578   : > { %2003 = vrot.lane.b32.xlu0 %v1979_v49, %s4095_s11 }
 0x57a   : > { %v1973_v59 = vpop.permute.xlu1 %1972 }
 0x57b   : > { %v1975_v46 = vsel %vm1974_vm12, %v1971_v23, %v1973_v59  ;;  %v1981_v24 = vmul.f32 0.0, %v1973_v59  ;;  %vm1388_vm12 = vcmask 908288  }
 0x57c   : > { %v1980_v12 = vmul.f32 %v1975_v46, %v4473_v55  ;;  %v1983_v43 = vmul.f32 %v1975_v46, %v4475_v29  ;;  %v1986_v49 = vmul.f32 %v1975_v46, %v4494_v52  ;;  %v1989_v59 = vmul.f32 %v1975_v46, %v4496_v7 }
 0x57d   : > { %2007 = vrot.lane.b32.xlu0 %v1981_v24, %s4095_s11 }
 0x57e   : > { %2005 = vrot.lane.b32.xlu1 %v1980_v12, %s4095_s11  ;;  %v3974_v12 = vld [vmem:[%s6904_s3 + $0xf0] sm:$0xff] }
 0x581   : > { %2011 = vrot.lane.b32.xlu0 %v1983_v43, %s4095_s11 }
 0x582   : > { %2009 = vrot.lane.b32.xlu1 %v1982_v6, %s4095_s11 }
 0x585   : > { %2015 = vrot.lane.b32.xlu0 %v1985_v35, %s4095_s11  ;;  %v3975_v35 = vld [vmem:[%s6904_s3 + $0xf8] sm:$0xff] }
 0x586   : > { %2013 = vrot.lane.b32.xlu1 %v1981_v24, %s4095_s11 }
 0x589   : > { %2019 = vrot.lane.b32.xlu0 %v1981_v24, %s4095_s11 }
 0x58a   : > { %2017 = vrot.lane.b32.xlu1 %v1986_v49, %s4095_s11 }
 0x58d   : > { %2023 = vrot.lane.b32.xlu0 %v1989_v59, %s4095_s11 }
 0x58e   : > { %2021 = vrot.lane.b32.xlu1 %v1988_v13, %s4095_s11 }
 0x591   : > { %2065 = vrot.lane.b32.xlu0 %v3974_v12, %s4096_s22 }
 0x592   : > { %2025 = vrot.lane.b32.xlu1 %v1981_v24, %s4095_s11 }
 0x596   : > { %2067 = vrot.lane.b32.xlu1 %v3975_v35, %s4096_s22 }
 0x5ea   : > { %v5119_v43 = vpop.permute.xlu0 %2003 }
 0x5eb   : > { %7219 = vst [vmem:[#allocation130_spill] sm:$0xff] %v5119_v43 }
 0x5ef   : > { %v5121_v6 = vpop.permute.xlu0 %2007 }
 0x5f0   : > { %7220 = vst [vmem:[#allocation131_spill] sm:$0xff] %v5121_v6  ;;  %v5123_v46 = vpop.permute.xlu1 %2005 }
 0x5f1   : > { %7221 = vst [vmem:[#allocation132_spill] sm:$0xff] %v5123_v46 }
 0x5f3   : > { %v5125_v23 = vpop.permute.xlu0 %2011 }
 0x5f4   : > { %7222 = vst [vmem:[#allocation133_spill] sm:$0xff] %v5125_v23  ;;  %v5127_v13 = vpop.permute.xlu1 %2009 }
 0x5f5   : > { %7223 = vst [vmem:[#allocation134_spill] sm:$0xff] %v5127_v13 }
 0x5f7   : > { %v5129_v49 = vpop.permute.xlu0 %2015 }
 0x5f8   : > { %7224 = vst [vmem:[#allocation135_spill] sm:$0xff] %v5129_v49  ;;  %v5131_v59 = vpop.permute.xlu1 %2013 }
 0x5f9   : > { %7225 = vst [vmem:[#allocation136_spill] sm:$0xff] %v5131_v59 }
 0x5fb   : > { %v5133_v24 = vpop.permute.xlu0 %2019 }
 0x5fc   : > { %7226 = vst [vmem:[#allocation137_spill] sm:$0xff] %v5133_v24  ;;  %v5135_v12 = vpop.permute.xlu1 %2017 }
 0x5fd   : > { %7227 = vst [vmem:[#allocation138_spill] sm:$0xff] %v5135_v12 }
 0x5ff   : > { %v5137_v37 = vpop.permute.xlu0 %2023 }
 0x600   : > { %7228 = vst [vmem:[#allocation139_spill] sm:$0xff] %v5137_v37  ;;  %v5139_v35 = vpop.permute.xlu1 %2021 }
 0x601   : > { %7229 = vst [vmem:[#allocation140_spill] sm:$0xff] %v5139_v35 }
 0x603   : > { %v2066_v43 = vpop.permute.xlu0 %2065 }
 0x604   : > { %v5141_v6 = vpop.permute.xlu1 %2025  ;;  %v2074_v46 = vmul.f32 %v2066_v43, %v4467_v39  ;;  %v2077_v37 = vmul.f32 %v2066_v43, %v4488_v22  ;;  %v2083_v35 = vmul.f32 %v2066_v43, %v4507_v14 }
 0x605   : > { %7230 = vst [vmem:[#allocation141_spill] sm:$0xff] %v5141_v6  ;;  %v2080_v6 = vmul.f32 %v2066_v43, %v4490_v44 }
 0x606   : > { %2098 = vrot.lane.b32.xlu0 %v2074_v46, %s4097_s17 }
 0x608   : > { %v2068_v13 = vpop.permute.xlu1 %2067 }
 0x609   : > { %v2070_v49 = vsel %vm2069_vm13, %v2066_v43, %v2068_v13  ;;  %v2076_v23 = vmul.f32 0.0, %v2068_v13  ;;  %vm1764_vm13 = vcmask 506880  }
 0x60a   : > { %v2075_v59 = vmul.f32 %v2070_v49, %v4473_v55  ;;  %v2078_v24 = vmul.f32 %v2070_v49, %v4475_v29  ;;  %v2081_v46 = vmul.f32 %v2070_v49, %v4494_v52  ;;  %v2084_v13 = vmul.f32 %v2070_v49, %v4496_v7 }
 0x60b   : > { %2102 = vrot.lane.b32.xlu0 %v2076_v23, %s4097_s17 }
 0x60c   : > { %2100 = vrot.lane.b32.xlu1 %v2075_v59, %s4097_s17  ;;  %v3976_v59 = vld [vmem:[%s6904_s3 + $0x100] sm:$0xff] }
 0x60f   : > { %2106 = vrot.lane.b32.xlu0 %v2078_v24, %s4097_s17 }
 0x610   : > { %2104 = vrot.lane.b32.xlu1 %v2077_v37, %s4097_s17  ;;  %v3977_v37 = vld [vmem:[%s6904_s3 + $0x108] sm:$0xff] }
 0x613   : > { %2110 = vrot.lane.b32.xlu0 %v2080_v6, %s4097_s17 }
 0x614   : > { %2108 = vrot.lane.b32.xlu1 %v2076_v23, %s4097_s17 }
 0x617   : > { %2114 = vrot.lane.b32.xlu0 %v2076_v23, %s4097_s17 }
 0x618   : > { %2112 = vrot.lane.b32.xlu1 %v2081_v46, %s4097_s17 }
 0x61b   : > { %2118 = vrot.lane.b32.xlu0 %v2084_v13, %s4097_s17 }
 0x61c   : > { %2116 = vrot.lane.b32.xlu1 %v2083_v35, %s4097_s17 }
 0x61f   : > { %2160 = vrot.lane.b32.xlu0 %v3976_v59, %s4098_s13 }
 0x620   : > { %2120 = vrot.lane.b32.xlu1 %v2076_v23, %s4097_s17  ;;  %s4099_s17 = smov 47  }
 0x624   : > { %2162 = vrot.lane.b32.xlu1 %v3977_v37, %s4098_s13  ;;  %s4100_s13 = smov 9  }
 0x678   : > { %v5157_v6 = vpop.permute.xlu0 %2098 }
 0x679   : > { %7231 = vst [vmem:[#allocation142_spill] sm:$0xff] %v5157_v6 }
 0x67d   : > { %v5159_v24 = vpop.permute.xlu0 %2102 }
 0x67e   : > { %7232 = vst [vmem:[#allocation143_spill] sm:$0xff] %v5159_v24  ;;  %v5161_v49 = vpop.permute.xlu1 %2100 }
 0x67f   : > { %7233 = vst [vmem:[#allocation144_spill] sm:$0xff] %v5161_v49 }
 0x681   : > { %v5163_v43 = vpop.permute.xlu0 %2106 }
 0x682   : > { %7234 = vst [vmem:[#allocation145_spill] sm:$0xff] %v5163_v43  ;;  %v5165_v35 = vpop.permute.xlu1 %2104 }
 0x683   : > { %7235 = vst [vmem:[#allocation146_spill] sm:$0xff] %v5165_v35 }
 0x685   : > { %v5167_v46 = vpop.permute.xlu0 %2110 }
 0x686   : > { %7236 = vst [vmem:[#allocation147_spill] sm:$0xff] %v5167_v46  ;;  %v5169_v13 = vpop.permute.xlu1 %2108 }
 0x687   : > { %7237 = vst [vmem:[#allocation148_spill] sm:$0xff] %v5169_v13 }
 0x689   : > { %v5171_v23 = vpop.permute.xlu0 %2114 }
 0x68a   : > { %7238 = vst [vmem:[#allocation149_spill] sm:$0xff] %v5171_v23  ;;  %v5173_v59 = vpop.permute.xlu1 %2112 }
 0x68b   : > { %7239 = vst [vmem:[#allocation150_spill] sm:$0xff] %v5173_v59 }
 0x68d   : > { %v5175_v12 = vpop.permute.xlu0 %2118 }
 0x68e   : > { %7240 = vst [vmem:[#allocation151_spill] sm:$0xff] %v5175_v12  ;;  %v5177_v37 = vpop.permute.xlu1 %2116 }
 0x68f   : > { %7241 = vst [vmem:[#allocation152_spill] sm:$0xff] %v5177_v37 }
 0x691   : > { %v2161_v6 = vpop.permute.xlu0 %2160 }
 0x692   : > { %v5179_v24 = vpop.permute.xlu1 %2120  ;;  %v2169_v49 = vmul.f32 %v2161_v6, %v4467_v39  ;;  %v2172_v12 = vmul.f32 %v2161_v6, %v4488_v22  ;;  %v2178_v37 = vmul.f32 %v2161_v6, %v4507_v14 }
 0x693   : > { %7242 = vst [vmem:[#allocation153_spill] sm:$0xff] %v5179_v24  ;;  %v2175_v24 = vmul.f32 %v2161_v6, %v4490_v44 }
 0x694   : > { %2193 = vrot.lane.b32.xlu0 %v2169_v49, %s4099_s17 }
 0x696   : > { %v2163_v35 = vpop.permute.xlu1 %2162 }
 0x697   : > { %v2165_v46 = vsel %vm2164_vm14, %v2161_v6, %v2163_v35  ;;  %v2171_v43 = vmul.f32 0.0, %v2163_v35  ;;  %vm2027_vm14 = vcmask 441344  }
 0x698   : > { %v2170_v13 = vmul.f32 %v2165_v46, %v4473_v55  ;;  %v2173_v23 = vmul.f32 %v2165_v46, %v4475_v29  ;;  %v2176_v49 = vmul.f32 %v2165_v46, %v4494_v52  ;;  %v2179_v35 = vmul.f32 %v2165_v46, %v4496_v7 }
 0x699   : > { %2197 = vrot.lane.b32.xlu0 %v2171_v43, %s4099_s17 }
 0x69a   : > { %2195 = vrot.lane.b32.xlu1 %v2170_v13, %s4099_s17  ;;  %v3978_v13 = vld [vmem:[%s6904_s3 + $0x110] sm:$0xff] }
 0x69d   : > { %2201 = vrot.lane.b32.xlu0 %v2173_v23, %s4099_s17 }
 0x69e   : > { %2199 = vrot.lane.b32.xlu1 %v2172_v12, %s4099_s17  ;;  %v3979_v12 = vld [vmem:[%s6904_s3 + $0x118] sm:$0xff] }
 0x6a1   : > { %2205 = vrot.lane.b32.xlu0 %v2175_v24, %s4099_s17 }
 0x6a2   : > { %2203 = vrot.lane.b32.xlu1 %v2171_v43, %s4099_s17 }
 0x6a5   : > { %2209 = vrot.lane.b32.xlu0 %v2171_v43, %s4099_s17 }
 0x6a6   : > { %2207 = vrot.lane.b32.xlu1 %v2176_v49, %s4099_s17 }
 0x6a9   : > { %2213 = vrot.lane.b32.xlu0 %v2179_v35, %s4099_s17 }
 0x6aa   : > { %2211 = vrot.lane.b32.xlu1 %v2178_v37, %s4099_s17 }
 0x6ad   : > { %2255 = vrot.lane.b32.xlu0 %v3978_v13, %s4100_s13 }
 0x6ae   : > { %2215 = vrot.lane.b32.xlu1 %v2171_v43, %s4099_s17  ;;  %s4101_s17 = smov 46  }
 0x6b2   : > { %2257 = vrot.lane.b32.xlu1 %v3979_v12, %s4100_s13 }
 0x706   : > { %v5195_v24 = vpop.permute.xlu0 %2193 }
 0x707   : > { %7243 = vst [vmem:[#allocation154_spill] sm:$0xff] %v5195_v24 }
 0x70b   : > { %v5197_v23 = vpop.permute.xlu0 %2197 }
 0x70c   : > { %7244 = vst [vmem:[#allocation155_spill] sm:$0xff] %v5197_v23  ;;  %v5199_v46 = vpop.permute.xlu1 %2195 }
 0x70d   : > { %7245 = vst [vmem:[#allocation156_spill] sm:$0xff] %v5199_v46 }
 0x70f   : > { %v5201_v6 = vpop.permute.xlu0 %2201 }
 0x710   : > { %7246 = vst [vmem:[#allocation157_spill] sm:$0xff] %v5201_v6  ;;  %v5203_v37 = vpop.permute.xlu1 %2199 }
 0x711   : > { %7247 = vst [vmem:[#allocation158_spill] sm:$0xff] %v5203_v37 }
 0x713   : > { %v5205_v49 = vpop.permute.xlu0 %2205 }
 0x714   : > { %7248 = vst [vmem:[#allocation159_spill] sm:$0xff] %v5205_v49  ;;  %v5207_v35 = vpop.permute.xlu1 %2203 }
 0x715   : > { %7249 = vst [vmem:[#allocation160_spill] sm:$0xff] %v5207_v35 }
 0x717   : > { %v5209_v43 = vpop.permute.xlu0 %2209 }
 0x718   : > { %7250 = vst [vmem:[#allocation161_spill] sm:$0xff] %v5209_v43  ;;  %v5211_v13 = vpop.permute.xlu1 %2207 }
 0x719   : > { %7251 = vst [vmem:[#allocation162_spill] sm:$0xff] %v5211_v13 }
 0x71b   : > { %v5213_v59 = vpop.permute.xlu0 %2213 }
 0x71c   : > { %7252 = vst [vmem:[#allocation163_spill] sm:$0xff] %v5213_v59  ;;  %v5215_v12 = vpop.permute.xlu1 %2211 }
 0x71d   : > { %7253 = vst [vmem:[#allocation164_spill] sm:$0xff] %v5215_v12 }
 0x71f   : > { %v2256_v24 = vpop.permute.xlu0 %2255 }
 0x720   : > { %v5217_v23 = vpop.permute.xlu1 %2215  ;;  %v2264_v46 = vmul.f32 %v2256_v24, %v4467_v39  ;;  %v2267_v59 = vmul.f32 %v2256_v24, %v4488_v22  ;;  %v2273_v12 = vmul.f32 %v2256_v24, %v4507_v14 }
 0x721   : > { %7254 = vst [vmem:[#allocation165_spill] sm:$0xff] %v5217_v23  ;;  %v2270_v23 = vmul.f32 %v2256_v24, %v4490_v44 }
 0x722   : > { %2288 = vrot.lane.b32.xlu0 %v2264_v46, %s4101_s17 }
 0x724   : > { %v2258_v37 = vpop.permute.xlu1 %2257 }
 0x725   : > { %v2260_v49 = vsel %vm2259_vm15, %v2256_v24, %v2258_v37  ;;  %v2266_v6 = vmul.f32 0.0, %v2258_v37  ;;  %v3983_v24 = vld [vmem:[%s6904_s3 + $0x138] sm:$0xff]  ;;  %vm7090_vm15 = vcmask 392192  }
 0x726   : > { %v2265_v35 = vmul.f32 %v2260_v49, %v4473_v55  ;;  %v2268_v43 = vmul.f32 %v2260_v49, %v4475_v29  ;;  %v2271_v46 = vmul.f32 %v2260_v49, %v4494_v52  ;;  %v2274_v37 = vmul.f32 %v2260_v49, %v4496_v7 }
 0x727   : > { %2292 = vrot.lane.b32.xlu0 %v2266_v6, %s4101_s17 }
 0x728   : > { %2290 = vrot.lane.b32.xlu1 %v2265_v35, %s4101_s17  ;;  %v3980_v35 = vld [vmem:[%s6904_s3 + $0x120] sm:$0xff] }
 0x72b   : > { %2296 = vrot.lane.b32.xlu0 %v2268_v43, %s4101_s17 }
 0x72c   : > { %2294 = vrot.lane.b32.xlu1 %v2267_v59, %s4101_s17  ;;  %v3982_v59 = vld [vmem:[%s6904_s3 + $0x130] sm:$0xff] }
 0x72f   : > { %2300 = vrot.lane.b32.xlu0 %v2270_v23, %s4101_s17  ;;  %v3981_v23 = vld [vmem:[%s6904_s3 + $0x128] sm:$0xff] }
 0x730   : > { %2298 = vrot.lane.b32.xlu1 %v2266_v6, %s4101_s17 }
 0x733   : > { %2304 = vrot.lane.b32.xlu0 %v2266_v6, %s4101_s17 }
 0x734   : > { %2302 = vrot.lane.b32.xlu1 %v2271_v46, %s4101_s17 }
 0x737   : > { %2308 = vrot.lane.b32.xlu0 %v2274_v37, %s4101_s17 }
 0x738   : > { %2306 = vrot.lane.b32.xlu1 %v2273_v12, %s4101_s17 }
 0x73b   : > { %2350 = vrot.lane.b32.xlu0 %v3980_v35, %s4075_s9 }
 0x73c   : > { %2310 = vrot.lane.b32.xlu1 %v2266_v6, %s4101_s17 }
 0x73f   : > { %2387 = vrot.lane.b32.xlu0 %v3982_v59, %s4076_s14 }
 0x740   : > { %2352 = vrot.lane.b32.xlu1 %v3981_v23, %s4075_s9  ;;  %s7418_s9 = smov 110  }
 0x744   : > { %2389 = vrot.lane.b32.xlu1 %v3983_v24, %s4076_s14 }
 0x794   : > { %v5243_v49 = vpop.permute.xlu0 %2288 }
 0x795   : > { %7255 = vst [vmem:[#allocation166_spill] sm:$0xff] %v5243_v49 }
 0x799   : > { %v5245_v6 = vpop.permute.xlu0 %2292 }
 0x79a   : > { %7256 = vst [vmem:[#allocation167_spill] sm:$0xff] %v5245_v6  ;;  %v5247_v43 = vpop.permute.xlu1 %2290 }
 0x79b   : > { %7257 = vst [vmem:[#allocation168_spill] sm:$0xff] %v5247_v43 }
 0x79d   : > { %v5249_v12 = vpop.permute.xlu0 %2296 }
 0x79e   : > { %7258 = vst [vmem:[#allocation169_spill] sm:$0xff] %v5249_v12  ;;  %v5251_v46 = vpop.permute.xlu1 %2294 }
 0x79f   : > { %7259 = vst [vmem:[#allocation170_spill] sm:$0xff] %v5251_v46 }
 0x7a1   : > { %v5253_v37 = vpop.permute.xlu0 %2300 }
 0x7a2   : > { %7260 = vst [vmem:[#allocation171_spill] sm:$0xff] %v5253_v37  ;;  %v5255_v35 = vpop.permute.xlu1 %2298 }
 0x7a3   : > { %7261 = vst [vmem:[#allocation172_spill] sm:$0xff] %v5255_v35 }
 0x7a5   : > { %v5257_v59 = vpop.permute.xlu0 %2304 }
 0x7a6   : > { %7262 = vst [vmem:[#allocation173_spill] sm:$0xff] %v5257_v59  ;;  %v5259_v23 = vpop.permute.xlu1 %2302 }
 0x7a7   : > { %7263 = vst [vmem:[#allocation174_spill] sm:$0xff] %v5259_v23 }
 0x7a9   : > { %v5261_v13 = vpop.permute.xlu0 %2308 }
 0x7aa   : > { %7264 = vst [vmem:[#allocation175_spill] sm:$0xff] %v5261_v13  ;;  %v5263_v24 = vpop.permute.xlu1 %2306 }
 0x7ab   : > { %7265 = vst [vmem:[#allocation176_spill] sm:$0xff] %v5263_v24 }
 0x7ad   : > { %v5265_v49 = vpop.permute.xlu0 %2350 }
 0x7ae   : > { %7266 = vst [vmem:[#allocation177_spill] sm:$0xff] %v5265_v49  ;;  %v5267_v6 = vpop.permute.xlu1 %2310 }
 0x7af   : > { %7267 = vst [vmem:[#allocation178_spill] sm:$0xff] %v5267_v6 }
 0x7b1   : > { %v2388_v43 = vpop.permute.xlu0 %2387 }
 0x7b2   : > { %v5269_v12 = vpop.permute.xlu1 %2352  ;;  %v2395_v46 = vmul.f32 %v2388_v43, %v4467_v39  ;;  %v2398_v6 = vmul.f32 %v2388_v43, %v4488_v22  ;;  %v2404_v24 = vmul.f32 %v2388_v43, %v4507_v14 }
 0x7b3   : > { %7268 = vst [vmem:[#allocation179_spill] sm:$0xff] %v5269_v12 }
 0x7b4   : > { %2419 = vrot.lane.b32.xlu0 %v2395_v46, %s4081_s25  ;;  %v2401_v46 = vmul.f32 %v2388_v43, %v4490_v44 }
 0x7b6   : > { %v2390_v37 = vpop.permute.xlu1 %2389 }
 0x7b7   : > { %v2391_v59 = vsel %vm765_vm0, %v2388_v43, %v2390_v37  ;;  %v2397_v35 = vmul.f32 0.0, %v2390_v37 }
 0x7b8   : > { %v2396_v23 = vmul.f32 %v2391_v59, %v4473_v55  ;;  %v2399_v13 = vmul.f32 %v2391_v59, %v4475_v29  ;;  %v2402_v37 = vmul.f32 %v2391_v59, %v4494_v52 }
 0x7b9   : > { %2423 = vrot.lane.b32.xlu0 %v2397_v35, %s4081_s25 }
 0x7ba   : > { %2421 = vrot.lane.b32.xlu1 %v2396_v23, %s4081_s25  ;;  %v2405_v23 = vmul.f32 %v2391_v59, %v4496_v7 }
 0x7bd   : > { %2427 = vrot.lane.b32.xlu0 %v2399_v13, %s4081_s25  ;;  %v3984_v13 = vld [vmem:[%s6904_s3 + $0x140] sm:$0xff] }
 0x7be   : > { %2425 = vrot.lane.b32.xlu1 %v2398_v6, %s4081_s25  ;;  %v3985_v6 = vld [vmem:[%s6904_s3 + $0x148] sm:$0xff] }
 0x7c1   : > { %2431 = vrot.lane.b32.xlu0 %v2401_v46, %s4081_s25 }
 0x7c2   : > { %2429 = vrot.lane.b32.xlu1 %v2397_v35, %s4081_s25 }
 0x7c5   : > { %2435 = vrot.lane.b32.xlu0 %v2397_v35, %s4081_s25 }
 0x7c6   : > { %2433 = vrot.lane.b32.xlu1 %v2402_v37, %s4081_s25 }
 0x7c9   : > { %2439 = vrot.lane.b32.xlu0 %v2405_v23, %s4081_s25 }
 0x7ca   : > { %2437 = vrot.lane.b32.xlu1 %v2404_v24, %s4081_s25 }
 0x7cd   : > { %2480 = vrot.lane.b32.xlu0 %v3984_v13, %s4077_s19 }
 0x7ce   : > { %2441 = vrot.lane.b32.xlu1 %v2397_v35, %s4081_s25 }
 0x7d2   : > { %2482 = vrot.lane.b32.xlu1 %v3985_v6, %s4077_s19 }
 0x826   : > { %v5300_v59 = vpop.permute.xlu0 %2419 }
 0x827   : > { %7269 = vst [vmem:[#allocation180_spill] sm:$0xff] %v5300_v59 }
 0x82b   : > { %v5302_v43 = vpop.permute.xlu0 %2423 }
 0x82c   : > { %7270 = vst [vmem:[#allocation181_spill] sm:$0xff] %v5302_v43  ;;  %v5304_v46 = vpop.permute.xlu1 %2421 }
 0x82d   : > { %7271 = vst [vmem:[#allocation182_spill] sm:$0xff] %v5304_v46 }
 0x82f   : > { %v5306_v24 = vpop.permute.xlu0 %2427 }
 0x830   : > { %7272 = vst [vmem:[#allocation183_spill] sm:$0xff] %v5306_v24  ;;  %v5308_v37 = vpop.permute.xlu1 %2425 }
 0x831   : > { %7273 = vst [vmem:[#allocation184_spill] sm:$0xff] %v5308_v37 }
 0x833   : > { %v5310_v23 = vpop.permute.xlu0 %2431 }
 0x834   : > { %7274 = vst [vmem:[#allocation185_spill] sm:$0xff] %v5310_v23  ;;  %v5312_v13 = vpop.permute.xlu1 %2429 }
 0x835   : > { %7275 = vst [vmem:[#allocation186_spill] sm:$0xff] %v5312_v13 }
 0x837   : > { %v5314_v35 = vpop.permute.xlu0 %2435 }
 0x838   : > { %7276 = vst [vmem:[#allocation187_spill] sm:$0xff] %v5314_v35  ;;  %v5316_v49 = vpop.permute.xlu1 %2433 }
 0x839   : > { %7277 = vst [vmem:[#allocation188_spill] sm:$0xff] %v5316_v49 }
 0x83b   : > { %v5318_v12 = vpop.permute.xlu0 %2439 }
 0x83c   : > { %7278 = vst [vmem:[#allocation189_spill] sm:$0xff] %v5318_v12  ;;  %v5320_v6 = vpop.permute.xlu1 %2437 }
 0x83d   : > { %7279 = vst [vmem:[#allocation190_spill] sm:$0xff] %v5320_v6 }
 0x83f   : > { %v2481_v59 = vpop.permute.xlu0 %2480 }
 0x840   : > { %v5322_v43 = vpop.permute.xlu1 %2441  ;;  %v2488_v46 = vmul.f32 %v2481_v59, %v4467_v39  ;;  %v2491_v6 = vmul.f32 %v2481_v59, %v4488_v22 }
 0x841   : > { %7280 = vst [vmem:[#allocation191_spill] sm:$0xff] %v5322_v43  ;;  %v2497_v43 = vmul.f32 %v2481_v59, %v4507_v14 }
 0x842   : > { %2512 = vrot.lane.b32.xlu0 %v2488_v46, %s4082_s27  ;;  %v2494_v46 = vmul.f32 %v2481_v59, %v4490_v44 }
 0x844   : > { %v2483_v37 = vpop.permute.xlu1 %2482 }
 0x845   : > { %v2484_v23 = vsel %vm860_vm1, %v2481_v59, %v2483_v37  ;;  %v2490_v24 = vmul.f32 0.0, %v2483_v37  ;;  %vm727_vm1 = vcmask 449536  }
 0x846   : > { %v2489_v13 = vmul.f32 %v2484_v23, %v4473_v55  ;;  %v2492_v12 = vmul.f32 %v2484_v23, %v4475_v29  ;;  %v2495_v37 = vmul.f32 %v2484_v23, %v4494_v52 }
 0x847   : > { %2516 = vrot.lane.b32.xlu0 %v2490_v24, %s4082_s27 }
 0x848   : > { %2514 = vrot.lane.b32.xlu1 %v2489_v13, %s4082_s27  ;;  %v2498_v13 = vmul.f32 %v2484_v23, %v4496_v7 }
 0x84b   : > { %2520 = vrot.lane.b32.xlu0 %v2492_v12, %s4082_s27  ;;  %v3986_v12 = vld [vmem:[%s6904_s3 + $0x150] sm:$0xff] }
 0x84c   : > { %2518 = vrot.lane.b32.xlu1 %v2491_v6, %s4082_s27  ;;  %v3987_v6 = vld [vmem:[%s6904_s3 + $0x158] sm:$0xff] }
 0x84f   : > { %2524 = vrot.lane.b32.xlu0 %v2494_v46, %s4082_s27 }
 0x850   : > { %2522 = vrot.lane.b32.xlu1 %v2490_v24, %s4082_s27 }
 0x853   : > { %2528 = vrot.lane.b32.xlu0 %v2490_v24, %s4082_s27 }
 0x854   : > { %2526 = vrot.lane.b32.xlu1 %v2495_v37, %s4082_s27 }
 0x857   : > { %2532 = vrot.lane.b32.xlu0 %v2498_v13, %s4082_s27 }
 0x858   : > { %2530 = vrot.lane.b32.xlu1 %v2497_v43, %s4082_s27 }
 0x85b   : > { %2573 = vrot.lane.b32.xlu0 %v3986_v12, %s4078_s26 }
 0x85c   : > { %2534 = vrot.lane.b32.xlu1 %v2490_v24, %s4082_s27 }
 0x860   : > { %2575 = vrot.lane.b32.xlu1 %v3987_v6, %s4078_s26 }
 0x8b4   : > { %v5353_v23 = vpop.permute.xlu0 %2512 }
 0x8b5   : > { %7281 = vst [vmem:[#allocation192_spill] sm:$0xff] %v5353_v23 }
 0x8b9   : > { %v5355_v59 = vpop.permute.xlu0 %2516 }
 0x8ba   : > { %7282 = vst [vmem:[#allocation193_spill] sm:$0xff] %v5355_v59  ;;  %v5357_v46 = vpop.permute.xlu1 %2514 }
 0x8bb   : > { %7283 = vst [vmem:[#allocation194_spill] sm:$0xff] %v5357_v46 }
 0x8bd   : > { %v5359_v43 = vpop.permute.xlu0 %2520 }
 0x8be   : > { %7284 = vst [vmem:[#allocation195_spill] sm:$0xff] %v5359_v43  ;;  %v5361_v37 = vpop.permute.xlu1 %2518 }
 0x8bf   : > { %7285 = vst [vmem:[#allocation196_spill] sm:$0xff] %v5361_v37 }
 0x8c1   : > { %v5363_v13 = vpop.permute.xlu0 %2524 }
 0x8c2   : > { %7286 = vst [vmem:[#allocation197_spill] sm:$0xff] %v5363_v13  ;;  %v5365_v12 = vpop.permute.xlu1 %2522 }
 0x8c3   : > { %7287 = vst [vmem:[#allocation198_spill] sm:$0xff] %v5365_v12 }
 0x8c5   : > { %v5367_v24 = vpop.permute.xlu0 %2528 }
 0x8c6   : > { %7288 = vst [vmem:[#allocation199_spill] sm:$0xff] %v5367_v24  ;;  %v5369_v35 = vpop.permute.xlu1 %2526 }
 0x8c7   : > { %7289 = vst [vmem:[#allocation200_spill] sm:$0xff] %v5369_v35 }
 0x8c9   : > { %v5371_v49 = vpop.permute.xlu0 %2532 }
 0x8ca   : > { %7290 = vst [vmem:[#allocation201_spill] sm:$0xff] %v5371_v49  ;;  %v5373_v6 = vpop.permute.xlu1 %2530 }
 0x8cb   : > { %7291 = vst [vmem:[#allocation202_spill] sm:$0xff] %v5373_v6 }
 0x8cd   : > { %v2574_v23 = vpop.permute.xlu0 %2573 }
 0x8ce   : > { %v5375_v59 = vpop.permute.xlu1 %2534  ;;  %v2581_v46 = vmul.f32 %v2574_v23, %v4467_v39  ;;  %v2584_v6 = vmul.f32 %v2574_v23, %v4488_v22 }
 0x8cf   : > { %7292 = vst [vmem:[#allocation203_spill] sm:$0xff] %v5375_v59  ;;  %v2590_v59 = vmul.f32 %v2574_v23, %v4507_v14 }
 0x8d0   : > { %2605 = vrot.lane.b32.xlu0 %v2581_v46, %s4083_s28  ;;  %v3989_v46 = vld [vmem:[%s6904_s3 + $0x168] sm:$0xff] }
 0x8d2   : > { %v2576_v37 = vpop.permute.xlu1 %2575 }
 0x8d3   : > { %v2577_v13 = vsel %vm955_vm2, %v2574_v23, %v2576_v37  ;;  %v2583_v43 = vmul.f32 0.0, %v2576_v37  ;;  %v3988_v37 = vld [vmem:[%s6904_s3 + $0x160] sm:$0xff] }
 0x8d4   : > { %v2582_v12 = vmul.f32 %v2577_v13, %v4473_v55  ;;  %v2585_v49 = vmul.f32 %v2577_v13, %v4475_v29 }
 0x8d5   : > { %2609 = vrot.lane.b32.xlu0 %v2583_v43, %s4083_s28 }
 0x8d6   : > { %2607 = vrot.lane.b32.xlu1 %v2582_v12, %s4083_s28  ;;  %v3991_v12 = vld [vmem:[%s6904_s3 + $0x178] sm:$0xff] }
 0x8d9   : > { %2613 = vrot.lane.b32.xlu0 %v2585_v49, %s4083_s28  ;;  %v3990_v49 = vld [vmem:[%s6904_s3 + $0x170] sm:$0xff] }
 0x8da   : > { %2611 = vrot.lane.b32.xlu1 %v2584_v6, %s4083_s28  ;;  %v3993_v6 = vld [vmem:[%s6904_s3 + $0x188] sm:$0xff] }
 0x8dd   : > { %2668 = vrot.lane.b32.xlu0 %v3989_v46, %s4079_s8  ;;  %v3992_v46 = vld [vmem:[%s6904_s3 + $0x180] sm:$0xff] }
 0x8de   : > { %2666 = vrot.lane.b32.xlu1 %v3988_v37, %s4079_s8  ;;  %v3995_v37 = vld [vmem:[%s6904_s3 + $0x198] sm:$0xff]  ;;  %s7549_s8 = sshll.u32 %s7559_s18, 4 }
 0x8df   : > { %s6869_s17 = scalar_lea.vmem %s6908_s7, %s7549_s8 }
 0x8e1   : > { %2761 = vrot.lane.b32.xlu0 %v3991_v12, %s4080_s15  ;;  %v3994_v12 = vld [vmem:[%s6904_s3 + $0x190] sm:$0xff] }
 0x8e2   : > { %2759 = vrot.lane.b32.xlu1 %v3990_v49, %s4080_s15  ;;  %v3997_v49 = vld [vmem:[%s6904_s3 + $0x1a8] sm:$0xff] }
 0x8e5   : > { %2854 = vrot.lane.b32.xlu0 %v3993_v6, %s4086_s16  ;;  %v3996_v6 = vld [vmem:[%s6904_s3 + $0x1a0] sm:$0xff] }
 0x8e6   : > { %2852 = vrot.lane.b32.xlu1 %v3992_v46, %s4086_s16  ;;  %s7293_s16 = smov 73   ;;  %v2587_v46 = vmul.f32 %v2574_v23, %v4490_v44 }
 0x8e9   : > { %2947 = vrot.lane.b32.xlu0 %v3995_v37, %s4088_s12  ;;  %v2588_v37 = vmul.f32 %v2577_v13, %v4494_v52 }
 0x8ea   : > { %2945 = vrot.lane.b32.xlu1 %v3994_v12, %s4088_s12  ;;  %v2591_v12 = vmul.f32 %v2577_v13, %v4496_v7  ;;  %s7309_s12 = smov 118  }
 0x8ed   : > { %3040 = vrot.lane.b32.xlu0 %v3997_v49, %s7293_s16 }
 0x8ee   : > { %3038 = vrot.lane.b32.xlu1 %v3996_v6, %s7293_s16 }
 0x8f1   : > { %2617 = vrot.lane.b32.xlu0 %v2587_v46, %s4083_s28 }
 0x8f2   : > { %2615 = vrot.lane.b32.xlu1 %v2583_v43, %s4083_s28 }
 0x8f5   : > { %2621 = vrot.lane.b32.xlu0 %v2583_v43, %s4083_s28 }
 0x8f6   : > { %2619 = vrot.lane.b32.xlu1 %v2588_v37, %s4083_s28 }
 0x8f9   : > { %2625 = vrot.lane.b32.xlu0 %v2591_v12, %s4083_s28 }
 0x8fa   : > { %2623 = vrot.lane.b32.xlu1 %v2590_v59, %s4083_s28 }
 0x8fe   : > { %2627 = vrot.lane.b32.xlu1 %v2583_v43, %s4083_s28  ;;  %s7299_s28 = smov 119  }
 0x942   : > { %v5438_v49 = vpop.permute.xlu0 %2605 }
 0x943   : > { %7294 = vst [vmem:[#allocation204_spill] sm:$0xff] %v5438_v49 }
 0x947   : > { %v5440_v6 = vpop.permute.xlu0 %2609 }
 0x948   : > { %7295 = vst [vmem:[#allocation205_spill] sm:$0xff] %v5440_v6  ;;  %v5442_v46 = vpop.permute.xlu1 %2607 }
 0x949   : > { %7296 = vst [vmem:[#allocation206_spill] sm:$0xff] %v5442_v46 }
 0x94b   : > { %v5444_v24 = vpop.permute.xlu0 %2613 }
 0x94c   : > { %7297 = vst [vmem:[#allocation207_spill] sm:$0xff] %v5444_v24  ;;  %v5446_v35 = vpop.permute.xlu1 %2611 }
 0x94d   : > { %7298 = vst [vmem:[#allocation208_spill] sm:$0xff] %v5446_v35 }
 0x94f   : > { %v2669_v37 = vpop.permute.xlu0 %2668 }
 0x950   : > { %v2667_v13 = vpop.permute.xlu1 %2666  ;;  %v2676_v6 = vmul.f32 0.0, %v2669_v37 }
 0x951   : > { %v2674_v23 = vmul.f32 %v2667_v13, %v4467_v39  ;;  %v2670_v12 = vsel %vm1050_vm3, %v2667_v13, %v2669_v37  ;;  %v2677_v49 = vmul.f32 %v2667_v13, %v4488_v22  ;;  %v2680_v37 = vmul.f32 %v2667_v13, %v4490_v44 }
 0x952   : > { %v2675_v59 = vmul.f32 %v2670_v12, %v4473_v55  ;;  %v2678_v38 = vmul.f32 %v2670_v12, %v4475_v29 }
 0x953   : > { %v2762_v33 = vpop.permute.xlu0 %2761  ;;  %2698 = vrot.lane.b32.xlu0 %v2674_v23, %s7299_s28 }
 0x954   : > { %2700 = vrot.lane.b32.xlu1 %v2675_v59, %s7299_s28  ;;  %v5453_v43 = vpop.permute.xlu1 %2759  ;;  %v2681_v59 = vmul.f32 %v2670_v12, %v4494_v52 }
 0x957   : > { %v5456_v46 = vpop.permute.xlu0 %2854  ;;  %2702 = vrot.lane.b32.xlu0 %v2676_v6, %s7299_s28 }
 0x958   : > { %2704 = vrot.lane.b32.xlu1 %v2677_v49, %s7299_s28  ;;  %v5460_v35 = vpop.permute.xlu1 %2852 }
 0x95b   : > { %v5463_v36 = vpop.permute.xlu0 %2947  ;;  %2706 = vrot.lane.b32.xlu0 %v2678_v38, %s7299_s28 }
 0x95c   : > { %7300 = vst [vmem:[#allocation209_spill] sm:$0xff] %v5463_v36  ;;  %2708 = vrot.lane.b32.xlu1 %v2676_v6, %s7299_s28  ;;  %v5467_v23 = vpop.permute.xlu1 %2945  ;;  %v2683_v36 = vmul.f32 %v2667_v13, %v4507_v14  ;;  %v5493_v13 = vsel %vm1145_vm4, %v5453_v43, %v2762_v33  ;;  %vm913_vm4 = vcmask 1031168  }
 0x95d   : > { %7301 = vst [vmem:[#allocation210_spill] sm:$0xff] %v5467_v23 }
 0x95f   : > { %v5471_v1 = vpop.permute.xlu0 %3040  ;;  %2710 = vrot.lane.b32.xlu0 %v2680_v37, %s7299_s28  ;;  %v2684_v37 = vmul.f32 %v2670_v12, %v4496_v7  ;;  %v2767_v12 = vmul.f32 %v5453_v43, %v4467_v39 }
 0x960   : > { %7302 = vst [vmem:[#allocation211_spill] sm:$0xff] %v5471_v1  ;;  %2712 = vrot.lane.b32.xlu1 %v2681_v59, %s7299_s28  ;;  %v5475_v49 = vpop.permute.xlu1 %3038 }
 0x961   : > { %7303 = vst [vmem:[#allocation212_spill] sm:$0xff] %v5475_v49  ;;  %v821_v49 = vsel %vm818_vm11, %v4581_v11, %v4637_v62 }
 0x963   : > { %v2618_v34 = vpop.permute.xlu0 %2617  ;;  %2714 = vrot.lane.b32.xlu0 %v2676_v6, %s7299_s28 }
 0x964   : > { %2716 = vrot.lane.b32.xlu1 %v2683_v36, %s7299_s28  ;;  %v5480_v38 = vpop.permute.xlu1 %2615 }
 0x965   : > { %7304 = vst [vmem:[#allocation213_spill] sm:$0xff] %v5480_v38  ;;  %v5485_v23 = vsel %vm1008_vm9, %v5444_v24, %v5480_v38  ;;  %v2773_v24 = vmul.f32 %v5453_v43, %v4490_v44 }
 0x966   : > { %7305 = vst [vmem:[#allocation214_spill] sm:$0xff] %v5485_v23  ;;  %v5509_v23 = vmul.f32 0.0, %v2762_v33 }
 0x967   : > { %v5488_v1 = vpop.permute.xlu0 %2621  ;;  %2718 = vrot.lane.b32.xlu0 %v2684_v37, %s7299_s28  ;;  %v2768_v37 = vmul.f32 %v5493_v13, %v4473_v55 }
 0x968   : > { %7306 = vst [vmem:[#allocation215_spill] sm:$0xff] %v5488_v1  ;;  %2720 = vrot.lane.b32.xlu1 %v2676_v6, %s7299_s28  ;;  %v2620_v36 = vpop.permute.xlu1 %2619  ;;  %v2771_v6 = vmul.f32 %v5493_v13, %v4475_v29 }
 0x969   : > { %v5497_v59 = vsel %vm1008_vm9, %v2618_v34, %v2620_v36  ;;  %v5501_v38 = vsel %vm1008_vm9, %v2620_v36, %v5488_v1  ;;  %v2770_v34 = vmul.f32 %v5453_v43, %v4488_v22  ;;  %v728_v36 = vsel %vm727_vm1, %v4221_v21, %v4423_v25 }
 0x96a   : > { %7307 = vst [vmem:[#allocation216_spill] sm:$0xff] %v5497_v59  ;;  %7308 = vst [vmem:[#allocation217_spill] sm:$0xff] %v5501_v38  ;;  %v733_v33 = vmul.f32 %v728_v36, %v4467_v39  ;;  %v737_v38 = vmul.f32 %v4423_v25, %v4475_v29  ;;  %v736_v1 = vmul.f32 %v728_v36, %v4488_v22 }
 0x96b   : > { %2791 = vrot.lane.b32.xlu0 %v2767_v12, %s7309_s12  ;;  %v732_v12 = vmul.f32 0.0, %v4221_v21  ;;  %v739_v59 = vmul.f32 %v728_v36, %v4490_v44  ;;  %v820_v21 = vsel %vm818_vm11, %v4631_v18, %v4633_v56  ;;  %v822_v22 = vsel %vm818_vm11, %v4637_v62, %v4635_v61 }
 0x96c   : > { %2793 = vrot.lane.b32.xlu1 %v2768_v37, %s7309_s12  ;;  %v734_v37 = vmul.f32 %v4423_v25, %v4473_v55  ;;  %v2774_v29 = vmul.f32 %v5493_v13, %v4494_v52  ;;  %v5557_v44 = vmul.f32 %v728_v36, %v4507_v14  ;;  %v840_v11 = vadd.f32 %v820_v21, %v733_v33 }
 0x96d   : > { %v824_v62 = vsel %vm818_vm11, %v4639_v53, %v4641_v31 }
 0x96f   : > { %2795 = vrot.lane.b32.xlu0 %v5509_v23, %s7309_s12 }
 0x970   : > { %2797 = vrot.lane.b32.xlu1 %v2770_v34, %s7309_s12  ;;  %v819_v34 = vsel %vm818_vm11, %v4583_v15, %v4631_v18  ;;  %v743_v15 = vmul.f32 %v4423_v25, %v4496_v7  ;;  %v823_v18 = vsel %vm818_vm11, %v4597_v16, %v4639_v53  ;;  %v844_v7 = vadd.f32 %v4635_v61, %v737_v38 }
 0x971   : > { %v839_v10 = vadd.f32 %v819_v34, %v732_v12  ;;  %v825_v16 = vsel %vm818_vm11, %v4595_v8, %v4645_v40  ;;  %v845_v36 = vadd.f32 %v823_v18, %v732_v12  ;;  %v914_v61 = vsel %vm913_vm4, %v4603_v27, %v4647_v45 }
 0x972   : > { %v5578_v53 = vsel %vm1240_vm5, %v5460_v35, %v5456_v46  ;;  %v846_v8 = vadd.f32 %v824_v62, %v739_v59  ;;  %v916_v27 = vsel %vm913_vm4, %v4601_v30, %v4653_v41  ;;  %v919_v30 = vsel %vm913_vm4, %v4655_v47, %v4657_v51 }
 0x973   : > { %2799 = vrot.lane.b32.xlu0 %v2771_v6, %s7309_s12  ;;  %v740_v6 = vmul.f32 %v4423_v25, %v4494_v52  ;;  %v841_v25 = vadd.f32 %v4633_v56, %v734_v37  ;;  %v842_v56 = vadd.f32 %v821_v49, %v732_v12  ;;  %v843_v37 = vadd.f32 %v822_v22, %v736_v1 }
 0x974   : > { %2801 = vrot.lane.b32.xlu1 %v5509_v23, %s7309_s12  ;;  %v5585_v1 = vsel %vm818_vm11, %v4645_v40, %v4643_v26  ;;  %v848_v22 = vadd.f32 %v825_v16, %v732_v12  ;;  %v917_v49 = vsel %vm913_vm4, %v4653_v41, %v4651_v0  ;;  %v5602_v40 = vmul.f32 0.0, %v5456_v46 }
 0x975   : > { %v847_v34 = vadd.f32 %v4641_v31, %v740_v6  ;;  %v915_v31 = vsel %vm913_vm4, %v4647_v45, %v4649_v63  ;;  %v934_v45 = vadd.f32 %v914_v61, %v839_v10  ;;  %v936_v38 = vadd.f32 %v4649_v63, %v841_v25  ;;  %v7314_v61 = vld [vmem:[#allocation25_spill] sm:$0xff] }
 0x976   : > { %vm1198_vm5 = vcmask 965632   ;;  %v2861_v41 = vmul.f32 %v5578_v53, %v4473_v55  ;;  %v935_v59 = vadd.f32 %v915_v31, %v840_v11  ;;  %v939_v12 = vadd.f32 %v4651_v0, %v844_v7  ;;  %v3126_v0 = vld [vmem:[%s6905_s4] sm:$0xff] }
 0x977   : > { %2803 = vrot.lane.b32.xlu0 %v2773_v24, %s7309_s12  ;;  %v5570_v24 = vadd.f32 %v4643_v26, %v743_v15  ;;  %v918_v26 = vsel %vm913_vm4, %v4607_v20, %v4655_v47  ;;  %v920_v20 = vsel %vm913_vm4, %v4605_v42, %v4661_v60  ;;  %v1009_v10 = vsel %vm1008_vm9, %v4611_v19, %v4663_v2 }
 0x978   : > { %2805 = vrot.lane.b32.xlu1 %v2774_v29, %s7309_s12  ;;  %v2860_v29 = vmul.f32 %v5460_v35, %v4467_v39  ;;  %v937_v63 = vadd.f32 %v916_v27, %v842_v56  ;;  %v938_v46 = vadd.f32 %v917_v49, %v843_v37  ;;  %v940_v33 = vadd.f32 %v918_v26, %v845_v36  ;;  %v7311_v56 = vld [vmem:[#allocation24_spill] sm:$0xff]  ;;  %v7317_v27 = vld [vmem:[#allocation14_spill] sm:$0xff] }
 0x979   : > { %v942_v47 = vadd.f32 %v4657_v51, %v847_v34  ;;  %v941_v21 = vadd.f32 %v919_v30, %v846_v8  ;;  %v1010_v7 = vsel %vm1008_vm9, %v4663_v2, %v4665_v17  ;;  %v1011_v42 = vsel %vm1008_vm9, %v4609_v54, %v4669_v9  ;;  %v7313_v34 = vld [vmem:[#allocation23_spill] sm:$0xff]  ;;  %v7318_v30 = vld [vmem:[#allocation28_spill] sm:$0xff] }
 0x97a   : > { %v1012_v19 = vsel %vm1008_vm9, %v4669_v9, %v4667_v57  ;;  %v943_v51 = vadd.f32 %v920_v20, %v848_v22  ;;  %v1029_v6 = vadd.f32 %v1009_v10, %v934_v45  ;;  %v1031_v15 = vadd.f32 %v4665_v17, %v936_v38  ;;  %v7320_v10 = vld [vmem:[#allocation29_spill] sm:$0xff] }
 0x97b   : > { %2807 = vrot.lane.b32.xlu0 %v5509_v23, %s7309_s12  ;;  %v1013_v2 = vsel %vm1008_vm9, %v4615_v28, %v4671_v48  ;;  %v1034_v54 = vadd.f32 %v4667_v57, %v939_v12  ;;  %v1014_v9 = vsel %vm1008_vm9, %v4671_v48, %v4673_v5  ;;  %v1015_v18 = vsel %vm1008_vm9, %v4613_v50, %v4677_v32  ;;  %v7312_v50 = vld [vmem:[#allocation15_spill] sm:$0xff] }
 0x97c   : > { %2884 = vrot.lane.b32.xlu1 %v2860_v29, %s7310_s21  ;;  %v2776_v25 = vmul.f32 %v5453_v43, %v4507_v14  ;;  %v1030_v11 = vadd.f32 %v1010_v7, %v935_v59  ;;  %v1032_v62 = vadd.f32 %v1011_v42, %v937_v63  ;;  %v1033_v17 = vadd.f32 %v1012_v19, %v938_v46  ;;  %v7315_v29 = vld [vmem:[#allocation17_spill] sm:$0xff]  ;;  %v7321_v63 = vld [vmem:[#allocation19_spill] sm:$0xff]  ;;  %v7324_v42 = vld [vmem:[#allocation32_spill] sm:$0xff] }
 0x97d   : > { %v1104_v28 = vsel %vm1103_vm8, %v4619_v58, %v4679_v4  ;;  %v1035_v57 = vadd.f32 %v1013_v2, %v940_v33  ;;  %v1037_v16 = vadd.f32 %v4673_v5, %v942_v47  ;;  %v1105_v48 = vsel %vm1103_vm8, %v4679_v4, %v4681_v3  ;;  %v7316_v4 = vld [vmem:[#allocation26_spill] sm:$0xff] }
 0x97e   : > { %v1106_v37 = vsel %vm1103_vm8, %v7312_v50, %v7311_v56  ;;  %v1036_v43 = vadd.f32 %v1014_v9, %v941_v21  ;;  %v1038_v36 = vadd.f32 %v1015_v18, %v943_v51  ;;  %v1107_v58 = vsel %vm1103_vm8, %v7311_v56, %v7313_v34  ;;  %v7322_v33 = vld [vmem:[#allocation30_spill] sm:$0xff]  ;;  %v7323_v21 = vld [vmem:[#allocation11_spill] sm:$0xff] }
 0x97f   : > { %2886 = vrot.lane.b32.xlu0 %v2861_v41, %s7310_s21  ;;  %v1108_v5 = vsel %vm1103_vm8, %v7315_v29, %v7314_v61  ;;  %v1124_v8 = vadd.f32 %v1104_v28, %v1029_v6  ;;  %v1126_v22 = vadd.f32 %v4681_v3, %v1031_v15  ;;  %v1109_v31 = vsel %vm1103_vm8, %v7314_v61, %v7316_v4  ;;  %v7319_v41 = vld [vmem:[#allocation16_spill] sm:$0xff]  ;;  %v7325_v19 = vld [vmem:[#allocation18_spill] sm:$0xff]  ;;  %v7326_v51 = vld [vmem:[#allocation31_spill] sm:$0xff] }
 0x980   : > { %2888 = vrot.lane.b32.xlu1 %v5602_v40, %s7310_s21  ;;  %v2777_v49 = vmul.f32 %v5493_v13, %v7317_v27  ;;  %v1125_v26 = vadd.f32 %v1105_v48, %v1030_v11  ;;  %v1129_v45 = vadd.f32 %v7313_v34, %v1034_v54  ;;  %v1127_v38 = vadd.f32 %v1106_v37, %v1032_v62  ;;  %v7327_v15 = vld [vmem:[#allocation12_spill] sm:$0xff]  ;;  %v7330_v28 = vld [vmem:[#allocation34_spill] sm:$0xff]  ;;  %v7332_v48 = vld [vmem:[#allocation35_spill] sm:$0xff] }
 0x981   : > { %v1110_v59 = vsel %vm1103_vm8, %v7319_v41, %v7318_v30  ;;  %v1128_v12 = vadd.f32 %v1107_v58, %v1033_v17  ;;  %v1130_v3 = vadd.f32 %v1108_v5, %v1035_v57  ;;  %v1132_v20 = vadd.f32 %v7316_v4, %v1037_v16  ;;  %v7329_v11 = vld [vmem:[#allocation20_spill] sm:$0xff]  ;;  %v7333_v50 = vld [vmem:[#allocation39_spill] sm:$0xff]  ;;  %v7334_v37 = vld [vmem:[#allocation38_spill] sm:$0xff] }
 0x982   : > { %v1199_v46 = vsel %vm1198_vm5, %v7321_v63, %v7320_v10  ;;  %v1131_v13 = vadd.f32 %v1109_v31, %v1036_v43  ;;  %v1200_v47 = vsel %vm1198_vm5, %v7320_v10, %v7322_v33  ;;  %v2864_v7 = vmul.f32 %v5578_v53, %v7323_v21  ;;  %v7331_v16 = vld [vmem:[#allocation36_spill] sm:$0xff]  ;;  %v7336_v29 = vld [vmem:[#allocation13_spill] sm:$0xff]  ;;  %v7337_v4 = vld [vmem:[#allocation42_spill] sm:$0xff] }
 0x983   : > { %3129 = vperm.xlu0 %4046, %v3126_v0   ;;  %v1201_v0 = vsel %vm1198_vm5, %v7325_v19, %v7324_v42  ;;  %v1202_v6 = vsel %vm1198_vm5, %v7324_v42, %v7326_v51  ;;  %v2863_v2 = vmul.f32 %v5460_v35, %v7327_v15  ;;  %v1219_v54 = vadd.f32 %v1199_v46, %v1124_v8  ;;  %v7335_v58 = vld [vmem:[#allocation40_spill] sm:$0xff]  ;;  %v7338_v31 = vld [vmem:[#allocation41_spill] sm:$0xff]  ;;  %v7342_v46 = vld [vmem:[#allocation46_spill] sm:$0xff] }
 0x984   : > { %2809 = vrot.lane.b32.xlu1 %v2776_v25, %s7309_s12  ;;  %v1221_v9 = vadd.f32 %v7322_v33, %v1126_v22  ;;  %v1224_v18 = vadd.f32 %v7326_v51, %v1129_v45  ;;  %v7328_v25 = vld [vmem:[#allocation33_spill] sm:$0xff]  ;;  %v1220_v17 = vadd.f32 %v1200_v47, %v1125_v26  ;;  %v1205_v56 = vsel %vm1198_vm5, %v7332_v48, %v7331_v16  ;;  %v7339_v26 = vld [vmem:[#allocation43_spill] sm:$0xff]  ;;  %v7341_v63 = vld [vmem:[#allocation44_spill] sm:$0xff] }
 0x985   : > { %v1203_v62 = vsel %vm1198_vm5, %v7329_v11, %v7328_v25  ;;  %v1204_v57 = vsel %vm1198_vm5, %v7328_v25, %v7330_v28  ;;  %v1294_v43 = vsel %vm1293_vm10, %v7334_v37, %v7333_v50  ;;  %v1223_v34 = vadd.f32 %v1202_v6, %v1128_v12  ;;  %v7344_v42 = vld [vmem:[#allocation47_spill] sm:$0xff]  ;;  %v7346_v51 = vld [vmem:[#allocation50_spill] sm:$0xff]  ;;  %v7351_v48 = vld [vmem:[#allocation53_spill] sm:$0xff] }
 0x986   : > { %v1295_v61 = vsel %vm1293_vm10, %v7333_v50, %v7335_v58  ;;  %v2866_v5 = vmul.f32 %v5460_v35, %v7336_v29  ;;  %v1225_v8 = vadd.f32 %v1203_v62, %v1130_v3  ;;  %v1227_v22 = vadd.f32 %v7330_v28, %v1132_v20  ;;  %v7340_v3 = vld [vmem:[#allocation45_spill] sm:$0xff]  ;;  %v7349_v25 = vld [vmem:[#allocation210_spill] sm:$0xff]  ;;  %v7352_v37 = vld [vmem:[#allocation55_spill] sm:$0xff] }
 0x987   : > { %2813 = vrot.lane.b32.xlu0 %v5509_v23, %s7309_s12  ;;  %v1133_v23 = vadd.f32 %v1110_v59, %v1038_v36  ;;  %v1222_v36 = vadd.f32 %v1201_v0, %v1127_v38  ;;  %v1297_v45 = vsel %vm1293_vm10, %v7337_v4, %v7339_v26  ;;  %v1226_v38 = vadd.f32 %v1204_v57, %v1131_v13  ;;  %v7345_v0 = vld [vmem:[#allocation51_spill] sm:$0xff]  ;;  %v7350_v57 = vld [vmem:[#allocation54_spill] sm:$0xff] }
 0x988   : > { %2811 = vrot.lane.b32.xlu1 %v2777_v49, %s7309_s12  ;;  %v1296_v49 = vsel %vm1293_vm10, %v7338_v31, %v7337_v4  ;;  %v1314_v59 = vadd.f32 %v1294_v43, %v1219_v54  ;;  %v1315_v12 = vadd.f32 %v1295_v61, %v1220_v17  ;;  %v1316_v10 = vadd.f32 %v7335_v58, %v1221_v9  ;;  %v7348_v9 = vld [vmem:[#allocation209_spill] sm:$0xff]  ;;  %v7355_v31 = vld [vmem:[#allocation58_spill] sm:$0xff] }
 0x989   : > { %v1228_v41 = vadd.f32 %v1205_v56, %v1133_v23  ;;  %v1298_v20 = vsel %vm1293_vm10, %v7341_v63, %v7340_v3  ;;  %v1299_v33 = vsel %vm1293_vm10, %v7340_v3, %v7342_v46  ;;  %v1317_v13 = vadd.f32 %v1296_v49, %v1222_v36  ;;  %v7343_v23 = vld [vmem:[#allocation48_spill] sm:$0xff]  ;;  %v7353_v36 = vld [vmem:[#allocation57_spill] sm:$0xff]  ;;  %v7359_v63 = vld [vmem:[#allocation62_spill] sm:$0xff] }
 0x98a   : > { %v1318_v47 = vadd.f32 %v1297_v45, %v1223_v34  ;;  %v1300_v19 = vsel %vm1293_vm10, %v7344_v42, %v7343_v23  ;;  %v1389_v6 = vsel %vm1388_vm12, %v7346_v51, %v7345_v0  ;;  %v5745_v11 = vsel %vm1335_vm6, %v7349_v25, %v7348_v9  ;;  %v7354_v34 = vld [vmem:[#allocation56_spill] sm:$0xff]  ;;  %v7357_v45 = vld [vmem:[#allocation59_spill] sm:$0xff]  ;;  %v7362_v42 = vld [vmem:[#allocation66_spill] sm:$0xff] }
 0x98b   : > { %2892 = vrot.lane.b32.xlu0 %v2864_v7, %s7310_s21  ;;  %v1319_v7 = vadd.f32 %v7339_v26, %v1224_v18  ;;  %v2867_v18 = vmul.f32 %v5578_v53, %v4494_v52  ;;  %v1320_v62 = vadd.f32 %v1298_v20, %v1225_v8  ;;  %v1321_v17 = vadd.f32 %v1299_v33, %v1226_v38  ;;  %v7356_v26 = vld [vmem:[#allocation60_spill] sm:$0xff] }
 0x98c   : > { %2890 = vrot.lane.b32.xlu1 %v2863_v2, %s7310_s21  ;;  %v7347_v2 = vld [vmem:[#allocation52_spill] sm:$0xff]  ;;  %v1322_v28 = vadd.f32 %v7342_v46, %v1227_v22  ;;  %v1391_v56 = vsel %vm1388_vm12, %v7351_v48, %v7350_v57  ;;  %v1323_v50 = vadd.f32 %v1300_v19, %v1228_v41  ;;  %v1392_v43 = vsel %vm1388_vm12, %v7350_v57, %v7352_v37  ;;  %v7363_v19 = vld [vmem:[#allocation65_spill] sm:$0xff] }
 0x98d   : > { %v1390_v54 = vsel %vm1388_vm12, %v7345_v0, %v7347_v2  ;;  %v1393_v58 = vsel %vm1388_vm12, %v7354_v34, %v7353_v36  ;;  %vm1483_vm6 = vcmask 900096   ;;  %v1409_v61 = vadd.f32 %v1389_v6, %v1314_v59  ;;  %v7361_v33 = vld [vmem:[#allocation64_spill] sm:$0xff]  ;;  %v7364_v6 = vld [vmem:[#allocation67_spill] sm:$0xff] }
 0x98e   : > { %v1411_v8 = vadd.f32 %v7347_v2, %v1316_v10  ;;  %v2954_v22 = vmul.f32 %v5745_v11, %v4473_v55  ;;  %v1412_v4 = vadd.f32 %v1391_v56, %v1317_v13  ;;  %v1394_v49 = vsel %vm1388_vm12, %v7353_v36, %v7355_v31  ;;  %v7358_v10 = vld [vmem:[#allocation63_spill] sm:$0xff]  ;;  %v7366_v57 = vld [vmem:[#allocation68_spill] sm:$0xff] }
 0x98f   : > { %2896 = vrot.lane.b32.xlu0 %v2866_v5, %s7310_s21  ;;  %v1410_v5 = vadd.f32 %v1390_v54, %v1315_v12  ;;  %v1395_v38 = vsel %vm1388_vm12, %v7357_v45, %v7356_v26  ;;  %v2953_v41 = vmul.f32 %v7349_v25, %v4467_v39  ;;  %v1413_v3 = vadd.f32 %v1392_v43, %v1318_v47  ;;  %v7368_v43 = vld [vmem:[#allocation72_spill] sm:$0xff]  ;;  %v7369_v36 = vld [vmem:[#allocation71_spill] sm:$0xff] }
 0x990   : > { %2894 = vrot.lane.b32.xlu1 %v5602_v40, %s7310_s21  ;;  %v1414_v59 = vadd.f32 %v7352_v37, %v1319_v7  ;;  %v1415_v12 = vadd.f32 %v1393_v58, %v1320_v62  ;;  %v1484_v20 = vsel %vm1483_vm6, %v7359_v63, %v7358_v10  ;;  %v1417_v46 = vadd.f32 %v7355_v31, %v1322_v28  ;;  %v7365_v28 = vld [vmem:[#allocation69_spill] sm:$0xff]  ;;  %v7370_v58 = vld [vmem:[#allocation76_spill] sm:$0xff] }
 0x991   : > { %v1485_v13 = vsel %vm1483_vm6, %v7358_v10, %v7361_v33  ;;  %v1486_v0 = vsel %vm1483_vm6, %v7363_v19, %v7362_v42  ;;  %v5786_v47 = vmul.f32 0.0, %v7348_v9  ;;  %v1416_v7 = vadd.f32 %v1394_v49, %v1321_v17  ;;  %v7367_v9 = vld [vmem:[#allocation70_spill] sm:$0xff]  ;;  %v7373_v49 = vld [vmem:[#allocation77_spill] sm:$0xff] }
 0x992   : > { %v1418_v51 = vadd.f32 %v1395_v38, %v1323_v50  ;;  %v1487_v2 = vsel %vm1483_vm6, %v7362_v42, %v7364_v6  ;;  %v2869_v54 = vmul.f32 %v5460_v35, %v4507_v14  ;;  %v1506_v62 = vadd.f32 %v7361_v33, %v1411_v8  ;;  %v7377_v33 = vld [vmem:[#allocation79_spill] sm:$0xff] }
 0x993   : > { %2900 = vrot.lane.b32.xlu0 %v5602_v40, %s7310_s21  ;;  %v1488_v48 = vsel %vm1483_vm6, %v7366_v57, %v7365_v28  ;;  %v1489_v56 = vsel %vm1483_vm6, %v7365_v28, %v7367_v9  ;;  %v1505_v17 = vadd.f32 %v1485_v13, %v1410_v5  ;;  %v1507_v50 = vadd.f32 %v1486_v0, %v1412_v4  ;;  %v7374_v5 = vld [vmem:[#allocation78_spill] sm:$0xff]  ;;  %v7381_v28 = vld [vmem:[#allocation88_spill] sm:$0xff] }
 0x994   : > { %2898 = vrot.lane.b32.xlu1 %v2867_v18, %s7310_s21  ;;  %v1504_v18 = vadd.f32 %v1484_v20, %v1409_v61  ;;  %v1509_v37 = vadd.f32 %v7364_v6, %v1414_v59  ;;  %v1490_v34 = vsel %vm1483_vm6, %v7369_v36, %v7368_v43  ;;  %v1508_v35 = vadd.f32 %v1487_v2, %v1413_v3  ;;  %v7371_v61 = vld [vmem:[#allocation74_spill] sm:$0xff]  ;;  %v7375_v3 = vld [vmem:[#allocation80_spill] sm:$0xff]  ;;  %v7379_v2 = vld [vmem:[#allocation83_spill] sm:$0xff] }
 0x995   : > { %v1577_v8 = vsel %vm1050_vm3, %v7371_v61, %v7370_v58  ;;  %v1579_v4 = vsel %vm1050_vm3, %v7374_v5, %v7373_v49  ;;  %v1510_v45 = vadd.f32 %v1488_v48, %v1415_v12  ;;  %v1511_v38 = vadd.f32 %v1489_v56, %v1416_v7  ;;  %v7376_v20 = vld [vmem:[#allocation82_spill] sm:$0xff]  ;;  %v7378_v7 = vld [vmem:[#allocation81_spill] sm:$0xff]  ;;  %v7388_v5 = vld [vmem:[#allocation91_spill] sm:$0xff] }
 0x996   : > { %v1580_v59 = vsel %vm1050_vm3, %v7373_v49, %v7375_v3  ;;  %v1513_v10 = vadd.f32 %v1490_v34, %v1418_v51  ;;  %v1581_v13 = vsel %vm1050_vm3, %v7377_v33, %v7376_v20  ;;  %v2870_v42 = vmul.f32 %v5578_v53, %v7317_v27  ;;  %v7382_v57 = vld [vmem:[#allocation86_spill] sm:$0xff] }
 0x997   : > { %2979 = vrot.lane.b32.xlu0 %v2954_v22, %s7360_s10  ;;  %v7372_v22 = vld [vmem:[#allocation75_spill] sm:$0xff]  ;;  %v1597_v19 = vadd.f32 %v1577_v8, %v1504_v18  ;;  %v1600_v12 = vadd.f32 %v1579_v4, %v1507_v50  ;;  %v1601_v51 = vadd.f32 %v1580_v59, %v1508_v35  ;;  %v1602_v6 = vadd.f32 %v7375_v3, %v1509_v37  ;;  %v7384_v50 = vld [vmem:[#allocation89_spill] sm:$0xff]  ;;  %v7385_v37 = vld [vmem:[#allocation90_spill] sm:$0xff] }
 0x998   : > { %2977 = vrot.lane.b32.xlu1 %v2953_v41, %s7360_s10  ;;  %v1578_v31 = vsel %vm1050_vm3, %v7370_v58, %v7372_v22  ;;  %v1512_v41 = vadd.f32 %v7367_v9, %v1417_v46  ;;  %v1599_v63 = vadd.f32 %v7372_v22, %v1506_v62  ;;  %v1582_v46 = vsel %vm1050_vm3, %v7376_v20, %v7378_v7  ;;  %v7383_v9 = vld [vmem:[#allocation87_spill] sm:$0xff]  ;;  %v7386_v8 = vld [vmem:[#allocation92_spill] sm:$0xff]  ;;  %v7387_v49 = vld [vmem:[#allocation94_spill] sm:$0xff] }
 0x999   : > { %v1598_v0 = vadd.f32 %v1578_v31, %v1505_v17  ;;  %v1670_v53 = vsel %vm955_vm2, %v7382_v57, %v7381_v28  ;;  %v1603_v48 = vadd.f32 %v1581_v13, %v1510_v45  ;;  %v2957_v56 = vmul.f32 %v5745_v11, %v7323_v21  ;;  %v7389_v45 = vld [vmem:[#allocation93_spill] sm:$0xff]  ;;  %v7391_v3 = vld [vmem:[#allocation96_spill] sm:$0xff]  ;;  %v7393_v20 = vld [vmem:[#allocation98_spill] sm:$0xff] }
 0x99a   : > { %v1605_v18 = vadd.f32 %v7378_v7, %v1512_v41  ;;  %v1604_v17 = vadd.f32 %v1582_v46, %v1511_v38  ;;  %v1672_v36 = vsel %vm955_vm2, %v7385_v37, %v7384_v50  ;;  %v2956_v34 = vmul.f32 %v7349_v25, %v7327_v15  ;;  %v7390_v41 = vld [vmem:[#allocation95_spill] sm:$0xff] }
 0x99b   : > { %2902 = vrot.lane.b32.xlu0 %v2869_v54, %s7310_s21  ;;  %v7380_v54 = vld [vmem:[#allocation84_spill] sm:$0xff]  ;;  %v1692_v58 = vadd.f32 %v7383_v9, %v1599_v63  ;;  %v1690_v61 = vadd.f32 %v1670_v53, %v1597_v19  ;;  %v1673_v22 = vsel %vm955_vm2, %v7384_v50, %v7386_v8  ;;  %v1674_v4 = vsel %vm955_vm2, %v7388_v5, %v7387_v49  ;;  %v7394_v13 = vld [vmem:[#allocation99_spill] sm:$0xff] }
 0x99c   : > { %2981 = vrot.lane.b32.xlu1 %v5786_v47, %s7360_s10  ;;  %v1583_v62 = vsel %vm1050_vm3, %v7380_v54, %v7379_v2  ;;  %v1675_v38 = vsel %vm955_vm2, %v7387_v49, %v7389_v45  ;;  %v1676_v59 = vsel %vm955_vm2, %v7391_v3, %v7390_v41  ;;  %v7392_v63 = vld [vmem:[#allocation100_spill] sm:$0xff]  ;;  %v2959_v19 = vmul.f32 %v7349_v25, %v7336_v29  ;;  %v7395_v54 = vld [vmem:[#allocation101_spill] sm:$0xff]  ;;  %v7399_v37 = vld [vmem:[#allocation103_spill] sm:$0xff] }
 0x99d   : > { %v1606_v35 = vadd.f32 %v1583_v62, %v1513_v10  ;;  %v1693_v10 = vadd.f32 %v1672_v36, %v1600_v12  ;;  %v1765_v33 = vsel %vm1764_vm13, %v7393_v20, %v7392_v63  ;;  %v1695_v7 = vadd.f32 %v7386_v8, %v1602_v6  ;;  %v7396_v62 = vld [vmem:[#allocation102_spill] sm:$0xff]  ;;  %v7397_v50 = vld [vmem:[#allocation104_spill] sm:$0xff]  ;;  %v7400_v36 = vld [vmem:[#allocation105_spill] sm:$0xff] }
 0x99e   : > { %v1698_v46 = vadd.f32 %v7389_v45, %v1605_v18  ;;  %v1767_v12 = vsel %vm1764_vm13, %v7396_v62, %v7395_v54  ;;  %v1697_v57 = vadd.f32 %v1675_v38, %v1604_v17  ;;  %v7398_v6 = vld [vmem:[#allocation106_spill] sm:$0xff]  ;;  %v7403_v8 = vld [vmem:[#allocation112_spill] sm:$0xff]  ;;  %v7405_v49 = vld [vmem:[#allocation111_spill] sm:$0xff]  ;;  %v2960_v3 = vmul.f32 %v5745_v11, %v4494_v52 }
 0x99f   : > { %2906 = vrot.lane.b32.xlu0 %v5602_v40, %s7310_s21  ;;  %v1671_v40 = vsel %vm955_vm2, %v7381_v28, %v7383_v9  ;;  %v1696_v28 = vadd.f32 %v1674_v4, %v1603_v48  ;;  %v1699_v53 = vadd.f32 %v1676_v59, %v1606_v35  ;;  %v1787_v9 = vadd.f32 %v7394_v13, %v1692_v58  ;;  %v7401_v35 = vld [vmem:[#allocation107_spill] sm:$0xff]  ;;  %v7402_v58 = vld [vmem:[#allocation108_spill] sm:$0xff]  ;;  %v7408_v20 = vld [vmem:[#allocation113_spill] sm:$0xff] }
 0x9a0   : > { %2904 = vrot.lane.b32.xlu1 %v2870_v42, %s7310_s21  ;;  %v1691_v31 = vadd.f32 %v1671_v40, %v1598_v0  ;;  %v1766_v42 = vsel %vm1764_vm13, %v7392_v63, %v7394_v13  ;;  %v1694_v0 = vadd.f32 %v1673_v22, %v1601_v51  ;;  %v1785_v40 = vadd.f32 %v1765_v33, %v1690_v61  ;;  %v7404_v22 = vld [vmem:[#allocation110_spill] sm:$0xff]  ;;  %v7406_v4 = vld [vmem:[#allocation211_spill] sm:$0xff]  ;;  %v7407_v45 = vld [vmem:[#allocation212_spill] sm:$0xff] }
 0x9a1   : > { %v1768_v51 = vsel %vm1764_vm13, %v7395_v54, %v7397_v50  ;;  %v1769_v18 = vsel %vm1764_vm13, %v7399_v37, %v7398_v6  ;;  %v1788_v48 = vadd.f32 %v1767_v12, %v1693_v10  ;;  %v1790_v17 = vadd.f32 %v7397_v50, %v1695_v7  ;;  %v7409_v33 = vld [vmem:[#allocation114_spill] sm:$0xff]  ;;  %v7410_v54 = vld [vmem:[#allocation116_spill] sm:$0xff] }
 0x9a2   : > { %v1771_v61 = vsel %vm1764_vm13, %v7402_v58, %v7401_v35  ;;  %v1859_v5 = vsel %vm765_vm0, %v7403_v8, %v7405_v49  ;;  %v5905_v38 = vsel %vm7089_vm7, %v7407_v45, %v7406_v4  ;;  %v1789_v59 = vadd.f32 %v1768_v51, %v1694_v0  ;;  %v7411_v12 = vld [vmem:[#allocation118_spill] sm:$0xff]  ;;  %v7415_v37 = vld [vmem:[#allocation120_spill] sm:$0xff] }
 0x9a3   : > { %2985 = vrot.lane.b32.xlu0 %v2957_v56, %s7360_s10  ;;  %v1786_v56 = vadd.f32 %v1766_v42, %v1691_v31  ;;  %v1858_v31 = vsel %vm765_vm0, %v7404_v22, %v7403_v8  ;;  %v1793_v10 = vadd.f32 %v7400_v36, %v1698_v46  ;;  %v1791_v63 = vadd.f32 %v1769_v18, %v1696_v28  ;;  %v7412_v28 = vld [vmem:[#allocation115_spill] sm:$0xff]  ;;  %v7416_v58 = vld [vmem:[#allocation124_spill] sm:$0xff]  ;;  %v7419_v22 = vld [vmem:[#allocation126_spill] sm:$0xff] }
 0x9a4   : > { %2983 = vrot.lane.b32.xlu1 %v2956_v34, %s7360_s10  ;;  %v1770_v34 = vsel %vm1764_vm13, %v7398_v6, %v7400_v36  ;;  %v1860_v13 = vsel %vm765_vm0, %v7409_v33, %v7408_v20  ;;  %v1880_v7 = vadd.f32 %v7405_v49, %v1787_v9  ;;  %v1861_v62 = vsel %vm765_vm0, %v7408_v20, %v7410_v54  ;;  %v7414_v9 = vld [vmem:[#allocation119_spill] sm:$0xff]  ;;  %v7422_v20 = vld [vmem:[#allocation125_spill] sm:$0xff] }
 0x9a5   : > { %v1792_v42 = vadd.f32 %v1770_v34, %v1697_v57  ;;  %v1878_v0 = vadd.f32 %v1858_v31, %v1785_v40  ;;  %v1879_v46 = vadd.f32 %v1859_v5, %v1786_v56  ;;  %v1862_v50 = vsel %vm765_vm0, %v7412_v28, %v7411_v12  ;;  %v7413_v57 = vld [vmem:[#allocation117_spill] sm:$0xff]  ;;  %v7420_v31 = vld [vmem:[#allocation123_spill] sm:$0xff] }
 0x9a6   : > { %v3047_v51 = vmul.f32 %v5905_v38, %v4473_v55  ;;  %v1881_v6 = vadd.f32 %v1860_v13, %v1788_v48  ;;  %v1864_v18 = vsel %vm765_vm0, %v7415_v37, %v7414_v9  ;;  %v3046_v40 = vmul.f32 %v7407_v45, %v4467_v39  ;;  %v7428_v37 = vld [vmem:[#allocation134_spill] sm:$0xff] }
 0x9a7   : > { %2989 = vrot.lane.b32.xlu0 %v2959_v19, %s7360_s10  ;;  %v1794_v19 = vadd.f32 %v1771_v61, %v1699_v53  ;;  %v1863_v53 = vsel %vm765_vm0, %v7411_v12, %v7413_v57  ;;  %v1882_v56 = vadd.f32 %v1861_v62, %v1789_v59  ;;  %v1883_v36 = vadd.f32 %v7410_v54, %v1790_v17  ;;  %v7417_v61 = vld [vmem:[#allocation121_spill] sm:$0xff]  ;;  %v5949_v17 = vld [vmem:[%s6906_s5] sm:$0xf] }
 0x9a8   : > { %2987 = vrot.lane.b32.xlu1 %v5786_v47, %s7360_s10  ;;  %v1886_v34 = vadd.f32 %v7413_v57, %v1793_v10  ;;  %v1925_v48 = vsel %vm727_vm1, %v7417_v61, %v7416_v58  ;;  %v1884_v8 = vadd.f32 %v1862_v50, %v1791_v63  ;;  %v1926_v49 = vsel %vm727_vm1, %v7420_v31, %v7419_v22  ;;  %v7421_v63 = vld [vmem:[#allocation128_spill] sm:$0xff]  ;;  %v7423_v50 = vld [vmem:[#allocation127_spill] sm:$0xff] }
 0x9a9   : > { %v5943_v5 = vmul.f32 0.0, %v7406_v4  ;;  %v1887_v59 = vadd.f32 %v1864_v18, %v1794_v19  ;;  %v1941_v10 = vadd.f32 %v7417_v61, %v1878_v0  ;;  %v1927_v33 = vsel %vm727_vm1, %v7422_v20, %v7421_v63  ;;  %v7425_v19 = vld [vmem:[#allocation130_spill] sm:$0xff] }
 0x9aa   : > { %v1944_v13 = vadd.f32 %v7420_v31, %v1881_v6  ;;  %v1942_v54 = vadd.f32 %v1925_v48, %v1879_v46  ;;  %v1943_v4 = vadd.f32 %v7416_v58, %v1880_v7  ;;  %v1947_v62 = vadd.f32 %v7422_v20, %v1884_v8  ;;  %v7426_v6 = vld [vmem:[#allocation131_spill] sm:$0xff]  ;;  %v7427_v46 = vld [vmem:[#allocation133_spill] sm:$0xff]  ;;  %v7430_v61 = vld [vmem:[#allocation138_spill] sm:$0xff] }
 0x9ab   : > { %2993 = vrot.lane.b32.xlu0 %v5786_v47, %s7360_s10  ;;  %v1945_v12 = vadd.f32 %v1926_v49, %v1882_v56  ;;  %v1946_v28 = vadd.f32 %v7419_v22, %v1883_v36  ;;  %v2030_v18 = vsel %vm2027_vm14, %v7428_v37, %v7427_v46  ;;  %v2962_v36 = vmul.f32 %v7349_v25, %v4507_v14  ;;  %v7431_v48 = vld [vmem:[#allocation135_spill] sm:$0xff]  ;;  %v7432_v22 = vld [vmem:[#allocation137_spill] sm:$0xff]  ;;  %v7433_v20 = vld [vmem:[#allocation144_spill] sm:$0xff] }
 0x9ac   : > { %2991 = vrot.lane.b32.xlu1 %v2960_v3, %s7360_s10  ;;  %v1885_v3 = vadd.f32 %v1863_v53, %v1792_v42  ;;  %v7424_v42 = vld [vmem:[#allocation132_spill] sm:$0xff]  ;;  %v1949_v53 = vadd.f32 %v7421_v63, %v1886_v34  ;;  %v2048_v34 = vadd.f32 %v7425_v19, %v1941_v10  ;;  %v2032_v8 = vsel %vm2027_vm14, %v7431_v48, %v7430_v61  ;;  %v7434_v10 = vld [vmem:[#allocation142_spill] sm:$0xff] }
 0x9ad   : > { %v2028_v0 = vsel %vm2027_vm14, %v7425_v19, %v7424_v42  ;;  %v2029_v7 = vsel %vm2027_vm14, %v7424_v42, %v7426_v6  ;;  %v2033_v31 = vsel %vm2027_vm14, %v7430_v61, %v7432_v22  ;;  %v2054_v63 = vadd.f32 %v7431_v48, %v1947_v62  ;;  %v7442_v61 = vld [vmem:[#allocation149_spill] sm:$0xff]  ;;  %v7443_v22 = vld [vmem:[#allocation156_spill] sm:$0xff] }
 0x9ae   : > { %v1948_v57 = vadd.f32 %v1927_v33, %v1885_v3  ;;  %v2049_v58 = vadd.f32 %v2028_v0, %v1942_v54  ;;  %v2050_v49 = vadd.f32 %v2029_v7, %v1943_v4  ;;  %v2051_v3 = vadd.f32 %v7428_v37, %v1944_v13  ;;  %v7435_v54 = vld [vmem:[#allocation143_spill] sm:$0xff]  ;;  %v7437_v0 = vld [vmem:[#allocation146_spill] sm:$0xff] }
 0x9af   : > { %3072 = vrot.lane.b32.xlu0 %v3047_v51, %s7418_s9  ;;  %v1950_v51 = vadd.f32 %v7423_v50, %v1887_v59  ;;  %v2052_v59 = vadd.f32 %v2030_v18, %v1945_v12  ;;  %v2123_v33 = vsel %vm7090_vm15, %v7434_v10, %v7433_v20  ;;  %v2124_v42 = vsel %vm7090_vm15, %v7433_v20, %v7435_v54  ;;  %v7436_v12 = vld [vmem:[#allocation145_spill] sm:$0xff]  ;;  %v7445_v20 = vld [vmem:[#allocation155_spill] sm:$0xff] }
 0x9b0   : > { %3070 = vrot.lane.b32.xlu1 %v3046_v40, %s7418_s9  ;;  %v7429_v40 = vld [vmem:[#allocation136_spill] sm:$0xff]  ;;  %v4102_v19 = vmov 4   ;;  %v2055_v4 = vadd.f32 %v2032_v8, %v1948_v57  ;;  %v2056_v13 = vadd.f32 %v2033_v31, %v1949_v53  ;;  %v2125_v62 = vsel %vm7090_vm15, %v7437_v0, %v7436_v12  ;;  %v7440_v57 = vld [vmem:[#allocation150_spill] sm:$0xff]  ;;  %v7441_v53 = vld [vmem:[#allocation147_spill] sm:$0xff]  ;;  %v6018_v31 = vpop.permute.xlu1 %2623 }
 0x9b1   : > { %v2031_v56 = vsel %vm2027_vm14, %v7427_v46, %v7429_v40  ;;  %vm2217_vm7 = vcmask 384000   ;;  %v2143_v7 = vadd.f32 %v7434_v10, %v2048_v34  ;;  %v7439_v46 = vld [vmem:[#allocation148_spill] sm:$0xff]  ;;  %v2963_v18 = vmul.f32 %v5745_v11, %v7317_v27  ;;  %v7444_v11 = vld [vmem:[#allocation154_spill] sm:$0xff] }
 0x9b2   : > { %v2053_v25 = vadd.f32 %v2031_v56, %v1946_v28  ;;  %v7438_v28 = vld [vmem:[#allocation140_spill] sm:$0xff]  ;;  %v2126_v37 = vsel %vm7090_vm15, %v7436_v12, %v7439_v46  ;;  %v2144_v40 = vadd.f32 %v2123_v33, %v2049_v58  ;;  %v2145_v56 = vadd.f32 %v2124_v42, %v2050_v49  ;;  %v7446_v33 = vld [vmem:[#allocation157_spill] sm:$0xff] }
 0x9b3   : > { %3148 = vperm.xlu0 %4046, %v5949_v17   ;;  %v2057_v6 = vadd.f32 %v7438_v28, %v1950_v51  ;;  %v2128_v48 = vsel %vm7090_vm15, %v7440_v57, %v7442_v61  ;;  %v2146_v51 = vadd.f32 %v7437_v0, %v2051_v3  ;;  %v2147_v34 = vadd.f32 %v2125_v62, %v2052_v59  ;;  %v7450_v46 = vld [vmem:[#allocation160_spill] sm:$0xff]  ;;  %v7454_v61 = vld [vmem:[#allocation179_spill] sm:$0xff] }
 0x9b4   : > { %3074 = vrot.lane.b32.xlu1 %v5943_v5, %s7418_s9  ;;  %v2149_v8 = vadd.f32 %v7441_v53, %v2054_v63  ;;  %v2218_v58 = vsel %vm2217_vm7, %v7444_v11, %v7443_v22  ;;  %v2148_v49 = vadd.f32 %v2126_v37, %v2053_v25  ;;  %v2219_v10 = vsel %vm2217_vm7, %v7443_v22, %v7445_v20  ;;  %v7457_v20 = vld [vmem:[#allocation170_spill] sm:$0xff] }
 0x9b5   : > { %v3050_v59 = vmul.f32 %v5905_v38, %v7323_v21  ;;  %v7448_v63 = vmov 2   ;;  %v2151_v42 = vadd.f32 %v2128_v48, %v2056_v13  ;;  %v3049_v25 = vmul.f32 %v7407_v45, %v7327_v15  ;;  %v7455_v48 = vld [vmem:[#allocation177_spill] sm:$0xff] }
 0x9b6   : > { %v2238_v0 = vadd.f32 %v7444_v11, %v2143_v7  ;;  %v6034_v62 = vadd.f32 %v2218_v58, %v2144_v40  ;;  %v2221_v37 = vsel %vm2217_vm7, %v7446_v33, %v7450_v46  ;;  %v6054_v22 = vsel %vm727_vm1, %v7455_v48, %v7454_v61  ;;  %v6056_v11 = vpop.permute.xlu0 %2625  ;;  %v7456_v58 = vld [vmem:[#allocation169_spill] sm:$0xff] }
 0x9b7   : > { %2995 = vrot.lane.b32.xlu0 %v2962_v36, %s7360_s10  ;;  %v2127_v36 = vsel %vm7090_vm15, %v7441_v53, %v7440_v57  ;;  %v7452_v57 = vld [vmem:[#allocation159_spill] sm:$0xff]  ;;  %vm2312_vm15 = vcmask 375808  }
 0x9b8   : > { %3224 = vperm.xlu1 %4050, %v5949_v17   ;;  %4053 = vset.pattern.permute.xlu0 %v4102_v19  ;;  %v2150_v54 = vadd.f32 %v2127_v36, %v2055_v4  ;;  %v7449_v19 = vld [vmem:[#allocation152_spill] sm:$0xff]  ;;  %v6043_v4 = vadd.f32 %v2219_v10, %v2145_v56  ;;  %v7453_v36 = vld [vmem:[#allocation161_spill] sm:$0xff]  ;;  %v2244_v40 = vadd.f32 %v7452_v57, %v2149_v8 }
 0x9b9   : > { %v2152_v12 = vadd.f32 %v7449_v19, %v2057_v6  ;;  %v3052_v56 = vmul.f32 %v7407_v45, %v7336_v29  ;;  %v2315_v10 = vsel %vm2312_vm15, %v7457_v20, %v7456_v58 }
 0x9bb   : > { %2999 = vrot.lane.b32.xlu0 %v5786_v47, %s7360_s10  ;;  %v7447_v47 = vld [vmem:[#allocation158_spill] sm:$0xff] }
 0x9bc   : > { %2997 = vrot.lane.b32.xlu1 %v2963_v18, %s7360_s10  ;;  %v2220_v3 = vsel %vm2217_vm7, %v7447_v47, %v7446_v33  ;;  %v7451_v18 = vld [vmem:[#allocation162_spill] sm:$0xff]  ;;  %v2241_v13 = vadd.f32 %v7447_v47, %v2146_v51  ;;  %v2243_v51 = vadd.f32 %v2221_v37, %v2148_v49  ;;  %v7458_v33 = vld [vmem:[#allocation172_spill] sm:$0xff]  ;;  %v6066_v47 = vpop.permute.xlu1 %2627  ;;  %v2361_v49 = vmul.f32 %v7455_v48, %v7327_v15 }
 0x9bd   : > { %4051 = vset.pattern.permute.xlu1 %v7448_v63  ;;  %v2222_v53 = vsel %vm2217_vm7, %v7452_v57, %v7451_v18  ;;  %v2242_v6 = vadd.f32 %v2220_v3, %v2147_v34  ;;  %v2223_v7 = vsel %vm2217_vm7, %v7451_v18, %v7453_v36  ;;  %v2316_v8 = vsel %vm2312_vm15, %v7456_v58, %v7458_v33  ;;  %v7462_v37 = vld [vmem:[#allocation168_spill] sm:$0xff]  ;;  %v7464_v36 = vld [vmem:[#allocation174_spill] sm:$0xff]  ;;  %v7466_v33 = vld [vmem:[#allocation173_spill] sm:$0xff] }
 0x9be   : > { %v2245_v34 = vadd.f32 %v2222_v53, %v2150_v54  ;;  %7459 = vst [vmem:[#allocation24_spill] sm:$0xff] %v6066_v47  ;;  %v2246_v3 = vadd.f32 %v2223_v7, %v2151_v42  ;;  %v7461_v54 = vld [vmem:[#allocation166_spill] sm:$0xff]  ;;  %v7463_v42 = vld [vmem:[#allocation167_spill] sm:$0xff]  ;;  %v2362_v57 = vmul.f32 %v6054_v22, %v7323_v21  ;;  %v2336_v15 = vadd.f32 %v7457_v20, %v2241_v13  ;;  %v7468_v21 = vld [vmem:[#allocation184_spill] sm:$0xff] }
 0x9bf   : > { %3078 = vrot.lane.b32.xlu0 %v3050_v59, %s7418_s9  ;;  %v7460_v59 = vld [vmem:[#allocation164_spill] sm:$0xff]  ;;  %v6078_v46 = vadd.f32 %v7461_v54, %v2238_v0  ;;  %v6083_v18 = vsel %vm2312_vm15, %v7461_v54, %v7462_v37  ;;  %v2337_v0 = vadd.f32 %v2315_v10, %v2242_v6  ;;  %v2338_v53 = vadd.f32 %v2316_v8, %v2243_v51  ;;  %v7465_v7 = vld [vmem:[#allocation171_spill] sm:$0xff]  ;;  %v7469_v20 = vld [vmem:[#allocation186_spill] sm:$0xff] }
 0x9c0   : > { %3076 = vrot.lane.b32.xlu1 %v3049_v25, %s7418_s9  ;;  %v6069_v63 = vadd.f32 %v7460_v59, %v2152_v12  ;;  %v6072_v25 = vmul.f32 0.0, %v7454_v61  ;;  %v6088_v12 = vsel %vm2312_vm15, %v7462_v37, %v7463_v42  ;;  %v2317_v61 = vsel %vm2312_vm15, %v7465_v7, %v7464_v36  ;;  %v7467_v37 = vld [vmem:[#allocation183_spill] sm:$0xff] }
 0x9c1   : > { %v2339_v58 = vadd.f32 %v7465_v7, %v2244_v40  ;;  %v2318_v54 = vsel %vm2312_vm15, %v7464_v36, %v7466_v33  ;;  %v2445_v42 = vsel %vm818_vm11, %v7468_v21, %v7467_v37  ;;  %v3053_v13 = vmul.f32 %v5905_v38, %v4494_v52  ;;  %v7470_v33 = vld [vmem:[#allocation195_spill] sm:$0xff]  ;;  %v7471_v21 = vld [vmem:[#allocation196_spill] sm:$0xff] }
 0x9c2   : > { %v2373_v6 = vadd.f32 %v2361_v49, %v2336_v15  ;;  %v2375_v51 = vadd.f32 %v6072_v25, %v2338_v53  ;;  %v2446_v10 = vsel %vm818_vm11, %v7467_v37, %v7469_v20  ;;  %v2340_v8 = vadd.f32 %v2317_v61, %v2245_v34  ;;  %v7472_v37 = vld [vmem:[#allocation198_spill] sm:$0xff]  ;;  %v7474_v61 = vld [vmem:[#allocation208_spill] sm:$0xff] }
 0x9c3   : > { %3082 = vrot.lane.b32.xlu0 %v3052_v56, %s7418_s9  ;;  %v2374_v36 = vadd.f32 %v2362_v57, %v2337_v0  ;;  %v2364_v7 = vmul.f32 %v7455_v48, %v7336_v29  ;;  %v2538_v49 = vsel %vm913_vm4, %v7471_v21, %v7470_v33  ;;  %v3055_v34 = vmul.f32 %v7407_v45, %v4507_v14  ;;  %v7473_v0 = vld [vmem:[#allocation207_spill] sm:$0xff] }
 0x9c4   : > { %3080 = vrot.lane.b32.xlu1 %v5943_v5, %s7418_s9  ;;  %v2466_v15 = vadd.f32 %v2445_v42, %v2373_v6  ;;  %v2468_v53 = vadd.f32 %v7469_v20, %v2375_v51  ;;  %v2341_v57 = vadd.f32 %v2318_v54, %v2246_v3  ;;  %v2631_v21 = vsel %vm1008_vm9, %v7474_v61, %v7473_v0  ;;  %v7475_v51 = vld [vmem:[#allocation188_spill] sm:$0xff]  ;;  %v7476_v20 = vld [vmem:[#allocation185_spill] sm:$0xff] }
 0x9c5   : > { %v2699_v56 = vpop.permute.xlu0 %2698  ;;  %v2467_v29 = vadd.f32 %v2446_v10, %v2374_v36  ;;  %v2365_v6 = vmul.f32 %v6054_v22, %v4494_v52  ;;  %v2376_v54 = vadd.f32 %v2364_v7, %v2339_v58  ;;  %v7477_v36 = vld [vmem:[#allocation187_spill] sm:$0xff]  ;;  %v7478_v0 = vld [vmem:[#allocation200_spill] sm:$0xff]  ;;  %v7479_v61 = vld [vmem:[#allocation197_spill] sm:$0xff] }
 0x9c6   : > { %v2701_v47 = vpop.permute.xlu1 %2700  ;;  %v2559_v19 = vadd.f32 %v2538_v49, %v2466_v15  ;;  %v2561_v45 = vadd.f32 %v7472_v37, %v2468_v53  ;;  %v2378_v3 = vadd.f32 %v6072_v25, %v2341_v57  ;;  %v2448_v52 = vsel %vm818_vm11, %v7475_v51, %v7477_v36  ;;  %v7480_v53 = vld [vmem:[#allocation213_spill] sm:$0xff]  ;;  %v7481_v58 = vld [vmem:[#allocation214_spill] sm:$0xff] }
 0x9c7   : > { %v6112_v40 = vsel %vm1103_vm8, %v2699_v56, %v2701_v47  ;;  %3086 = vrot.lane.b32.xlu0 %v5943_v5, %s7418_s9  ;;  %v2539_v56 = vsel %vm913_vm4, %v7470_v33, %v7472_v37  ;;  %v2447_v33 = vsel %vm818_vm11, %v7476_v20, %v7475_v51  ;;  %v2540_v49 = vsel %vm913_vm4, %v7479_v61, %v7478_v0  ;;  %v7486_v61 = vld [vmem:[#allocation190_spill] sm:$0xff] }
 0x9c8   : > { %3084 = vrot.lane.b32.xlu1 %v3053_v13, %s7418_s9  ;;  %v2560_v10 = vadd.f32 %v2539_v56, %v2467_v29  ;;  %v2652_v15 = vadd.f32 %v2631_v21, %v2559_v19  ;;  %v2654_v37 = vadd.f32 %v7480_v53, %v2561_v45  ;;  %v2469_v57 = vadd.f32 %v2447_v33, %v2376_v54  ;;  %v7482_v21 = vld [vmem:[#allocation199_spill] sm:$0xff] }
 0x9c9   : > { %v6126_v59 = vpop.permute.xlu0 %2702  ;;  %v3056_v29 = vmul.f32 %v5905_v38, %v7317_v27  ;;  %v2377_v20 = vadd.f32 %v2365_v6, %v2340_v8  ;;  %v2471_v19 = vadd.f32 %v7477_v36, %v2378_v3  ;;  %v2334_v38 = vadd.f32 %v6083_v18, %v6034_v62  ;;  %v7483_v6 = vld [vmem:[#allocation176_spill] sm:$0xff] }
 0x9ca   : > { %v6135_v42 = vsel %vm1103_vm8, %v2701_v47, %v6126_v59  ;;  %v2705_v13 = vpop.permute.xlu1 %2704  ;;  %v2367_v47 = vmul.f32 %v7455_v48, %v4507_v14  ;;  %v2653_v7 = vadd.f32 %v7481_v58, %v2560_v10  ;;  %v2562_v33 = vadd.f32 %v2540_v49, %v2469_v57  ;;  %v7487_v62 = vld [vmem:[#allocation216_spill] sm:$0xff] }
 0x9cb   : > { %3088 = vrot.lane.b32.xlu0 %v3055_v34, %s7418_s9  ;;  %v2335_v8 = vadd.f32 %v6088_v12, %v6043_v4  ;;  %v2470_v54 = vadd.f32 %v2448_v52, %v2377_v20  ;;  %v7484_v10 = vmov 3   ;;  %v2358_v36 = vmul.f32 %v7455_v48, %v4467_v39  ;;  %v7489_v39 = vld [vmem:[#allocation202_spill] sm:$0xff] }
 0x9cc   : > { %3300 = vperm.xlu1 %4051, %v5949_v17   ;;  %v2655_v18 = vadd.f32 %v7487_v62, %v2562_v33  ;;  %v2359_v4 = vmul.f32 %v6054_v22, %v4473_v55 }
 0x9cd   : > { %v2707_v34 = vpop.permute.xlu0 %2706 }
 0x9ce   : > { %v2724_v14 = vsel %vm1103_vm8, %v2705_v13, %v2707_v34  ;;  %v2709_v56 = vpop.permute.xlu1 %2708  ;;  %v2541_v13 = vsel %vm913_vm4, %v7478_v0, %v7482_v21  ;;  %v7485_v0 = vld [vmem:[#allocation189_spill] sm:$0xff] }
 0x9cf   : > { %v6159_v28 = vadd.f32 %v2724_v14, %v2652_v15  ;;  %v2725_v51 = vsel %vm1103_vm8, %v2707_v34, %v2709_v56  ;;  %v6162_v50 = vadd.f32 %v2709_v56, %v2654_v37  ;;  %3092 = vrot.lane.b32.xlu0 %v5943_v5, %s7418_s9  ;;  %v2342_v5 = vadd.f32 %v7483_v6, %v6069_v63  ;;  %v7488_v37 = vld [vmem:[#allocation201_spill] sm:$0xff]  ;;  %v7490_v34 = vld [vmem:[#allocation215_spill] sm:$0xff]  ;;  %v7492_v14 = vld [vmem:[#allocation180_spill] sm:$0xff] }
 0x9d0   : > { %v6170_v45 = vadd.f32 %v2725_v51, %v2653_v7  ;;  %3090 = vrot.lane.b32.xlu1 %v3056_v29, %s7418_s9  ;;  %v2449_v49 = vsel %vm818_vm11, %v7486_v61, %v7485_v0  ;;  %v2564_v15 = vadd.f32 %v7482_v21, %v2471_v19  ;;  %v2563_v12 = vadd.f32 %v2541_v13, %v2470_v54  ;;  %v7491_v7 = vld [vmem:[#allocation182_spill] sm:$0xff]  ;;  %v7493_v56 = vld [vmem:[#allocation217_spill] sm:$0xff] }
 0x9d1   : > { %v2711_v3 = vpop.permute.xlu0 %2710  ;;  %4052 = vset.pattern.permute.xlu1 %v7484_v10  ;;  %v2379_v63 = vadd.f32 %v2367_v47, %v2342_v5  ;;  %v2542_v48 = vsel %vm913_vm4, %v7489_v39, %v7488_v37  ;;  %v2443_v55 = vsel %vm818_vm11, %v7492_v14, %v7491_v7  ;;  %v2370_v51 = vadd.f32 %v2358_v36, %v6078_v46  ;;  %v7494_v54 = vld [vmem:[#allocation194_spill] sm:$0xff]  ;;  %v7500_v14 = vld [vmem:[#allocation21_spill] sm:$0xff] }
 0x9d2   : > { %v2713_v53 = vpop.permute.xlu1 %2712  ;;  %v2657_v57 = vadd.f32 %v7490_v34, %v2564_v15  ;;  %v2656_v29 = vadd.f32 %v7493_v56, %v2563_v12  ;;  %v2635_v19 = vsel %vm1008_vm9, %v6018_v31, %v6056_v11  ;;  %v2372_v5 = vadd.f32 %v6072_v25, %v2335_v8  ;;  %v7496_v31 = vld [vmem:[#allocation181_spill] sm:$0xff]  ;;  %v7498_v12 = vld [vmem:[#allocation204_spill] sm:$0xff] }
 0x9d3   : > { %v2726_v52 = vsel %vm1103_vm8, %v2711_v3, %v2713_v53  ;;  %3452 = vperm.xlu0 %4053, %v5949_v17   ;;  %v2472_v47 = vadd.f32 %v2449_v49, %v2379_v63  ;;  %v7495_v3 = vld [vmem:[#allocation192_spill] sm:$0xff]  ;;  %v4103_v15 = vmov 7   ;;  %v849_v46 = vadd.f32 %v5585_v1, %v5557_v44  ;;  %v7497_v63 = vld [vmem:[#allocation206_spill] sm:$0xff]  ;;  %v7499_v44 = vld [vmem:[#allocation193_spill] sm:$0xff] }
 0x9d4   : > { %v6195_v58 = vadd.f32 %v2726_v52, %v2655_v18  ;;  %3376 = vperm.xlu1 %4052, %v5949_v17   ;;  %v2536_v10 = vsel %vm913_vm4, %v7495_v3, %v7494_v54  ;;  %v2444_v36 = vsel %vm818_vm11, %v7491_v7, %v7496_v31  ;;  %v2463_v62 = vadd.f32 %v2443_v55, %v2370_v51 }
 0x9d5   : > { %v2715_v20 = vpop.permute.xlu0 %2714  ;;  %v2565_v61 = vadd.f32 %v2542_v48, %v2472_v47  ;;  %v4104_v18 = vmov 5   ;;  %v2465_v8 = vadd.f32 %v7496_v31, %v2372_v5  ;;  %v2629_v52 = vsel %vm1008_vm9, %v7498_v12, %v7497_v63  ;;  %v7505_v12 = vld [vmem:[#allocation37_spill] sm:$0xff] }
 0x9d6   : > { %v2727_v21 = vsel %vm1103_vm8, %v2713_v53, %v2715_v20  ;;  %v6207_v13 = vadd.f32 %v2715_v20, %v2657_v57  ;;  %v2717_v33 = vpop.permute.xlu1 %2716  ;;  %v2371_v53 = vadd.f32 %v2359_v4, %v2334_v38  ;;  %v2537_v1 = vsel %vm913_vm4, %v7494_v54, %v7499_v44  ;;  %v7501_v20 = vld [vmem:[#allocation205_spill] sm:$0xff] }
 0x9d7   : > { %v6213_v49 = vadd.f32 %v2727_v21, %v2656_v29  ;;  %4056 = vset.pattern.permute.xlu0 %v4103_v15  ;;  %v2658_v39 = vadd.f32 %v2635_v19, %v2565_v61  ;;  %v2556_v34 = vadd.f32 %v2536_v10, %v2463_v62  ;;  %v921_v38 = vsel %vm913_vm4, %v4661_v60, %v7500_v14  ;;  %v7503_v60 = vld [vmem:[#allocation22_spill] sm:$0xff] }
 0x9d8   : > { %4054 = vset.pattern.permute.xlu1 %v4104_v18  ;;  %3680 = vperm.xlu0 %4056, %v5949_v17   ;;  %v2464_v4 = vadd.f32 %v2444_v36, %v2371_v53  ;;  %v945_v56 = vadd.f32 %v7500_v14, %v5570_v24  ;;  %v2558_v29 = vadd.f32 %v7499_v44, %v2465_v8  ;;  %v7502_v21 = vmov 0   ;;  %v7504_v36 = vld [vmem:[#allocation27_spill] sm:$0xff] }
 0x9d9   : > { %v2719_v48 = vpop.permute.xlu0 %2718  ;;  %3528 = vperm.xlu1 %4054, %v5949_v17   ;;  %v2630_v51 = vsel %vm1008_vm9, %v7497_v63, %v7501_v20  ;;  %v2649_v19 = vadd.f32 %v2629_v52, %v2556_v34  ;;  %v4105_v3 = vmov 6   ;;  %v944_v10 = vadd.f32 %v921_v38, %v849_v46 }
 0x9da   : > { %v2728_v57 = vsel %vm1103_vm8, %v2717_v33, %v2719_v48  ;;  %v6230_v7 = vpop.permute.xlu1 %2720  ;;  %v1016_v33 = vsel %vm1008_vm9, %v4677_v32, %v7503_v60  ;;  %v2557_v5 = vadd.f32 %v2537_v1, %v2464_v4  ;;  %v1040_v24 = vadd.f32 %v7503_v60, %v945_v56 }
 0x9db   : > { %v6235_v55 = vadd.f32 %v2728_v57, %v2658_v39  ;;  %v6239_v47 = vsel %vm1103_vm8, %v2719_v48, %v6230_v7  ;;  %v2651_v61 = vadd.f32 %v7501_v20, %v2558_v29  ;;  %v2742_v15 = vadd.f32 %v6112_v40, %v2649_v19  ;;  %v3145_v40 = vld [vmem:[%s6907_s6] sm:$0xf] }
 0x9dc   : > { %4058 = vset.pattern.permute.xlu0 %v7502_v21  ;;  %v1111_v62 = vsel %vm1103_vm8, %v7318_v30, %v7504_v36  ;;  %v2650_v18 = vadd.f32 %v2630_v51, %v2557_v5  ;;  %v1039_v8 = vadd.f32 %v1016_v33, %v944_v10  ;;  %v1135_v53 = vadd.f32 %v7504_v36, %v1040_v24  ;;  %v7509_v10 = vld [vmem:[#allocation85_spill] sm:$0xff] }
 0x9dd   : > { %v2792_v54 = vpop.permute.xlu0 %2791  ;;  %4055 = vset.pattern.permute.xlu1 %v4105_v3  ;;  %v2744_v46 = vadd.f32 %v6126_v59, %v2651_v61  ;;  %v7506_v59 = vld [vmem:[#allocation49_spill] sm:$0xff]  ;;  %v1584_v24 = vsel %vm1050_vm3, %v7379_v2, %v7509_v10  ;;  %vm3860_vm3 = vcmask 1043456  }
 0x9de   : > { %3604 = vperm.xlu1 %4055, %v5949_v17   ;;  %v2794_v31 = vpop.permute.xlu1 %2793  ;;  %v1206_v17 = vsel %vm1198_vm5, %v7331_v16, %v7505_v12  ;;  %v2743_v52 = vadd.f32 %v6135_v42, %v2650_v18  ;;  %v1134_v39 = vadd.f32 %v1111_v62, %v1039_v8  ;;  %v1230_v48 = vadd.f32 %v7505_v12, %v1135_v53  ;;  %v7507_v42 = vld [vmem:[#allocation61_spill] sm:$0xff] }
 0x9df   : > { %v2815_v32 = vsel %vm1198_vm5, %v2792_v54, %v2794_v31  ;;  %v1301_v57 = vsel %vm1293_vm10, %v7343_v23, %v7506_v59  ;;  %v1396_v4 = vsel %vm1388_vm12, %v7356_v26, %v7507_v42 }
 0x9e0   : > { %v2835_v63 = vadd.f32 %v2815_v32, %v2742_v15  ;;  %v1229_v38 = vadd.f32 %v1206_v17, %v1134_v39  ;;  %v1325_v16 = vadd.f32 %v7506_v59, %v1230_v48  ;;  %v7511_v32 = vld [vmem:[#allocation109_spill] sm:$0xff]  ;;  %v7512_v17 = vld [vmem:[#allocation122_spill] sm:$0xff]  ;;  %v7514_v48 = vld [vmem:[#allocation127_spill] sm:$0xff] }
 0x9e1   : > { %v2796_v30 = vpop.permute.xlu0 %2795  ;;  %v1772_v2 = vsel %vm1764_vm13, %v7401_v35, %v7511_v32  ;;  %v7513_v39 = vld [vmem:[#allocation129_spill] sm:$0xff] }
 0x9e2   : > { %v2816_v44 = vsel %vm1198_vm5, %v2794_v31, %v2796_v30  ;;  %v2837_v1 = vadd.f32 %v2796_v30, %v2744_v46  ;;  %v2798_v34 = vpop.permute.xlu1 %2797  ;;  %4057 = vset.pattern.permute.xlu1 %v7502_v21  ;;  %v1324_v29 = vadd.f32 %v1301_v57, %v1229_v38  ;;  %v1420_v20 = vadd.f32 %v7507_v42, %v1325_v16  ;;  %v7508_v21 = vld [vmem:[#allocation73_spill] sm:$0xff]  ;;  %v7516_v38 = vld [vmem:[#allocation139_spill] sm:$0xff] }
 0x9e3   : > { %v2836_v14 = vadd.f32 %v2816_v44, %v2743_v52  ;;  %3757 = vperm.xlu1 %4057, %v3145_v40   ;;  %v1491_v23 = vsel %vm1483_vm6, %v7368_v43, %v7508_v21  ;;  %v7510_v31 = vld [vmem:[#allocation97_spill] sm:$0xff]  ;;  %v1865_v52 = vsel %vm765_vm0, %v7414_v9, %v7512_v17  ;;  %v1928_v44 = vsel %vm727_vm1, %v7514_v48, %v7513_v39 }
 0x9e4   : > { %v1419_v26 = vadd.f32 %v1396_v4, %v1324_v29  ;;  %v1515_v54 = vadd.f32 %v7508_v21, %v1420_v20  ;;  %v7515_v57 = vld [vmem:[#allocation141_spill] sm:$0xff]  ;;  %v7519_v21 = vld [vmem:[#allocation151_spill] sm:$0xff]  ;;  %vm7520_vm0 = vcmask 392192  }
 0x9e5   : > { %v2800_v56 = vpop.permute.xlu0 %2799  ;;  %v2035_v16 = vsel %vm2027_vm14, %v7516_v38, %v7515_v57 }
 0x9e6   : > { %v2817_v51 = vsel %vm1198_vm5, %v2798_v34, %v2800_v56  ;;  %v2802_v19 = vpop.permute.xlu1 %2801  ;;  %v1514_v43 = vadd.f32 %v1491_v23, %v1419_v26 }
 0x9e7   : > { %v6284_v60 = vadd.f32 %v2817_v51, %v6159_v28  ;;  %v2818_v33 = vsel %vm1198_vm5, %v2800_v56, %v2802_v19  ;;  %v6288_v5 = vadd.f32 %v2802_v19, %v6162_v50  ;;  %v1608_v28 = vadd.f32 %v7509_v10, %v1515_v54  ;;  %v7518_v19 = vld [vmem:[#allocation153_spill] sm:$0xff]  ;;  %v7521_v54 = vld [vmem:[#allocation152_spill] sm:$0xff] }
 0x9e8   : > { %v6292_v3 = vadd.f32 %v2818_v33, %v6170_v45  ;;  %v1677_v50 = vsel %vm955_vm2, %v7390_v41, %v7510_v31  ;;  %v1607_v62 = vadd.f32 %v1584_v24, %v1514_v43  ;;  %v2130_v23 = vsel %vm7520_vm0, %v7519_v21, %v7518_v19  ;;  %vm7522_vm2 = vmmov %vm7520_vm0 }
 0x9e9   : > { %v2804_v61 = vpop.permute.xlu0 %2803  ;;  %v1701_v18 = vadd.f32 %v7510_v31, %v1608_v28  ;;  %v2129_v10 = vsel %vm7522_vm2, %v7521_v54, %v7519_v21 }
 0x9ea   : > { %v2806_v15 = vpop.permute.xlu1 %2805  ;;  %v1700_v53 = vadd.f32 %v1677_v50, %v1607_v62 }
 0x9eb   : > { %v2819_v36 = vsel %vm1198_vm5, %v2804_v61, %v2806_v15  ;;  %v1796_v46 = vadd.f32 %v7511_v32, %v1701_v18  ;;  %v7523_v61 = vld [vmem:[#allocation165_spill] sm:$0xff] }
 0x9ec   : > { %v6304_v45 = vadd.f32 %v2819_v36, %v6195_v58  ;;  %v1795_v30 = vadd.f32 %v1772_v2, %v1700_v53  ;;  %v7526_v36 = vld [vmem:[#allocation178_spill] sm:$0xff] }
 0x9ed   : > { %v2808_v8 = vpop.permute.xlu0 %2807  ;;  %v1889_v35 = vadd.f32 %v7512_v17, %v1796_v46 }
 0x9ee   : > { %v2820_v40 = vsel %vm1198_vm5, %v2806_v15, %v2808_v8  ;;  %v6312_v41 = vadd.f32 %v2808_v8, %v6207_v13  ;;  %v2885_v12 = vpop.permute.xlu1 %2884  ;;  %v1888_v59 = vadd.f32 %v1865_v52, %v1795_v30  ;;  %v7525_v15 = vld [vmem:[#allocation164_spill] sm:$0xff]  ;;  %v2368_v8 = vmul.f32 %v6054_v22, %v7317_v27  ;;  %v7528_v30 = vld [vmem:[#allocation191_spill] sm:$0xff] }
 0x9ef   : > { %v6318_v58 = vadd.f32 %v2820_v40, %v6213_v49  ;;  %v1952_v13 = vadd.f32 %v7513_v39, %v1889_v35  ;;  %v7517_v49 = vld [vmem:[#allocation140_spill] sm:$0xff]  ;;  %v2450_v35 = vsel %vm818_vm11, %v7485_v0, %v7528_v30 }
 0x9f0   : > { %v2034_v4 = vsel %vm2027_vm14, %v7517_v49, %v7516_v38  ;;  %v1951_v51 = vadd.f32 %v1928_v44, %v1888_v59  ;;  %v7529_v44 = vld [vmem:[#allocation203_spill] sm:$0xff]  ;;  %v7530_v59 = vld [vmem:[#allocation24_spill] sm:$0xff] }
 0x9f1   : > { %v2887_v34 = vpop.permute.xlu0 %2886  ;;  %v2059_v26 = vadd.f32 %v2035_v16, %v1952_v13  ;;  %v2543_v27 = vsel %vm913_vm4, %v7488_v37, %v7529_v44 }
 0x9f2   : > { %v2908_v9 = vsel %vm1293_vm10, %v2885_v12, %v2887_v34  ;;  %v2889_v42 = vpop.permute.xlu1 %2888  ;;  %v2058_v24 = vadd.f32 %v2034_v4, %v1951_v51 }
 0x9f3   : > { %v6332_v56 = vadd.f32 %v2908_v9, %v2835_v63  ;;  %v2909_v29 = vsel %vm1293_vm10, %v2887_v34, %v2889_v42  ;;  %v6335_v20 = vadd.f32 %v2889_v42, %v2837_v1  ;;  %v7524_v63 = vld [vmem:[#allocation163_spill] sm:$0xff]  ;;  %v2154_v1 = vadd.f32 %v2130_v23, %v2059_v26 }
 0x9f4   : > { %v6340_v33 = vadd.f32 %v2909_v29, %v2836_v14  ;;  %v2225_v43 = vsel %vm2217_vm7, %v7524_v63, %v7523_v61  ;;  %v2224_v31 = vsel %vm2217_vm7, %v7525_v15, %v7524_v63  ;;  %v2153_v50 = vadd.f32 %v2129_v10, %v2058_v24  ;;  %v7527_v14 = vld [vmem:[#allocation175_spill] sm:$0xff] }
 0x9f5   : > { %v2320_v62 = vsel %vm2312_vm15, %v7527_v14, %v7526_v36  ;;  %v2249_v18 = vadd.f32 %v2225_v43, %v2154_v1  ;;  %v2319_v32 = vsel %vm2312_vm15, %v7483_v6, %v7527_v14  ;;  %vm7550_vm7 = vcmask 596992  }
 0x9f6   : > { %v2810_v28 = vpop.permute.xlu1 %2809  ;;  %v2248_v2 = vadd.f32 %v2224_v31, %v2153_v50  ;;  %vm7551_vm8 = vmmov %vm7550_vm7 }
 0x9f7   : > { %v2344_v46 = vadd.f32 %v2320_v62, %v2249_v18  ;;  %vm7553_vm11 = vmmov %vm7550_vm7 }
 0x9f8   : > { %v2343_v12 = vadd.f32 %v2319_v32, %v2248_v2  ;;  %vm7554_vm1 = vmmov %vm7550_vm7 }
 0x9f9   : > { %v2381_v52 = vadd.f32 %v6072_v25, %v2344_v46  ;;  %vm7555_vm4 = vmmov %vm7554_vm1 }
 0x9fa   : > { %v2812_v53 = vpop.permute.xlu1 %2811  ;;  %v2380_v39 = vadd.f32 %v2368_v8, %v2343_v12 }
 0x9fb   : > { %v2821_v40 = vsel %vm1198_vm5, %v2810_v28, %v2812_v53  ;;  %v2474_v6 = vadd.f32 %v7528_v30, %v2381_v52 }
 0x9fc   : > { %v2844_v17 = vadd.f32 %v2821_v40, %v6235_v55  ;;  %v2473_v22 = vadd.f32 %v2450_v35, %v2380_v39  ;;  %v2636_v55 = vsel %vm1008_vm9, %v6056_v11, %v7530_v59  ;;  %vm7552_vm9 = vmmov %vm7550_vm7 }
 0x9fd   : > { %v2567_v34 = vadd.f32 %v7529_v44, %v2474_v6 }
 0x9fe   : > { %v2891_v48 = vpop.permute.xlu1 %2890  ;;  %v2566_v25 = vadd.f32 %v2543_v27, %v2473_v22 }
 0x9ff   : > { %v2660_v0 = vadd.f32 %v7530_v59, %v2567_v34 }
 0xa00   : > { %v2659_v16 = vadd.f32 %v2636_v55, %v2566_v25 }
 0xa01   : > { %v2753_v9 = vadd.f32 %v6230_v7, %v2660_v0 }
 0xa02   : > { %v6373_v13 = vpop.permute.xlu0 %3129  ;;  %v2895_v57 = vpop.permute.xlu1 %2894  ;;  %v2752_v37 = vadd.f32 %v6239_v47, %v2659_v16 }
 0xa03   : > { %v2933_v38 = vadd.f32 %v2895_v57, %v6288_v5 }
 0xa06   : > { %v2814_v42 = vpop.permute.xlu0 %2813  ;;  %v2899_v49 = vpop.permute.xlu1 %2898 }
 0xa07   : > { %v2822_v4 = vsel %vm1198_vm5, %v2812_v53, %v2814_v42  ;;  %v2846_v29 = vadd.f32 %v2814_v42, %v2753_v9  ;;  %vm7556_vm5 = vmmov %vm7554_vm1 }
 0xa08   : > { %v2845_v51 = vadd.f32 %v2822_v4, %v2752_v37 }
 0xa0a   : > { %v2893_v11 = vpop.permute.xlu0 %2892  ;;  %v2978_v19 = vpop.permute.xlu1 %2977 }
 0xa0b   : > { %v2910_v39 = vsel %vm1293_vm10, %v2891_v48, %v2893_v11  ;;  %v2911_v6 = vsel %vm1293_vm10, %v2893_v11, %v2895_v57  ;;  %v7532_v11 = vld [vmem:[#allocation3_spill] sm:$0xff] }
 0xa0c   : > { %v2931_v25 = vadd.f32 %v2910_v39, %v6284_v60  ;;  %v2932_v48 = vadd.f32 %v2911_v6, %v6292_v3 }
 0xa0e   : > { %v2897_v21 = vpop.permute.xlu0 %2896  ;;  %v2982_v23 = vpop.permute.xlu1 %2981 }
 0xa0f   : > { %v2912_v26 = vsel %vm1293_vm10, %v2897_v21, %v2899_v49  ;;  %v3023_v53 = vadd.f32 %v2982_v23, %v6335_v20  ;;  %v7533_v21 = vld [vmem:[#allocation5_spill] sm:$0xff] }
 0xa10   : > { %v2934_v54 = vadd.f32 %v2912_v26, %v6304_v45  ;;  %v7534_v26 = vld [vmem:[#allocation8_spill] sm:$0xff] }
 0xa12   : > { %v2901_v5 = vpop.permute.xlu0 %2900  ;;  %v2905_v10 = vpop.permute.xlu1 %2904 }
 0xa13   : > { %v2913_v7 = vsel %vm1293_vm10, %v2899_v49, %v2901_v5  ;;  %v2936_v47 = vadd.f32 %v2901_v5, %v6312_v41  ;;  %v7535_v5 = vld [vmem:[#allocation9_spill] sm:$0xff] }
 0xa14   : > { %v2935_v24 = vadd.f32 %v2913_v7, %v6318_v58 }
 0xa16   : > { %v2980_v61 = vpop.permute.xlu0 %2979  ;;  %v2984_v63 = vpop.permute.xlu1 %2983 }
 0xa17   : > { %v3001_v2 = vsel %vm1388_vm12, %v2978_v19, %v2980_v61  ;;  %v3002_v40 = vsel %vm1388_vm12, %v2980_v61, %v2982_v23  ;;  %v7537_v61 = vld [vmem:[#allocation6_spill] sm:$0xff] }
 0xa18   : > { %v3021_v12 = vadd.f32 %v3001_v2, %v6332_v56  ;;  %v3022_v44 = vadd.f32 %v3002_v40, %v6340_v33 }
 0xa1a   : > { %v2903_v43 = vpop.permute.xlu0 %2902  ;;  %v2988_v15 = vpop.permute.xlu1 %2987 }
 0xa1b   : > { %v2914_v28 = vsel %vm1293_vm10, %v2903_v43, %v2905_v10  ;;  %v3026_v0 = vadd.f32 %v2988_v15, %v2933_v38  ;;  %v7538_v43 = vld [vmem:[#allocation10_spill] sm:$0xff] }
 0xa1c   : > { %v6386_v1 = vadd.f32 %v2914_v28, %v2844_v17 }
 0xa1e   : > { %v2907_v31 = vpop.permute.xlu0 %2906  ;;  %v2992_v62 = vpop.permute.xlu1 %2991 }
 0xa1f   : > { %v2915_v50 = vsel %vm1293_vm10, %v2905_v10, %v2907_v31  ;;  %v6389_v45 = vadd.f32 %v2907_v31, %v2846_v29  ;;  %vm7557_vm10 = vmmov %vm7554_vm1 }
 0xa20   : > { %v6391_v36 = vadd.f32 %v2915_v50, %v2845_v51  ;;  %v7531_v51 = vld [vmem:[#allocation7_spill] sm:$0xff] }
 0xa22   : > { %v2986_v14 = vpop.permute.xlu0 %2985  ;;  %v3071_v18 = vpop.permute.xlu1 %3070 }
 0xa23   : > { %v3003_v20 = vsel %vm1388_vm12, %v2984_v63, %v2986_v14  ;;  %v3004_v22 = vsel %vm1388_vm12, %v2986_v14, %v2988_v15 }
 0xa24   : > { %v3024_v16 = vadd.f32 %v3003_v20, %v2931_v25  ;;  %v3025_v9 = vadd.f32 %v3004_v22, %v2932_v48 }
 0xa26   : > { %v2990_v41 = vpop.permute.xlu0 %2989  ;;  %v3075_v8 = vpop.permute.xlu1 %3074 }
 0xa27   : > { %v3116_v52 = vadd.f32 %v3075_v8, %v3023_v53  ;;  %v3005_v34 = vsel %vm1388_vm12, %v2990_v41, %v2992_v62 }
 0xa28   : > { %v6418_v37 = vadd.f32 %v3005_v34, %v2934_v54 }
 0xa29   : > { %v6408_v56 = vadd.f32 %v6373_v13, %v3116_v52 }
 0xa2a   : > { %v2994_v58 = vpop.permute.xlu0 %2993 }
 0xa2b   : > { %v3006_v57 = vsel %vm1388_vm12, %v2992_v62, %v2994_v58  ;;  %v3029_v42 = vadd.f32 %v2994_v58, %v2936_v47  ;;  %v3162_v3 = vrot.slane %v6408_v56, %v7531_v51  ;;  %v3238_v19 = vrot.slane %v6408_v56, %v7532_v11  ;;  %v7536_v47 = vld [vmem:[#allocation4_spill] sm:$0xff] }
 0xa2c   : > { %v6420_v4 = vadd.f32 %v3006_v57, %v2935_v24  ;;  %v3314_v23 = vrot.slane %v6408_v56, %v7533_v21  ;;  %v3390_v54 = vrot.slane %v6408_v56, %v7534_v26  ;;  %v3466_v10 = vrot.slane %v6408_v56, %v7535_v5 }
 0xa2e   : > { %v3073_v32 = vpop.permute.xlu0 %3072 }
 0xa2f   : > { %v3094_v46 = vsel %vm1483_vm6, %v3071_v18, %v3073_v32  ;;  %v3095_v30 = vsel %vm1483_vm6, %v3073_v32, %v3075_v8 }
 0xa30   : > { %v3114_v35 = vadd.f32 %v3094_v46, %v3021_v12  ;;  %v3115_v59 = vadd.f32 %v3095_v30, %v3022_v44 }
 0xa32   : > { %v6398_v17 = vpop.permute.xlu0 %3148  ;;  %v6416_v33 = vadd.f32 %v6373_v13, %v3114_v35  ;;  %v6423_v29 = vadd.f32 %v6373_v13, %v3115_v59 }
 0xa33   : > { %v3201_v7 = vmul.f32 %v3162_v3, %v6398_v17 }
 0xa34   : > { %v3154_v38 = vrot.slane %v6416_v33, %v7531_v51  ;;  %v3230_v31 = vrot.slane %v6416_v33, %v7532_v11  ;;  %v3306_v50 = vrot.slane %v6416_v33, %v7533_v21  ;;  %v3382_v14 = vrot.slane %v6416_v33, %v7534_v26 }
 0xa35   : > { %v3458_v62 = vrot.slane %v6416_v33, %v7535_v5  ;;  %v3534_v18 = vrot.slane %v6416_v33, %v7536_v47  ;;  %v3158_v32 = vrot.slane %v6423_v29, %v7531_v51  ;;  %v3234_v2 = vrot.slane %v6423_v29, %v7532_v11 }
 0xa36   : > { %v2996_v27 = vpop.permute.xlu0 %2995  ;;  %v3199_v53 = vmul.f32 %v3154_v38, %v6398_v17  ;;  %v3686_v40 = vrot.slane %v6416_v33, %v7538_v43  ;;  %v3310_v30 = vrot.slane %v6423_v29, %v7533_v21  ;;  %v3386_v35 = vrot.slane %v6423_v29, %v7534_v26 }
 0xa37   : > { %v6410_v55 = vpop.permute.xlu1 %3224  ;;  %v3462_v6 = vrot.slane %v6423_v29, %v7535_v5  ;;  %v3538_v44 = vrot.slane %v6423_v29, %v7536_v47  ;;  %v3200_v57 = vmul.f32 %v3158_v32, %v6398_v17 }
 0xa38   : > { %v3275_v46 = vmul.f32 %v3230_v31, %v6410_v55  ;;  %v3276_v52 = vmul.f32 %v3234_v2, %v6410_v55  ;;  %v3277_v22 = vmul.f32 %v3238_v19, %v6410_v55 }
 0xa3a   : > { %v3000_v49 = vpop.permute.xlu0 %2999  ;;  %v3287_v38 = vadd.f32 %v3275_v46, %v3199_v53  ;;  %v3288_v2 = vadd.f32 %v3276_v52, %v3200_v57 }
 0xa3b   : > { %v2998_v60 = vpop.permute.xlu1 %2997  ;;  %v3032_v19 = vadd.f32 %v3000_v49, %v6389_v45 }
 0xa3c   : > { %v3007_v34 = vsel %vm1388_vm12, %v2996_v27, %v2998_v60  ;;  %v3008_v59 = vsel %vm1388_vm12, %v2998_v60, %v3000_v49 }
 0xa3d   : > { %v3031_v32 = vadd.f32 %v3008_v59, %v6391_v36 }
 0xa3e   : > { %v3079_v15 = vpop.permute.xlu0 %3078 }
 0xa3f   : > { %v3077_v41 = vpop.permute.xlu1 %3076 }
 0xa40   : > { %v3096_v8 = vsel %vm1483_vm6, %v3077_v41, %v3079_v15 }
 0xa41   : > { %v3117_v12 = vadd.f32 %v3096_v8, %v3024_v16  ;;  %v3030_v8 = vadd.f32 %v3007_v34, %v6386_v1 }
 0xa42   : > { %v3083_v39 = vpop.permute.xlu0 %3082 }
 0xa43   : > { %v6480_v25 = vadd.f32 %v6373_v13, %v3117_v12  ;;  %v3081_v48 = vpop.permute.xlu1 %3080 }
 0xa44   : > { %v3097_v16 = vsel %vm1483_vm6, %v3079_v15, %v3081_v48  ;;  %v3119_v3 = vadd.f32 %v3081_v48, %v3026_v0  ;;  %v3289_v0 = vadd.f32 %v3277_v22, %v3201_v7 }
 0xa45   : > { %v3118_v41 = vadd.f32 %v3097_v16, %v3025_v9  ;;  %v3166_v27 = vrot.slane %v6480_v25, %v7531_v51  ;;  %v3242_v60 = vrot.slane %v6480_v25, %v7532_v11  ;;  %v3318_v36 = vrot.slane %v6480_v25, %v7533_v21 }
 0xa46   : > { %v3087_v15 = vpop.permute.xlu0 %3086  ;;  %v6499_v48 = vadd.f32 %v6373_v13, %v3119_v3  ;;  %v3470_v7 = vrot.slane %v6480_v25, %v7535_v5 }
 0xa47   : > { %v6494_v53 = vadd.f32 %v6373_v13, %v3118_v41  ;;  %v3122_v46 = vadd.f32 %v3087_v15, %v3029_v42  ;;  %v3085_v9 = vpop.permute.xlu1 %3084  ;;  %v3202_v12 = vmul.f32 %v3166_v27, %v6398_v17  ;;  %v3278_v52 = vmul.f32 %v3242_v60, %v6410_v55 }
 0xa48   : > { %v3098_v45 = vsel %vm1483_vm6, %v3083_v39, %v3085_v9  ;;  %v3099_v1 = vsel %vm1483_vm6, %v3085_v9, %v3087_v15  ;;  %v3394_v42 = vrot.slane %v6480_v25, %v7534_v26  ;;  %v3250_v22 = vrot.slane %v6499_v48, %v7532_v11 }
 0xa49   : > { %v3120_v49 = vadd.f32 %v3098_v45, %v6418_v37  ;;  %v3170_v59 = vrot.slane %v6494_v53, %v7531_v51  ;;  %v3246_v57 = vrot.slane %v6494_v53, %v7532_v11  ;;  %v3322_v37 = vrot.slane %v6494_v53, %v7533_v21 }
 0xa4a   : > { %v3089_v34 = vpop.permute.xlu0 %3088  ;;  %v6521_v16 = vadd.f32 %v6373_v13, %v3122_v46  ;;  %v6524_v3 = vadd.f32 %v3099_v1, %v6420_v4  ;;  %v3290_v27 = vadd.f32 %v3278_v52, %v3202_v12  ;;  %v3398_v46 = vrot.slane %v6494_v53, %v7534_v26 }
 0xa4b   : > { %v6526_v41 = vpop.permute.xlu1 %3300  ;;  %v6539_v4 = vadd.f32 %v6373_v13, %v3120_v49  ;;  %v3203_v52 = vmul.f32 %v3170_v59, %v6398_v17  ;;  %v3279_v1 = vmul.f32 %v3246_v57, %v6410_v55  ;;  %v3474_v39 = vrot.slane %v6494_v53, %v7535_v5 }
 0xa4c   : > { %v3351_v15 = vmul.f32 %v3306_v50, %v6526_v41  ;;  %v3352_v9 = vmul.f32 %v3310_v30, %v6526_v41  ;;  %v3353_v45 = vmul.f32 %v3314_v23, %v6526_v41  ;;  %v3354_v12 = vmul.f32 %v3318_v36, %v6526_v41 }
 0xa4d   : > { %v3355_v30 = vmul.f32 %v3322_v37, %v6526_v41  ;;  %v3550_v23 = vrot.slane %v6494_v53, %v7536_v47  ;;  %v3291_v36 = vadd.f32 %v3279_v1, %v3203_v52  ;;  %v3174_v59 = vrot.slane %v6499_v48, %v7531_v51 }
 0xa4e   : > { %v3093_v50 = vpop.permute.xlu0 %3092  ;;  %v3363_v20 = vadd.f32 %v3351_v15, %v3287_v38  ;;  %v3364_v58 = vadd.f32 %v3352_v9, %v3288_v2  ;;  %v3365_v60 = vadd.f32 %v3353_v45, %v3289_v0  ;;  %v3366_v31 = vadd.f32 %v3354_v12, %v3290_v27 }
 0xa4f   : > { %v3091_v49 = vpop.permute.xlu1 %3090  ;;  %v6557_v28 = vadd.f32 %v3093_v50, %v3032_v19  ;;  %v3702_v63 = vrot.slane %v6494_v53, %v7538_v43  ;;  %v3326_v38 = vrot.slane %v6499_v48, %v7533_v21  ;;  %v3367_v9 = vadd.f32 %v3355_v30, %v3291_v36 }
 0xa50   : > { %v3100_v57 = vsel %vm1483_vm6, %v3089_v34, %v3091_v49  ;;  %v3101_v37 = vsel %vm1483_vm6, %v3091_v49, %v3093_v50  ;;  %v3204_v0 = vmul.f32 %v3174_v59, %v6398_v17  ;;  %v3280_v27 = vmul.f32 %v3250_v22, %v6410_v55 }
 0xa51   : > { %v6563_v2 = vadd.f32 %v3100_v57, %v3030_v8  ;;  %v6565_v15 = vadd.f32 %v3101_v37, %v3031_v32  ;;  %v3356_v12 = vmul.f32 %v3326_v38, %v6526_v41  ;;  %v3402_v8 = vrot.slane %v6499_v48, %v7534_v26 }
 0xa52   : > { %v6567_v34 = vpop.permute.xlu0 %3452  ;;  %v3292_v37 = vadd.f32 %v3280_v27, %v3204_v0 }
 0xa53   : > { %v6570_v45 = vpop.permute.xlu1 %3376  ;;  %v3503_v19 = vmul.f32 %v3458_v62, %v6567_v34  ;;  %v3504_v62 = vmul.f32 %v3462_v6, %v6567_v34  ;;  %v3506_v50 = vmul.f32 %v3470_v7, %v6567_v34  ;;  %v3507_v6 = vmul.f32 %v3474_v39, %v6567_v34 }
 0xa54   : > { %v3427_v32 = vmul.f32 %v3382_v14, %v6570_v45  ;;  %v3428_v52 = vmul.f32 %v3386_v35, %v6570_v45  ;;  %v3429_v22 = vmul.f32 %v3390_v54, %v6570_v45  ;;  %v3505_v14 = vmul.f32 %v3466_v10, %v6567_v34 }
 0xa55   : > { %v3430_v1 = vmul.f32 %v3394_v42, %v6570_v45  ;;  %v3431_v35 = vmul.f32 %v3398_v46, %v6570_v45  ;;  %v3432_v38 = vmul.f32 %v3402_v8, %v6570_v45  ;;  %v7540_v46 = vrot.slane %v6423_v29, %v7538_v43 }
 0xa56   : > { %v3439_v30 = vadd.f32 %v3427_v32, %v3363_v20  ;;  %v3440_v49 = vadd.f32 %v3428_v52, %v3364_v58  ;;  %v3441_v36 = vadd.f32 %v3429_v22, %v3365_v60  ;;  %v3478_v58 = vrot.slane %v6499_v48, %v7535_v5 }
 0xa57   : > { %v6604_v59 = vpop.permute.xlu0 %3680  ;;  %v3442_v57 = vadd.f32 %v3430_v1, %v3366_v31  ;;  %v3443_v54 = vadd.f32 %v3431_v35, %v3367_v9  ;;  %v7539_v60 = vrot.slane %v6408_v56, %v7536_v47  ;;  %v7543_v52 = vrot.slane %v6480_v25, %v7538_v43 }
 0xa58   : > { %v6607_v24 = vpop.permute.xlu1 %3528  ;;  %v3515_v10 = vadd.f32 %v3503_v19, %v3439_v30  ;;  %v3731_v42 = vmul.f32 %v3686_v40, %v6604_v59  ;;  %v3516_v20 = vadd.f32 %v3504_v62, %v3440_v49  ;;  %v3517_v39 = vadd.f32 %v3505_v14, %v3441_v36 }
 0xa59   : > { %v3579_v31 = vmul.f32 %v3534_v18, %v6607_v24  ;;  %v3580_v7 = vmul.f32 %v3538_v44, %v6607_v24  ;;  %v3581_v40 = vmul.f32 %v7539_v60, %v6607_v24  ;;  %v3732_v9 = vmul.f32 %v7540_v46, %v6604_v59 }
 0xa5a   : > { %v7541_v18 = vrot.slane %v6408_v56, %v7538_v43  ;;  %v3518_v19 = vadd.f32 %v3506_v50, %v3442_v57  ;;  %v7542_v44 = vrot.slane %v6480_v25, %v7536_v47  ;;  %v3734_v62 = vmul.f32 %v7543_v52, %v6604_v59 }
 0xa5b   : > { %v3591_v8 = vadd.f32 %v3579_v31, %v3515_v10  ;;  %v3592_v32 = vadd.f32 %v3580_v7, %v3516_v20  ;;  %v3519_v22 = vadd.f32 %v3507_v6, %v3443_v54  ;;  %v3593_v14 = vadd.f32 %v3581_v40, %v3517_v39 }
 0xa5c   : > { %v3733_v0 = vmul.f32 %v7541_v18, %v6604_v59  ;;  %v3582_v27 = vmul.f32 %v7542_v44, %v6607_v24  ;;  %v3583_v35 = vmul.f32 %v3550_v23, %v6607_v24  ;;  %v3735_v30 = vmul.f32 %v3702_v63, %v6604_v59 }
 0xa5d   : > { %v6645_v50 = vpop.permute.xlu1 %3604  ;;  %v3368_v49 = vadd.f32 %v3356_v12, %v3292_v37  ;;  %v3508_v36 = vmul.f32 %v3478_v58, %v6567_v34  ;;  %v3554_v57 = vrot.slane %v6499_v48, %v7536_v47  ;;  %v3630_v10 = vrot.slane %v6499_v48, %v7537_v61 }
 0xa5e   : > { %v3594_v1 = vadd.f32 %v3582_v27, %v3518_v19  ;;  %v7544_v6 = vrot.slane %v6416_v33, %v7537_v61  ;;  %v7545_v63 = vrot.slane %v6423_v29, %v7537_v61  ;;  %v7546_v12 = vrot.slane %v6408_v56, %v7537_v61 }
 0xa5f   : > { %v7547_v20 = vrot.slane %v6480_v25, %v7537_v61  ;;  %v3595_v31 = vadd.f32 %v3583_v35, %v3519_v22  ;;  %v7548_v33 = vrot.slane %v6494_v53, %v7537_v61  ;;  %v3444_v39 = vadd.f32 %v3432_v38, %v3368_v49 }
 0xa60   : > { %v3655_v54 = vmul.f32 %v7544_v6, %v6645_v50  ;;  %v3656_v23 = vmul.f32 %v7545_v63, %v6645_v50  ;;  %v3657_v37 = vmul.f32 %v7546_v12, %v6645_v50  ;;  %v3584_v29 = vmul.f32 %v3554_v57, %v6607_v24 }
 0xa61   : > { %v3658_v58 = vmul.f32 %v7547_v20, %v6645_v50  ;;  %v3659_v7 = vmul.f32 %v7548_v33, %v6645_v50  ;;  %v3520_v19 = vadd.f32 %v3508_v36, %v3444_v39  ;;  %v3660_v44 = vmul.f32 %v3630_v10, %v6645_v50 }
 0xa62   : > { %v3667_v60 = vadd.f32 %v3655_v54, %v3591_v8  ;;  %v3668_v40 = vadd.f32 %v3656_v23, %v3592_v32  ;;  %v3669_v46 = vadd.f32 %v3657_v37, %v3593_v14  ;;  %v3706_v25 = vrot.slane %v6499_v48, %v7538_v43  ;;  %v6676_v27 = vpop.permute.xlu1 %3757 }
 0xa63   : > { %v3670_v18 = vadd.f32 %v3658_v58, %v3594_v1  ;;  %v3671_v56 = vadd.f32 %v3659_v7, %v3595_v31  ;;  %v3596_v49 = vadd.f32 %v3584_v29, %v3520_v19  ;;  %v3178_v8 = vrot.slane %v6539_v4, %v7531_v51 }
 0xa64   : > { %v3743_v52 = vadd.f32 %v3731_v42, %v3667_v60  ;;  %v3744_v22 = vadd.f32 %v3732_v9, %v3668_v40  ;;  %v3745_v53 = vadd.f32 %v3733_v0, %v3669_v46  ;;  %v3254_v32 = vrot.slane %v6539_v4, %v7532_v11 }
 0xa65   : > { %v3746_v35 = vadd.f32 %v3734_v62, %v3670_v18  ;;  %v3747_v38 = vadd.f32 %v3735_v30, %v3671_v56  ;;  %v3672_v42 = vadd.f32 %v3660_v44, %v3596_v49  ;;  %v3736_v9 = vmul.f32 %v3706_v25, %v6604_v59 }
 0xa66   : > { %v3760_v14 = vadd.f32 %v6676_v27, %v3743_v52  ;;  %v3761_v1 = vadd.f32 %v6676_v27, %v3744_v22  ;;  %v3762_v48 = vadd.f32 %v6676_v27, %v3745_v53  ;;  %v3205_v0 = vmul.f32 %v3178_v8, %v6398_v17 }
 0xa67   : > { %v3763_v36 = vadd.f32 %v6676_v27, %v3746_v35  ;;  %v3281_v62 = vmul.f32 %v3254_v32, %v6410_v55  ;;  %v3764_v6 = vadd.f32 %v6676_v27, %v3747_v38  ;;  %v6692_v54 = vadd.f32 %v6373_v13, %v6524_v3 }
 0xa68   : > { %v3772_v30 = vmax.f32 %v3760_v14, 0.0  ;;  %v3773_v57 = vmax.f32 %v3761_v1, 0.0  ;;  %v3774_v10 = vmax.f32 %v3762_v48, 0.0  ;;  %v3748_v63 = vadd.f32 %v3736_v9, %v3672_v42 }
 0xa69   : > { %v3293_v23 = vadd.f32 %v3281_v62, %v3205_v0  ;;  %v3330_v12 = vrot.slane %v6539_v4, %v7533_v21  ;;  %v6698_v37 = vadd.f32 %v6373_v13, %v6557_v28  ;;  %v3775_v31 = vmax.f32 %v3763_v36, 0.0 }
 0xa6a   : > { %v3808_v20 = vrot.slane %v3772_v30, 4  ;;  %v3809_v58 = vrot.slane %v3773_v57, 4  ;;  %v6702_v33 = vadd.f32 %v6373_v13, %v6563_v2  ;;  %v3765_v7 = vadd.f32 %v6676_v27, %v3748_v63 }
 0xa6b   : > { %v3357_v3 = vmul.f32 %v3330_v12, %v6526_v41  ;;  %v3406_v39 = vrot.slane %v6539_v4, %v7534_v26  ;;  %v6710_v29 = vadd.f32 %v6373_v13, %v6565_v15  ;;  %v3810_v28 = vrot.slane %v3774_v10, 4 }
 0xa6c   : > { %3820 = vrot.lane.b32.xlu1 %v3808_v20, %s7293_s16  ;;  %3822 = vrot.lane.b32.xlu0 %v3809_v58, %s7293_s16  ;;  %v3776_v60 = vmax.f32 %v3764_v6, 0.0  ;;  %v3482_v2 = vrot.slane %v6539_v4, %v7535_v5  ;;  %v3777_v40 = vmax.f32 %v3765_v7, 0.0  ;;  %v3558_v56 = vrot.slane %v6539_v4, %v7536_v47 }
 0xa6d   : > { %v3369_v46 = vadd.f32 %v3357_v3, %v3293_v23  ;;  %v3433_v18 = vmul.f32 %v3406_v39, %v6570_v45  ;;  %v3811_v19 = vrot.slane %v3775_v31, 4  ;;  %v3634_v13 = vrot.slane %v6539_v4, %v7537_v61 }
 0xa6e   : > { %v3710_v15 = vrot.slane %v6539_v4, %v7538_v43  ;;  %v3182_v44 = vrot.slane %v6692_v54, %v7531_v51  ;;  %v3509_v52 = vmul.f32 %v3482_v2, %v6567_v34  ;;  %v3585_v22 = vmul.f32 %v3558_v56, %v6607_v24 }
 0xa6f   : > { %v3445_v25 = vadd.f32 %v3433_v18, %v3369_v46  ;;  %v3258_v53 = vrot.slane %v6692_v54, %v7532_v11  ;;  %v3812_v35 = vrot.slane %v3776_v60, 4  ;;  %v3661_v38 = vmul.f32 %v3634_v13, %v6645_v50 }
 0xa70   : > { %3824 = vrot.lane.b32.xlu1 %v3810_v28, %s7293_s16  ;;  %3826 = vrot.lane.b32.xlu0 %v3811_v19, %s7293_s16  ;;  %v3206_v4 = vmul.f32 %v3182_v44, %v6398_v17  ;;  %v3334_v49 = vrot.slane %v6692_v54, %v7533_v21  ;;  %v3813_v8 = vrot.slane %v3777_v40, 4  ;;  %v3410_v1 = vrot.slane %v6692_v54, %v7534_v26 }
 0xa71   : > { %v3521_v32 = vadd.f32 %v3509_v52, %v3445_v25  ;;  %v3282_v14 = vmul.f32 %v3258_v53, %v6410_v55  ;;  %v3737_v48 = vmul.f32 %v3710_v15, %v6604_v59  ;;  %v3486_v42 = vrot.slane %v6692_v54, %v7535_v5 }
 0xa72   : > { %v3358_v36 = vmul.f32 %v3334_v49, %v6526_v41  ;;  %v3562_v9 = vrot.slane %v6692_v54, %v7536_v47  ;;  %v3434_v30 = vmul.f32 %v3410_v1, %v6570_v45  ;;  %v3638_v57 = vrot.slane %v6692_v54, %v7537_v61 }
 0xa73   : > { %v3597_v0 = vadd.f32 %v3585_v22, %v3521_v32  ;;  %v3294_v62 = vadd.f32 %v3282_v14, %v3206_v4  ;;  %v3510_v10 = vmul.f32 %v3486_v42, %v6567_v34  ;;  %v3714_v6 = vrot.slane %v6692_v54, %v7538_v43 }
 0xa74   : > { %3828 = vrot.lane.b32.xlu1 %v3812_v35, %s7293_s16  ;;  %3830 = vrot.lane.b32.xlu0 %v3813_v8, %s7293_s16  ;;  %v3186_v63 = vrot.slane %v6521_v16, %v7531_v51  ;;  %v3262_v20 = vrot.slane %v6521_v16, %v7532_v11  ;;  %v3338_v58 = vrot.slane %v6521_v16, %v7533_v21 }
 0xa75   : > { %v3673_v23 = vadd.f32 %v3661_v38, %v3597_v0  ;;  %v3370_v12 = vadd.f32 %v3358_v36, %v3294_v62  ;;  %v3586_v31 = vmul.f32 %v3562_v9, %v6607_v24  ;;  %v3662_v7 = vmul.f32 %v3638_v57, %v6645_v50 }
 0xa76   : > { %v3207_v3 = vmul.f32 %v3186_v63, %v6398_v17  ;;  %v3414_v54 = vrot.slane %v6521_v16, %v7534_v26  ;;  %v3283_v60 = vmul.f32 %v3262_v20, %v6410_v55  ;;  %v3490_v2 = vrot.slane %v6521_v16, %v7535_v5 }
 0xa77   : > { %v3749_v39 = vadd.f32 %v3737_v48, %v3673_v23  ;;  %v3446_v28 = vadd.f32 %v3434_v30, %v3370_v12  ;;  %v3738_v40 = vmul.f32 %v3714_v6, %v6604_v59  ;;  %v3359_v46 = vmul.f32 %v3338_v58, %v6526_v41 }
 0xa78   : > { %v3435_v18 = vmul.f32 %v3414_v54, %v6570_v45  ;;  %v3566_v56 = vrot.slane %v6521_v16, %v7536_v47  ;;  %v3295_v15 = vadd.f32 %v3283_v60, %v3207_v3  ;;  %v3511_v44 = vmul.f32 %v3490_v2, %v6567_v34 }
 0xa79   : > { %v3766_v19 = vadd.f32 %v6676_v27, %v3749_v39  ;;  %v3522_v13 = vadd.f32 %v3510_v10, %v3446_v28  ;;  %v3190_v52 = vrot.slane %v6702_v33, %v7531_v51  ;;  %v3266_v22 = vrot.slane %v6702_v33, %v7532_v11 }
 0xa7a   : > { %v3587_v25 = vmul.f32 %v3566_v56, %v6607_v24  ;;  %v3342_v53 = vrot.slane %v6702_v33, %v7533_v21  ;;  %v3371_v4 = vadd.f32 %v3359_v46, %v3295_v15  ;;  %v3642_v49 = vrot.slane %v6521_v16, %v7537_v61 }
 0xa7b   : > { %v3778_v35 = vmax.f32 %v3766_v19, 0.0  ;;  %v3598_v38 = vadd.f32 %v3586_v31, %v3522_v13  ;;  %v3718_v8 = vrot.slane %v6521_v16, %v7538_v43  ;;  %v3208_v32 = vmul.f32 %v3190_v52, %v6398_v17 }
 0xa7c   : > { %v3284_v14 = vmul.f32 %v3266_v22, %v6410_v55  ;;  %v3418_v1 = vrot.slane %v6702_v33, %v7534_v26  ;;  %v3447_v42 = vadd.f32 %v3435_v18, %v3371_v4  ;;  %v3494_v9 = vrot.slane %v6702_v33, %v7535_v5 }
 0xa7d   : > { %v3814_v48 = vrot.slane %v3778_v35, 4  ;;  %v3674_v36 = vadd.f32 %v3662_v7, %v3598_v38  ;;  %v3663_v0 = vmul.f32 %v3642_v49, %v6645_v50  ;;  %v3739_v62 = vmul.f32 %v3718_v8, %v6604_v59 }
 0xa7e   : > { %v3296_v30 = vadd.f32 %v3284_v14, %v3208_v32  ;;  %v3360_v16 = vmul.f32 %v3342_v53, %v6526_v41  ;;  %v3523_v10 = vadd.f32 %v3511_v44, %v3447_v42  ;;  %v3436_v6 = vmul.f32 %v3418_v1, %v6570_v45 }
 0xa7f   : > { %3832 = vrot.lane.b32.xlu1 %v3814_v48, %s7293_s16  ;;  %v3750_v57 = vadd.f32 %v3738_v40, %v3674_v36  ;;  %v3570_v63 = vrot.slane %v6702_v33, %v7536_v47  ;;  %v3646_v12 = vrot.slane %v6702_v33, %v7537_v61  ;;  %v3722_v20 = vrot.slane %v6702_v33, %v7538_v43 }
 0xa80   : > { %v3372_v23 = vadd.f32 %v3360_v16, %v3296_v30  ;;  %v3194_v58 = vrot.slane %v6710_v29, %v7531_v51  ;;  %v3599_v7 = vadd.f32 %v3587_v25, %v3523_v10  ;;  %v3512_v3 = vmul.f32 %v3494_v9, %v6567_v34 }
 0xa81   : > { %v3767_v31 = vadd.f32 %v6676_v27, %v3750_v57  ;;  %v3270_v54 = vrot.slane %v6710_v29, %v7532_v11  ;;  %v3346_v60 = vrot.slane %v6710_v29, %v7533_v21  ;;  %v3422_v33 = vrot.slane %v6710_v29, %v7534_v26 }
 0xa82   : > { %v3448_v39 = vadd.f32 %v3436_v6, %v3372_v23  ;;  %v3209_v28 = vmul.f32 %v3194_v58, %v6398_v17  ;;  %v3675_v40 = vadd.f32 %v3663_v0, %v3599_v7  ;;  %v3498_v18 = vrot.slane %v6710_v29, %v7535_v5 }
 0xa83   : > { %v3779_v2 = vmax.f32 %v3767_v31, 0.0  ;;  %v3285_v46 = vmul.f32 %v3270_v54, %v6410_v55  ;;  %v3588_v19 = vmul.f32 %v3570_v63, %v6607_v24  ;;  %v3664_v13 = vmul.f32 %v3646_v12, %v6645_v50 }
 0xa84   : > { %v3524_v56 = vadd.f32 %v3512_v3, %v3448_v39  ;;  %v3740_v15 = vmul.f32 %v3722_v20, %v6604_v59  ;;  %v3751_v25 = vadd.f32 %v3739_v62, %v3675_v40  ;;  %v3361_v22 = vmul.f32 %v3346_v60, %v6526_v41 }
 0xa85   : > { %v3815_v44 = vrot.slane %v3779_v2, 4  ;;  %v3297_v52 = vadd.f32 %v3285_v46, %v3209_v28  ;;  %v3437_v35 = vmul.f32 %v3422_v33, %v6570_v45  ;;  %v3513_v38 = vmul.f32 %v3498_v18, %v6567_v34 }
 0xa86   : > { %v3600_v53 = vadd.f32 %v3588_v19, %v3524_v56  ;;  %v3574_v4 = vrot.slane %v6710_v29, %v7536_v47  ;;  %v3768_v49 = vadd.f32 %v6676_v27, %v3751_v25  ;;  %v3198_v32 = vrot.slane %v6698_v37, %v7531_v51  ;;  %v287_v56 = vld [vmem:[%s4228_s23] sm:$0xff] }
 0xa87   : > { %3834 = vrot.lane.b32.xlu0 %v3815_v44, %s7293_s16  ;;  %v3373_v8 = vadd.f32 %v3361_v22, %v3297_v52  ;;  %v3274_v14 = vrot.slane %v6698_v37, %v7532_v11  ;;  %v3650_v36 = vrot.slane %v6710_v29, %v7537_v61  ;;  %v3350_v42 = vrot.slane %v6698_v37, %v7533_v21 }
 0xa88   : > { %v3676_v1 = vadd.f32 %v3664_v13, %v3600_v53  ;;  %v3589_v48 = vmul.f32 %v3574_v4, %v6607_v24  ;;  %v3780_v9 = vmax.f32 %v3768_v49, 0.0  ;;  %v3210_v62 = vmul.f32 %v3198_v32, %v6398_v17  ;;  %v289_v13 = vld [vmem:[%s4228_s23 + $0x10] sm:$0xff] }
 0xa89   : > { %v3449_v0 = vadd.f32 %v3437_v35, %v3373_v8  ;;  %v3286_v30 = vmul.f32 %v3274_v14, %v6410_v55  ;;  %v3726_v51 = vrot.slane %v6710_v29, %v7538_v43  ;;  %v3362_v11 = vmul.f32 %v3350_v42, %v6526_v41  ;;  %v291_v14 = vld [vmem:[%s4228_s23 + $0x20] sm:$0xff] }
 0xa8a   : > { %v3752_v16 = vadd.f32 %v3740_v15, %v3676_v1  ;;  %v3426_v57 = vrot.slane %v6698_v37, %v7534_v26  ;;  %v3816_v10 = vrot.slane %v3780_v9, 4  ;;  %v3502_v21 = vrot.slane %v6698_v37, %v7535_v5 }
 0xa8b   : > { %v3525_v6 = vadd.f32 %v3513_v38, %v3449_v0  ;;  %v3298_v63 = vadd.f32 %v3286_v30, %v3210_v62  ;;  %v3665_v55 = vmul.f32 %v3650_v36, %v6645_v50  ;;  %v3741_v20 = vmul.f32 %v3726_v51, %v6604_v59  ;;  %v293_v51 = vld [vmem:[%s4228_s23 + $0x30] sm:$0xff] }
 0xa8c   : > { %v3769_v23 = vadd.f32 %v6676_v27, %v3752_v16  ;;  %3836 = vrot.lane.b32.xlu1 %v3816_v10, %s7293_s16  ;;  %v3438_v29 = vmul.f32 %v3426_v57, %v6570_v45  ;;  %v3578_v26 = vrot.slane %v6698_v37, %v7536_v47  ;;  %v3514_v5 = vmul.f32 %v3502_v21, %v6567_v34 }
 0xa8d   : > { %v3601_v17 = vadd.f32 %v3589_v48, %v3525_v6  ;;  %v3374_v12 = vadd.f32 %v3362_v11, %v3298_v63  ;;  %v3654_v7 = vrot.slane %v6698_v37, %v7537_v61  ;;  %v3730_v34 = vrot.slane %v6698_v37, %v7538_v43 }
 0xa8e   : > { %v3781_v41 = vmax.f32 %v3769_v23, 0.0  ;;  %v3590_v28 = vmul.f32 %v3578_v26, %v6607_v24  ;;  %v3788_v37 = vcombine.high %v287_v56, %v287_v56  ;;  %v3789_v22 = vcombine.high %v289_v13, %v289_v13 }
 0xa8f   : > { %v3677_v58 = vadd.f32 %v3665_v55, %v3601_v17  ;;  %v3450_v31 = vadd.f32 %v3438_v29, %v3374_v12  ;;  %v3666_v45 = vmul.f32 %v3654_v7, %v6645_v50  ;;  %v3742_v61 = vmul.f32 %v3730_v34, %v6604_v59 }
 0xa90   : > { %v3817_v3 = vrot.slane %v3781_v41, 4  ;;  %v3790_v42 = vcombine.high %v291_v14, %v291_v14  ;;  %v3791_v10 = vcombine.high %v293_v51, %v293_v51 }
 0xa91   : > { %v3753_v54 = vadd.f32 %v3741_v20, %v3677_v58  ;;  %v3526_v39 = vadd.f32 %v3514_v5, %v3450_v31 }
 0xa92   : > { %3838 = vrot.lane.b32.xlu0 %v3817_v3, %s7293_s16 }
 0xa93   : > { %v3770_v60 = vadd.f32 %v6676_v27, %v3753_v54  ;;  %v3602_v47 = vadd.f32 %v3590_v28, %v3526_v39 }
 0xa95   : > { %v3782_v33 = vmax.f32 %v3770_v60, 0.0  ;;  %v3678_v2 = vadd.f32 %v3666_v45, %v3602_v47 }
 0xa97   : > { %v3818_v40 = vrot.slane %v3782_v33, 4  ;;  %v3754_v46 = vadd.f32 %v3742_v61, %v3678_v2 }
 0xa99   : > { %3840 = vrot.lane.b32.xlu1 %v3818_v40, %s7293_s16  ;;  %v3771_v24 = vadd.f32 %v6676_v27, %v3754_v46 }
 0xa9b   : > { %v3783_v50 = vmax.f32 %v3771_v24, 0.0 }
 0xa9d   : > { %v3819_v18 = vrot.slane %v3783_v50, 4 }
 0xa9f   : > { %3842 = vrot.lane.b32.xlu0 %v3819_v18, %s7293_s16 }
 0xade   : > { %v3821_v19 = vpop.permute.xlu1 %3820  ;;  %v3823_v43 = vpop.permute.xlu0 %3822 }
 0xadf   : > { %v3844_v59 = vsel %vm7550_vm7, %v3821_v19, %v3823_v43 }
 0xae0   : > { %v3861_v27 = vsel %vm3860_vm3, %v287_v56, %v3844_v59 }
 0xae1   : > { %3869 = vst [vmem:[%s6869_s17] sm:$0xff] %v3861_v27 }
 0xae2   : > { %v3825_v15 = vpop.permute.xlu1 %3824  ;;  %v3827_v44 = vpop.permute.xlu0 %3826 }
 0xae3   : > { %v3845_v25 = vsel %vm7551_vm8, %v3823_v43, %v3825_v15 }
 0xae4   : > { %v3862_v52 = vsel %vm3860_vm3, %v3788_v37, %v3845_v25 }
 0xae5   : > { %3870 = vst [vmem:[%s6869_s17 + $0x8] sm:$0xff] %v3862_v52 }
 0xae6   : > { %v3829_v53 = vpop.permute.xlu1 %3828  ;;  %v3831_v35 = vpop.permute.xlu0 %3830 }
 0xae7   : > { %v3846_v38 = vsel %vm7552_vm9, %v3827_v44, %v3829_v53  ;;  %v3847_v4 = vsel %vm7553_vm11, %v3829_v53, %v3831_v35 }
 0xae8   : > { %v3863_v49 = vsel %vm3860_vm3, %v289_v13, %v3846_v38  ;;  %v3864_v8 = vsel %vm3860_vm3, %v3789_v22, %v3847_v4 }
 0xae9   : > { %3871 = vst [vmem:[%s6869_s17 + $0x10] sm:$0xff] %v3863_v49  ;;  %3872 = vst [vmem:[%s6869_s17 + $0x18] sm:$0xff] %v3864_v8 }
 0xaf1   : > { %v3833_v32 = vpop.permute.xlu1 %3832 }
 0xaf9   : > { %v3835_v1 = vpop.permute.xlu0 %3834 }
 0xafa   : > { %v3848_v48 = vsel %vm7554_vm1, %v3833_v32, %v3835_v1 }
 0xafb   : > { %v3865_v36 = vsel %vm3860_vm3, %v291_v14, %v3848_v48 }
 0xafc   : > { %3873 = vst [vmem:[%s6869_s17 + $0x20] sm:$0xff] %v3865_v36 }
 0xafe   : > { %v3837_v9 = vpop.permute.xlu1 %3836 }
 0xaff   : > { %v3849_v0 = vsel %vm7555_vm4, %v3835_v1, %v3837_v9 }
 0xb00   : > { %v3866_v62 = vsel %vm3860_vm3, %v3790_v42, %v3849_v0 }
 0xb01   : > { %3874 = vst [vmem:[%s6869_s17 + $0x28] sm:$0xff] %v3866_v62 }
 0xb04   : > { %v3839_v30 = vpop.permute.xlu0 %3838 }
 0xb0b   : > { %v3841_v16 = vpop.permute.xlu1 %3840 }
 0xb0c   : > { %v3850_v11 = vsel %vm7556_vm5, %v3839_v30, %v3841_v16 }
 0xb0d   : > { %v3867_v57 = vsel %vm3860_vm3, %v293_v51, %v3850_v11 }
 0xb0e   : > { %3875 = vst [vmem:[%s6869_s17 + $0x30] sm:$0xff] %v3867_v57 }
 0xb11   : > { %v3843_v6 = vpop.permute.xlu0 %3842 }
 0xb12   : > { %v3851_v63 = vsel %vm7557_vm10, %v3841_v16, %v3843_v6 }
 0xb13   : > { %v3868_v21 = vsel %vm3860_vm3, %v3791_v10, %v3851_v63 }
 0xb14   : > { %3876 = vst [vmem:[%s6869_s17 + $0x38] sm:$0xff] %v3868_v21 }
 0xb15 PF: > { %s17_s24 = sadd.s32 1, %s4069_s24  }
 0xb16   : > { %p14_p4 = scmp.ge.s32.totalorder %s17_s24, 4  }
 0xb18   :  { %16 = sbr.rel (!%p14_p4) target bundleno = 1 (0x1), region = 104 }

</bundles_post_ra>
